<compile_context>
chip_gen: v6e
topology: v6e:2x2x1
jax: 0.10.0
libtpu: 0.0.40
codegen_flags: <defaults>
</compile_context>

<pallas_src>
import functools

import jax
import jax.numpy as jnp
import numpy as np
from jax import lax
from jax.experimental import pallas as pl
from jax.experimental.pallas import tpu as pltpu


H1, W1 = 32, 32      # stage-1 spatial size
H2, W2 = 16, 16      # after first 2x2 pool
H3, W3 = 8, 8        # after second 2x2 pool
C1, C2 = 8, 16       # channel counts
OUT_LANES = 128      # lane-padded width of the heads output


# ----------------------------------------------------------------------------
# Fused Pallas kernel (one grid step = B images stacked along the row axis)
# ----------------------------------------------------------------------------
def _fused_kernel(x_ref,
                  m11_ref, b11_ref, m12_ref, b12_ref, q1_ref, e1_ref,
                  m21_ref, b21_ref, m22_ref, b22_ref, q2_ref, e2_ref,
                  gsel_ref, wh_ref, bh_ref,
                  eps_ref, out_ref, *, latent):
    f32 = jnp.float32
    bf16 = jnp.bfloat16

    def conv(x, m_ref, b_ref, img_h):
        # x: (B*img_h, W*Ci); m_ref: (3*W*Ci, W*Co) K-concatenated band matrix.
        rows = x.shape[0]
        r = lax.broadcasted_iota(jnp.int32, (rows, 1), 0)
        up = jnp.where(r % img_h == 0, 0.0, pltpu.roll(x, 1, axis=0))          # x[y-1]
        dn = jnp.where(r % img_h == img_h - 1, 0.0,
                       pltpu.roll(x, rows - 1, axis=0))                        # x[y+1]
        xc = jnp.concatenate([up, x, dn], axis=1).astype(bf16)                 # (rows, 3*W*Ci)
        z = jnp.dot(xc, m_ref[...], preferred_element_type=f32)
        return jnp.maximum(z + b_ref[...], 0.0)

    def pool(h, e_ref, q_ref):
        # h: (B*H, W*C).  Row pairs never straddle images (H is even).
        rows = h.shape[0]
        half = q_ref.shape[1] // 2
        rmax = jnp.maximum(h, pltpu.roll(h, rows - 1, axis=0))                 # max(h[r], h[r+1])
        rsel = jnp.dot(e_ref[...], rmax.astype(bf16),
                       preferred_element_type=f32)                             # even rows only
        cb = jnp.dot(rsel.astype(bf16), q_ref[...],
                     preferred_element_type=f32)                               # [even-x | odd-x]
        return jnp.maximum(cb[:, :half], cb[:, half:])

    x = x_ref[0]                                    # (B*32, 32)   rows = b*32 + y
    h = conv(x, m11_ref, b11_ref, H1)               # (B*32, 256)  lanes = x*8 + c
    h = conv(h, m12_ref, b12_ref, H1)               # (B*32, 256)
    h = pool(h, e1_ref, q1_ref)                     # (B*16, 128)
    h = conv(h, m21_ref, b21_ref, H2)               # (B*16, 256)  lanes = x*16 + c
    h = conv(h, m22_ref, b22_ref, H2)               # (B*16, 256)
    h = pool(h, e2_ref, q2_ref)                     # (B*8, 128)

    # Heads: gather each image's 8 rows into one 1024-lane feature row via tiny
    # 0/1 selection matmuls, then one K=1024 dot produces [mu | log_sigma | 0..].
    hb = h.astype(bf16)
    feat = jnp.concatenate(
        [jnp.dot(gsel_ref[y], hb, preferred_element_type=f32) for y in range(H3)],
        axis=1).astype(bf16)                                                    # (B, 1024)
    acc = jnp.dot(feat, wh_ref[...], preferred_element_type=f32) + bh_ref[...]  # (B, 128)

    # Reparameterization + one unmasked full-lane store: [mu | ls | z | 0...].
    mu = acc[:, 0:latent]
    ls = acc[:, latent:2 * latent]
    z = mu + jnp.exp(ls) * eps_ref[0]
    out_ref[0] = jnp.concatenate([acc[:, :2 * latent], z, acc[:, 3 * latent:]],
                                 axis=1)


# ----------------------------------------------------------------------------
# One-time weight transforms (plain JAX / numpy, outside the hot path)
# ----------------------------------------------------------------------------
def _conv_band_mat(w, width):
    """PyTorch conv weight (Co,Ci,3,3) -> K-concat banded matrix (3*W*Ci, W*Co)."""
    co, ci = w.shape[0], w.shape[1]
    wt = jnp.transpose(w, (2, 3, 1, 0)).astype(jnp.float32)        # (ky, kx, Ci, Co)
    xin = np.arange(width)[:, None]
    xout = np.arange(width)[None, :]
    ind = np.stack([(xin == xout + (kx - 1)) for kx in range(3)],
                   axis=0).astype(np.float32)                       # (3, W, W)
    mats = []
    for ky in range(3):
        m = jnp.einsum("kab,kio->aibo", jnp.asarray(ind), wt[ky])   # (W, Ci, W, Co)
        mats.append(m.reshape(width * ci, width * co))
    return jnp.concatenate(mats, axis=0).astype(jnp.bfloat16)       # rows: [up | mid | dn]


def _pool_col_mat(w, c):
    """Column-pair selectors for 2x2 pool, stacked along output lanes: (W*C, 2*Wo*C)."""
    wo = w // 2
    cin = np.arange(w * c)[:, None]
    cout = np.arange(wo * c)[None, :]
    xo, ch = cout // c, cout % c
    a = (cin == 2 * xo * c + ch).astype(np.float32)
    b = (cin == (2 * xo + 1) * c + ch).astype(np.float32)
    return jnp.asarray(np.concatenate([a, b], axis=1), dtype=jnp.bfloat16)


def prepare_params(params, latent_dim):
    """Turn PyTorch-shaped weights into the kernel's matmul operands (done once)."""
    assert 3 * latent_dim <= OUT_LANES, "latent_dim too large for lane-packed output"
    l2 = 2 * latent_dim
    wcat = jnp.concatenate([params["wmu"], params["wls"]], axis=0)    # (2L, 1024)
    wh = jnp.transpose(wcat.reshape(l2, C2, H3, W3), (2, 3, 1, 0))    # (H3, W3, C2, 2L)
    wh = wh.reshape(H3 * W3 * C2, l2).astype(jnp.float32)             # (1024, 2L)
    wh = jnp.pad(wh, ((0, 0), (0, OUT_LANES - l2))).astype(jnp.bfloat16)
    bh = jnp.pad(jnp.concatenate([params["bmu"], params["bls"]]).astype(jnp.float32),
                 (0, OUT_LANES - l2)).reshape(1, OUT_LANES)
    tile = lambda b, w: jnp.tile(b.astype(jnp.float32), w).reshape(1, -1)
    return {
        "m11": _conv_band_mat(params["w11"], W1), "b11": tile(params["b11"], W1),
        "m12": _conv_band_mat(params["w12"], W1), "b12": tile(params["b12"], W1),
        "m21": _conv_band_mat(params["w21"], W2), "b21": tile(params["b21"], W2),
        "m22": _conv_band_mat(params["w22"], W2), "b22": tile(params["b22"], W2),
        "q1": _pool_col_mat(W1, C1), "q2": _pool_col_mat(W2, C2),
        "wh": wh, "bh": bh,
    }


def _idx2(i):
    return (0, 0)


def _idx3(i):
    return (0, 0, 0)


def _const_spec(a):
    return pl.BlockSpec(a.shape, _idx2 if a.ndim == 2 else _idx3)


@jax.jit
def vae_encoder_forward(x_nchw, prepped, eps):
    n = x_nchw.shape[0]
    latent = eps.shape[-1]
    assert 3 * latent <= OUT_LANES

    bsz = max(1, min(8, -(-n // 2)))        # images per grid step; grid >= 2 for v7x
    n_pad = -(-n // bsz) * bsz
    groups = n_pad // bsz

    x = x_nchw.astype(jnp.float32).reshape(n, H1, W1)          # Cin == 1
    x = jnp.pad(x, ((0, n_pad - n), (0, 0), (0, 0)))
    x = x.reshape(groups, bsz * H1, W1)

    e = jnp.pad(eps.astype(jnp.float32), ((0, n_pad - n), (0, 0)))
    e = e.reshape(groups, bsz, latent)

    # Batch-size-dependent 0/1 selection matrices (trace-time constants, bf16-exact).
    r1 = np.arange(bsz * H2)[:, None]
    e1 = jnp.asarray(np.arange(bsz * H1)[None, :] == 2 * r1, dtype=jnp.bfloat16)
    r2 = np.arange(bsz * H3)[:, None]
    e2 = jnp.asarray(np.arange(bsz * H2)[None, :] == 2 * r2, dtype=jnp.bfloat16)
    yy = np.arange(H3)[:, None, None]
    bb = np.arange(bsz)[None, :, None]
    mm = np.arange(bsz * H3)[None, None, :]
    gsel = jnp.asarray(mm == H3 * bb + yy, dtype=jnp.bfloat16)   # (8, B, B*8)

    p = prepped
    consts = (p["m11"], p["b11"], p["m12"], p["b12"], p["q1"], e1,
              p["m21"], p["b21"], p["m22"], p["b22"], p["q2"], e2,
              gsel, p["wh"], p["bh"])

    kernel = functools.partial(_fused_kernel, latent=latent)
    out = pl.pallas_call(
        kernel,
        out_shape=jax.ShapeDtypeStruct((groups, bsz, OUT_LANES), jnp.float32),
        grid=(groups,),
        in_specs=[pl.BlockSpec((1, bsz * H1, W1), lambda i: (i, 0, 0))]
                 + [_const_spec(a) for a in consts]
                 + [pl.BlockSpec((1, bsz, latent), lambda i: (i, 0, 0))],
        out_specs=pl.BlockSpec((1, bsz, OUT_LANES), lambda i: (i, 0, 0)),
        compiler_params=pltpu.CompilerParams(
            dimension_semantics=("parallel",),      # shards grid over v7x's 2 TCs
            vmem_limit_bytes=32 * 1024 * 1024),
    )(x, *consts, e)

    res = out.reshape(n_pad, OUT_LANES)[:n]
    return (res[:, 0:latent], res[:, latent:2 * latent],
            res[:, 2 * latent:3 * latent])


# ----------------------------------------------------------------------------
# Pure-JAX reference (correctness sanity check)
# ----------------------------------------------------------------------------
def reference_forward(x, params, eps):
    def conv(x, w, b):
        y = lax.conv_general_dilated(
            x, w, window_strides=(1, 1), padding="SAME",
            dimension_numbers=("NCHW", "OIHW", "NCHW"))
        return jnp.maximum(y + b[None, :, None, None], 0.0)

    def pool(x):
        return lax.reduce_window(x, -jnp.inf, lax.max,
                                 (1, 1, 2, 2), (1, 1, 2, 2), "VALID")

    h = conv(x, params["w11"], params["b11"])
    h = conv(h, params["w12"], params["b12"])
    h = pool(h)
    h = conv(h, params["w21"], params["b21"])
    h = conv(h, params["w22"], params["b22"])
    h = pool(h)
    f = h.reshape(h.shape[0], -1)
    mu = f @ params["wmu"].T + params["bmu"]
    ls = f @ params["wls"].T + params["bls"]
    z = mu + jnp.exp(ls) * eps
    return mu, ls, z


# ----------------------------------------------------------------------------
# Deterministic parameter init (synthetic weights, PyTorch shapes)
# ----------------------------------------------------------------------------
def init_params(key, latent_dim=2):
    ks = jax.random.split(key, 12)
    n = lambda k, s, sc: (sc * jax.random.normal(k, s, jnp.float32))
    return {
        "w11": n(ks[0], (8, 1, 3, 3), 0.2),    "b11": n(ks[1], (8,), 0.1),
        "w12": n(ks[2], (8, 8, 3, 3), 0.1),    "b12": n(ks[3], (8,), 0.1),
        "w21": n(ks[4], (16, 8, 3, 3), 0.1),   "b21": n(ks[5], (16,), 0.1),
        "w22": n(ks[6], (16, 16, 3, 3), 0.08), "b22": n(ks[7], (16,), 0.1),
        "wmu": n(ks[8], (latent_dim, 16 * 8 * 8), 0.05),
        "bmu": n(ks[9], (latent_dim,), 0.1),
        "wls": n(ks[10], (latent_dim, 16 * 8 * 8), 0.05),
        "bls": n(ks[11], (latent_dim,), 0.1),
    }


if __name__ == "__main__":
    latent_dim = 2
    key = jax.random.PRNGKey(0)
    kx, kp, ke = jax.random.split(key, 3)

    # 32x32 single-channel input is what the flatten dim (16*8*8=1024) implies.
    # batch=4 -> 2 images per grid step, 2 grid steps (exercises the batched
    # row-stacking, image-boundary masks and both TensorCores on v7x).
    x = jax.random.normal(kx, (4, 1, 32, 32), jnp.float32)
    params = init_params(kp, latent_dim)
    # TODO(synk): torch.distributions.MultivariateNormal sampling has no Pallas
    # equivalent; standard-normal epsilons are drawn with jax.random here and
    # the reparameterization z = mu + exp(log_sigma)*eps is done in-kernel.
    eps = jax.random.normal(ke, (4, latent_dim), jnp.float32)

    prepped = prepare_params(params, latent_dim)      # one-time weight transform
    mu, log_sigma, z = vae_encoder_forward(x, prepped, eps)
    jax.block_until_ready((mu, log_sigma, z))

    mu_r, ls_r, z_r = reference_forward(x, params, eps)
    # Tolerances account for bfloat16 MXU operands (per perf review); a
    # structural error would produce O(1) mismatches.
    np.testing.assert_allclose(np.asarray(mu), np.asarray(mu_r), atol=3e-2, rtol=3e-2)
    np.testing.assert_allclose(np.asarray(log_sigma), np.asarray(ls_r), atol=3e-2, rtol=3e-2)
    np.testing.assert_allclose(np.asarray(z), np.asarray(z_r), atol=8e-2, rtol=5e-2)

    print("KERNEL_OK")
</pallas_src>

<mosaic_0001>
module attributes {stable_mosaic.version = 11 : i64} {
  func.func @_fused_kernel(%arg0: i32, %arg1: memref<1x64x32xf32, #tpu.memory_space<vmem>>, %arg2: memref<96x256xbf16, #tpu.memory_space<vmem>>, %arg3: memref<1x256xf32, #tpu.memory_space<vmem>>, %arg4: memref<768x256xbf16, #tpu.memory_space<vmem>>, %arg5: memref<1x256xf32, #tpu.memory_space<vmem>>, %arg6: memref<256x256xbf16, #tpu.memory_space<vmem>>, %arg7: memref<32x64xbf16, #tpu.memory_space<vmem>>, %arg8: memref<384x256xbf16, #tpu.memory_space<vmem>>, %arg9: memref<1x256xf32, #tpu.memory_space<vmem>>, %arg10: memref<768x256xbf16, #tpu.memory_space<vmem>>, %arg11: memref<1x256xf32, #tpu.memory_space<vmem>>, %arg12: memref<256x256xbf16, #tpu.memory_space<vmem>>, %arg13: memref<16x32xbf16, #tpu.memory_space<vmem>>, %arg14: memref<8x2x16xbf16, #tpu.memory_space<vmem>>, %arg15: memref<1024x128xbf16, #tpu.memory_space<vmem>>, %arg16: memref<1x128xf32, #tpu.memory_space<vmem>>, %arg17: memref<1x2x2xf32, #tpu.memory_space<vmem>>, %arg18: memref<1x2x128xf32, #tpu.memory_space<vmem>>) attributes {dimension_semantics = [#tpu.dimension_semantics<parallel>], iteration_bounds = array<i64: 2>, scalar_prefetch = 0 : i64, scratch_operands = 0 : i64, tpu.core_type = #tpu.core_type<tc>, window_params = [{transform_indices = @transform_0, window_bounds = array<i64: 1, 64, 32>}, {pipeline_mode = #tpu.pipeline_mode<synchronous>, transform_indices = @transform_1, window_bounds = array<i64: 96, 256>}, {pipeline_mode = #tpu.pipeline_mode<synchronous>, transform_indices = @transform_2, window_bounds = array<i64: 1, 256>}, {pipeline_mode = #tpu.pipeline_mode<synchronous>, transform_indices = @transform_3, window_bounds = array<i64: 768, 256>}, {pipeline_mode = #tpu.pipeline_mode<synchronous>, transform_indices = @transform_4, window_bounds = array<i64: 1, 256>}, {pipeline_mode = #tpu.pipeline_mode<synchronous>, transform_indices = @transform_5, window_bounds = array<i64: 256, 256>}, {pipeline_mode = #tpu.pipeline_mode<synchronous>, transform_indices = @transform_6, window_bounds = array<i64: 32, 64>}, {pipeline_mode = #tpu.pipeline_mode<synchronous>, transform_indices = @transform_7, window_bounds = array<i64: 384, 256>}, {pipeline_mode = #tpu.pipeline_mode<synchronous>, transform_indices = @transform_8, window_bounds = array<i64: 1, 256>}, {pipeline_mode = #tpu.pipeline_mode<synchronous>, transform_indices = @transform_9, window_bounds = array<i64: 768, 256>}, {pipeline_mode = #tpu.pipeline_mode<synchronous>, transform_indices = @transform_10, window_bounds = array<i64: 1, 256>}, {pipeline_mode = #tpu.pipeline_mode<synchronous>, transform_indices = @transform_11, window_bounds = array<i64: 256, 256>}, {pipeline_mode = #tpu.pipeline_mode<synchronous>, transform_indices = @transform_12, window_bounds = array<i64: 16, 32>}, {pipeline_mode = #tpu.pipeline_mode<synchronous>, transform_indices = @transform_13, window_bounds = array<i64: 8, 2, 16>}, {pipeline_mode = #tpu.pipeline_mode<synchronous>, transform_indices = @transform_14, window_bounds = array<i64: 1024, 128>}, {pipeline_mode = #tpu.pipeline_mode<synchronous>, transform_indices = @transform_15, window_bounds = array<i64: 1, 128>}, {transform_indices = @transform_16, window_bounds = array<i64: 1, 2, 2>}, {transform_indices = @transform_17, window_bounds = array<i64: 1, 2, 128>}]} {
    %c0 = arith.constant 0 : index
    %c0_0 = arith.constant 0 : index
    %c0_1 = arith.constant 0 : index
    %0 = vector.load %arg1[%c0, %c0_0, %c0_1] : memref<1x64x32xf32, #tpu.memory_space<vmem>>, vector<1x64x32xf32>
    %1 = vector.shape_cast %0 : vector<1x64x32xf32> to vector<64x32xf32>
    %2 = tpu.iota {dimensions = array<i32: 0>} : vector<64x1xi32>
    %c32_i32 = arith.constant 32 : i32
    %c0_i32 = arith.constant 0 : i32
    %3 = arith.cmpi eq, %c32_i32, %c0_i32 : i32
    %c1_i32 = arith.constant 1 : i32
    %4 = arith.select %3, %c1_i32, %c32_i32 : i32
    %5 = vector.broadcast %4 : i32 to vector<64x1xi32>
    %6 = arith.remsi %2, %5 : vector<64x1xi32>
    %c0_i32_2 = arith.constant 0 : i32
    %7 = vector.broadcast %c0_i32_2 : i32 to vector<64x1xi32>
    %8 = arith.cmpi ne, %6, %7 : vector<64x1xi32>
    %c0_i32_3 = arith.constant 0 : i32
    %9 = vector.broadcast %c0_i32_3 : i32 to vector<64x1xi32>
    %10 = arith.cmpi slt, %6, %9 : vector<64x1xi32>
    %c0_i32_4 = arith.constant 0 : i32
    %11 = arith.cmpi slt, %4, %c0_i32_4 : i32
    %12 = vector.broadcast %11 : i1 to vector<64x1xi1>
    %13 = vector.broadcast %12 : vector<64x1xi1> to vector<64x1xi1>
    %14 = arith.xori %10, %13 : vector<64x1xi1>
    %15 = arith.andi %14, %8 : vector<64x1xi1>
    %16 = vector.broadcast %4 : i32 to vector<64x1xi32>
    %17 = arith.addi %6, %16 : vector<64x1xi32>
    %18 = arith.select %15, %17, %6 : vector<64x1xi1>, vector<64x1xi32>
    %c0_i32_5 = arith.constant 0 : i32
    %19 = vector.broadcast %c0_i32_5 : i32 to vector<64x1xi32>
    %20 = arith.cmpi eq, %18, %19 : vector<64x1xi32>
    %c1_i32_6 = arith.constant 1 : i32
    %21 = tpu.dynamic_rotate %1 by %c1_i32_6 dim 0 : vector<64x32xf32>, i32 -> vector<64x32xf32>
    %cst = arith.constant 0.000000e+00 : f32
    %22 = vector.shape_cast %20 : vector<64x1xi1> to vector<64x1xi1>
    %23 = vector.broadcast %22 : vector<64x1xi1> to vector<64x32xi1>
    %24 = vector.broadcast %cst : f32 to vector<64x32xf32>
    %25 = arith.select %23, %24, %21 : vector<64x32xi1>, vector<64x32xf32>
    %c32_i32_7 = arith.constant 32 : i32
    %c0_i32_8 = arith.constant 0 : i32
    %26 = arith.cmpi eq, %c32_i32_7, %c0_i32_8 : i32
    %c1_i32_9 = arith.constant 1 : i32
    %27 = arith.select %26, %c1_i32_9, %c32_i32_7 : i32
    %28 = vector.broadcast %27 : i32 to vector<64x1xi32>
    %29 = arith.remsi %2, %28 : vector<64x1xi32>
    %c0_i32_10 = arith.constant 0 : i32
    %30 = vector.broadcast %c0_i32_10 : i32 to vector<64x1xi32>
    %31 = arith.cmpi ne, %29, %30 : vector<64x1xi32>
    %c0_i32_11 = arith.constant 0 : i32
    %32 = vector.broadcast %c0_i32_11 : i32 to vector<64x1xi32>
    %33 = arith.cmpi slt, %29, %32 : vector<64x1xi32>
    %c0_i32_12 = arith.constant 0 : i32
    %34 = arith.cmpi slt, %27, %c0_i32_12 : i32
    %35 = vector.broadcast %34 : i1 to vector<64x1xi1>
    %36 = vector.broadcast %35 : vector<64x1xi1> to vector<64x1xi1>
    %37 = arith.xori %33, %36 : vector<64x1xi1>
    %38 = arith.andi %37, %31 : vector<64x1xi1>
    %39 = vector.broadcast %27 : i32 to vector<64x1xi32>
    %40 = arith.addi %29, %39 : vector<64x1xi32>
    %41 = arith.select %38, %40, %29 : vector<64x1xi1>, vector<64x1xi32>
    %c31_i32 = arith.constant 31 : i32
    %42 = vector.broadcast %c31_i32 : i32 to vector<64x1xi32>
    %43 = arith.cmpi eq, %41, %42 : vector<64x1xi32>
    %c63_i32 = arith.constant 63 : i32
    %44 = tpu.dynamic_rotate %1 by %c63_i32 dim 0 : vector<64x32xf32>, i32 -> vector<64x32xf32>
    %cst_13 = arith.constant 0.000000e+00 : f32
    %45 = vector.shape_cast %43 : vector<64x1xi1> to vector<64x1xi1>
    %46 = vector.broadcast %45 : vector<64x1xi1> to vector<64x32xi1>
    %47 = vector.broadcast %cst_13 : f32 to vector<64x32xf32>
    %48 = arith.select %46, %47, %44 : vector<64x32xi1>, vector<64x32xf32>
    %49 = tpu.concatenate %25, %1, %48 in 1 : vector<64x32xf32>, vector<64x32xf32>, vector<64x32xf32> -> vector<64x96xf32>
    %50 = arith.truncf %49 : vector<64x96xf32> to vector<64x96xbf16>
    %c0_14 = arith.constant 0 : index
    %c0_15 = arith.constant 0 : index
    %51 = vector.load %arg2[%c0_14, %c0_15] : memref<96x256xbf16, #tpu.memory_space<vmem>>, vector<96x256xbf16>
    %cst_16 = arith.constant dense<0.000000e+00> : vector<64x256xf32>
    %52 = tpu.matmul %50, %51, %cst_16 {dimension_numbers = #tpu.dot_dimension_numbers<[1], [0], [0], [1], [0, 0, 1, 1], [], []>} : vector<64x96xbf16>, vector<96x256xbf16>, vector<64x256xf32> -> vector<64x256xf32>
    %c0_17 = arith.constant 0 : index
    %c0_18 = arith.constant 0 : index
    %53 = vector.load %arg3[%c0_17, %c0_18] : memref<1x256xf32, #tpu.memory_space<vmem>>, vector<1x256xf32>
    %54 = vector.broadcast %53 : vector<1x256xf32> to vector<64x256xf32>
    %55 = arith.addf %52, %54 : vector<64x256xf32>
    %cst_19 = arith.constant 0.000000e+00 : f32
    %56 = vector.broadcast %cst_19 : f32 to vector<64x256xf32>
    %57 = arith.maximumf %55, %56 : vector<64x256xf32>
    %58 = tpu.iota {dimensions = array<i32: 0>} : vector<64x1xi32>
    %c32_i32_20 = arith.constant 32 : i32
    %c0_i32_21 = arith.constant 0 : i32
    %59 = arith.cmpi eq, %c32_i32_20, %c0_i32_21 : i32
    %c1_i32_22 = arith.constant 1 : i32
    %60 = arith.select %59, %c1_i32_22, %c32_i32_20 : i32
    %61 = vector.broadcast %60 : i32 to vector<64x1xi32>
    %62 = arith.remsi %58, %61 : vector<64x1xi32>
    %c0_i32_23 = arith.constant 0 : i32
    %63 = vector.broadcast %c0_i32_23 : i32 to vector<64x1xi32>
    %64 = arith.cmpi ne, %62, %63 : vector<64x1xi32>
    %c0_i32_24 = arith.constant 0 : i32
    %65 = vector.broadcast %c0_i32_24 : i32 to vector<64x1xi32>
    %66 = arith.cmpi slt, %62, %65 : vector<64x1xi32>
    %c0_i32_25 = arith.constant 0 : i32
    %67 = arith.cmpi slt, %60, %c0_i32_25 : i32
    %68 = vector.broadcast %67 : i1 to vector<64x1xi1>
    %69 = vector.broadcast %68 : vector<64x1xi1> to vector<64x1xi1>
    %70 = arith.xori %66, %69 : vector<64x1xi1>
    %71 = arith.andi %70, %64 : vector<64x1xi1>
    %72 = vector.broadcast %60 : i32 to vector<64x1xi32>
    %73 = arith.addi %62, %72 : vector<64x1xi32>
    %74 = arith.select %71, %73, %62 : vector<64x1xi1>, vector<64x1xi32>
    %c0_i32_26 = arith.constant 0 : i32
    %75 = vector.broadcast %c0_i32_26 : i32 to vector<64x1xi32>
    %76 = arith.cmpi eq, %74, %75 : vector<64x1xi32>
    %c1_i32_27 = arith.constant 1 : i32
    %77 = tpu.dynamic_rotate %57 by %c1_i32_27 dim 0 : vector<64x256xf32>, i32 -> vector<64x256xf32>
    %cst_28 = arith.constant 0.000000e+00 : f32
    %78 = vector.shape_cast %76 : vector<64x1xi1> to vector<64x1xi1>
    %79 = vector.broadcast %78 : vector<64x1xi1> to vector<64x256xi1>
    %80 = vector.broadcast %cst_28 : f32 to vector<64x256xf32>
    %81 = arith.select %79, %80, %77 : vector<64x256xi1>, vector<64x256xf32>
    %c32_i32_29 = arith.constant 32 : i32
    %c0_i32_30 = arith.constant 0 : i32
    %82 = arith.cmpi eq, %c32_i32_29, %c0_i32_30 : i32
    %c1_i32_31 = arith.constant 1 : i32
    %83 = arith.select %82, %c1_i32_31, %c32_i32_29 : i32
    %84 = vector.broadcast %83 : i32 to vector<64x1xi32>
    %85 = arith.remsi %58, %84 : vector<64x1xi32>
    %c0_i32_32 = arith.constant 0 : i32
    %86 = vector.broadcast %c0_i32_32 : i32 to vector<64x1xi32>
    %87 = arith.cmpi ne, %85, %86 : vector<64x1xi32>
    %c0_i32_33 = arith.constant 0 : i32
    %88 = vector.broadcast %c0_i32_33 : i32 to vector<64x1xi32>
    %89 = arith.cmpi slt, %85, %88 : vector<64x1xi32>
    %c0_i32_34 = arith.constant 0 : i32
    %90 = arith.cmpi slt, %83, %c0_i32_34 : i32
    %91 = vector.broadcast %90 : i1 to vector<64x1xi1>
    %92 = vector.broadcast %91 : vector<64x1xi1> to vector<64x1xi1>
    %93 = arith.xori %89, %92 : vector<64x1xi1>
    %94 = arith.andi %93, %87 : vector<64x1xi1>
    %95 = vector.broadcast %83 : i32 to vector<64x1xi32>
    %96 = arith.addi %85, %95 : vector<64x1xi32>
    %97 = arith.select %94, %96, %85 : vector<64x1xi1>, vector<64x1xi32>
    %c31_i32_35 = arith.constant 31 : i32
    %98 = vector.broadcast %c31_i32_35 : i32 to vector<64x1xi32>
    %99 = arith.cmpi eq, %97, %98 : vector<64x1xi32>
    %c63_i32_36 = arith.constant 63 : i32
    %100 = tpu.dynamic_rotate %57 by %c63_i32_36 dim 0 : vector<64x256xf32>, i32 -> vector<64x256xf32>
    %cst_37 = arith.constant 0.000000e+00 : f32
    %101 = vector.shape_cast %99 : vector<64x1xi1> to vector<64x1xi1>
    %102 = vector.broadcast %101 : vector<64x1xi1> to vector<64x256xi1>
    %103 = vector.broadcast %cst_37 : f32 to vector<64x256xf32>
    %104 = arith.select %102, %103, %100 : vector<64x256xi1>, vector<64x256xf32>
    %105 = tpu.concatenate %81, %57, %104 in 1 : vector<64x256xf32>, vector<64x256xf32>, vector<64x256xf32> -> vector<64x768xf32>
    %106 = arith.truncf %105 : vector<64x768xf32> to vector<64x768xbf16>
    %c0_38 = arith.constant 0 : index
    %c0_39 = arith.constant 0 : index
    %107 = vector.load %arg4[%c0_38, %c0_39] : memref<768x256xbf16, #tpu.memory_space<vmem>>, vector<768x256xbf16>
    %cst_40 = arith.constant dense<0.000000e+00> : vector<64x256xf32>
    %108 = tpu.matmul %106, %107, %cst_40 {dimension_numbers = #tpu.dot_dimension_numbers<[1], [0], [0], [1], [0, 0, 1, 1], [], []>} : vector<64x768xbf16>, vector<768x256xbf16>, vector<64x256xf32> -> vector<64x256xf32>
    %c0_41 = arith.constant 0 : index
    %c0_42 = arith.constant 0 : index
    %109 = vector.load %arg5[%c0_41, %c0_42] : memref<1x256xf32, #tpu.memory_space<vmem>>, vector<1x256xf32>
    %110 = vector.broadcast %109 : vector<1x256xf32> to vector<64x256xf32>
    %111 = arith.addf %108, %110 : vector<64x256xf32>
    %cst_43 = arith.constant 0.000000e+00 : f32
    %112 = vector.broadcast %cst_43 : f32 to vector<64x256xf32>
    %113 = arith.maximumf %111, %112 : vector<64x256xf32>
    %c63_i32_44 = arith.constant 63 : i32
    %114 = tpu.dynamic_rotate %113 by %c63_i32_44 dim 0 : vector<64x256xf32>, i32 -> vector<64x256xf32>
    %115 = arith.maximumf %113, %114 : vector<64x256xf32>
    %c0_45 = arith.constant 0 : index
    %c0_46 = arith.constant 0 : index
    %116 = vector.load %arg7[%c0_45, %c0_46] : memref<32x64xbf16, #tpu.memory_space<vmem>>, vector<32x64xbf16>
    %117 = arith.truncf %115 : vector<64x256xf32> to vector<64x256xbf16>
    %cst_47 = arith.constant dense<0.000000e+00> : vector<32x256xf32>
    %118 = tpu.matmul %116, %117, %cst_47 {dimension_numbers = #tpu.dot_dimension_numbers<[1], [0], [0], [1], [0, 0, 1, 1], [], []>} : vector<32x64xbf16>, vector<64x256xbf16>, vector<32x256xf32> -> vector<32x256xf32>
    %119 = arith.truncf %118 : vector<32x256xf32> to vector<32x256xbf16>
    %c0_48 = arith.constant 0 : index
    %c0_49 = arith.constant 0 : index
    %120 = vector.load %arg6[%c0_48, %c0_49] : memref<256x256xbf16, #tpu.memory_space<vmem>>, vector<256x256xbf16>
    %cst_50 = arith.constant dense<0.000000e+00> : vector<32x256xf32>
    %121 = tpu.matmul %119, %120, %cst_50 {dimension_numbers = #tpu.dot_dimension_numbers<[1], [0], [0], [1], [0, 0, 1, 1], [], []>} : vector<32x256xbf16>, vector<256x256xbf16>, vector<32x256xf32> -> vector<32x256xf32>
    %122 = vector.extract_strided_slice %121 {offsets = [0, 0], sizes = [32, 128], strides = [1, 1]} : vector<32x256xf32> to vector<32x128xf32>
    %123 = vector.extract_strided_slice %121 {offsets = [0, 128], sizes = [32, 128], strides = [1, 1]} : vector<32x256xf32> to vector<32x128xf32>
    %124 = arith.maximumf %122, %123 : vector<32x128xf32>
    %125 = tpu.iota {dimensions = array<i32: 0>} : vector<32x1xi32>
    %c16_i32 = arith.constant 16 : i32
    %c0_i32_51 = arith.constant 0 : i32
    %126 = arith.cmpi eq, %c16_i32, %c0_i32_51 : i32
    %c1_i32_52 = arith.constant 1 : i32
    %127 = arith.select %126, %c1_i32_52, %c16_i32 : i32
    %128 = vector.broadcast %127 : i32 to vector<32x1xi32>
    %129 = arith.remsi %125, %128 : vector<32x1xi32>
    %c0_i32_53 = arith.constant 0 : i32
    %130 = vector.broadcast %c0_i32_53 : i32 to vector<32x1xi32>
    %131 = arith.cmpi ne, %129, %130 : vector<32x1xi32>
    %c0_i32_54 = arith.constant 0 : i32
    %132 = vector.broadcast %c0_i32_54 : i32 to vector<32x1xi32>
    %133 = arith.cmpi slt, %129, %132 : vector<32x1xi32>
    %c0_i32_55 = arith.constant 0 : i32
    %134 = arith.cmpi slt, %127, %c0_i32_55 : i32
    %135 = vector.broadcast %134 : i1 to vector<32x1xi1>
    %136 = vector.broadcast %135 : vector<32x1xi1> to vector<32x1xi1>
    %137 = arith.xori %133, %136 : vector<32x1xi1>
    %138 = arith.andi %137, %131 : vector<32x1xi1>
    %139 = vector.broadcast %127 : i32 to vector<32x1xi32>
    %140 = arith.addi %129, %139 : vector<32x1xi32>
    %141 = arith.select %138, %140, %129 : vector<32x1xi1>, vector<32x1xi32>
    %c0_i32_56 = arith.constant 0 : i32
    %142 = vector.broadcast %c0_i32_56 : i32 to vector<32x1xi32>
    %143 = arith.cmpi eq, %141, %142 : vector<32x1xi32>
    %c1_i32_57 = arith.constant 1 : i32
    %144 = tpu.dynamic_rotate %124 by %c1_i32_57 dim 0 : vector<32x128xf32>, i32 -> vector<32x128xf32>
    %cst_58 = arith.constant 0.000000e+00 : f32
    %145 = vector.shape_cast %143 : vector<32x1xi1> to vector<32x1xi1>
    %146 = vector.broadcast %145 : vector<32x1xi1> to vector<32x128xi1>
    %147 = vector.broadcast %cst_58 : f32 to vector<32x128xf32>
    %148 = arith.select %146, %147, %144 : vector<32x128xi1>, vector<32x128xf32>
    %c16_i32_59 = arith.constant 16 : i32
    %c0_i32_60 = arith.constant 0 : i32
    %149 = arith.cmpi eq, %c16_i32_59, %c0_i32_60 : i32
    %c1_i32_61 = arith.constant 1 : i32
    %150 = arith.select %149, %c1_i32_61, %c16_i32_59 : i32
    %151 = vector.broadcast %150 : i32 to vector<32x1xi32>
    %152 = arith.remsi %125, %151 : vector<32x1xi32>
    %c0_i32_62 = arith.constant 0 : i32
    %153 = vector.broadcast %c0_i32_62 : i32 to vector<32x1xi32>
    %154 = arith.cmpi ne, %152, %153 : vector<32x1xi32>
    %c0_i32_63 = arith.constant 0 : i32
    %155 = vector.broadcast %c0_i32_63 : i32 to vector<32x1xi32>
    %156 = arith.cmpi slt, %152, %155 : vector<32x1xi32>
    %c0_i32_64 = arith.constant 0 : i32
    %157 = arith.cmpi slt, %150, %c0_i32_64 : i32
    %158 = vector.broadcast %157 : i1 to vector<32x1xi1>
    %159 = vector.broadcast %158 : vector<32x1xi1> to vector<32x1xi1>
    %160 = arith.xori %156, %159 : vector<32x1xi1>
    %161 = arith.andi %160, %154 : vector<32x1xi1>
    %162 = vector.broadcast %150 : i32 to vector<32x1xi32>
    %163 = arith.addi %152, %162 : vector<32x1xi32>
    %164 = arith.select %161, %163, %152 : vector<32x1xi1>, vector<32x1xi32>
    %c15_i32 = arith.constant 15 : i32
    %165 = vector.broadcast %c15_i32 : i32 to vector<32x1xi32>
    %166 = arith.cmpi eq, %164, %165 : vector<32x1xi32>
    %c31_i32_65 = arith.constant 31 : i32
    %167 = tpu.dynamic_rotate %124 by %c31_i32_65 dim 0 : vector<32x128xf32>, i32 -> vector<32x128xf32>
    %cst_66 = arith.constant 0.000000e+00 : f32
    %168 = vector.shape_cast %166 : vector<32x1xi1> to vector<32x1xi1>
    %169 = vector.broadcast %168 : vector<32x1xi1> to vector<32x128xi1>
    %170 = vector.broadcast %cst_66 : f32 to vector<32x128xf32>
    %171 = arith.select %169, %170, %167 : vector<32x128xi1>, vector<32x128xf32>
    %172 = tpu.concatenate %148, %124, %171 in 1 : vector<32x128xf32>, vector<32x128xf32>, vector<32x128xf32> -> vector<32x384xf32>
    %173 = arith.truncf %172 : vector<32x384xf32> to vector<32x384xbf16>
    %c0_67 = arith.constant 0 : index
    %c0_68 = arith.constant 0 : index
    %174 = vector.load %arg8[%c0_67, %c0_68] : memref<384x256xbf16, #tpu.memory_space<vmem>>, vector<384x256xbf16>
    %cst_69 = arith.constant dense<0.000000e+00> : vector<32x256xf32>
    %175 = tpu.matmul %173, %174, %cst_69 {dimension_numbers = #tpu.dot_dimension_numbers<[1], [0], [0], [1], [0, 0, 1, 1], [], []>} : vector<32x384xbf16>, vector<384x256xbf16>, vector<32x256xf32> -> vector<32x256xf32>
    %c0_70 = arith.constant 0 : index
    %c0_71 = arith.constant 0 : index
    %176 = vector.load %arg9[%c0_70, %c0_71] : memref<1x256xf32, #tpu.memory_space<vmem>>, vector<1x256xf32>
    %177 = vector.broadcast %176 : vector<1x256xf32> to vector<32x256xf32>
    %178 = arith.addf %175, %177 : vector<32x256xf32>
    %cst_72 = arith.constant 0.000000e+00 : f32
    %179 = vector.broadcast %cst_72 : f32 to vector<32x256xf32>
    %180 = arith.maximumf %178, %179 : vector<32x256xf32>
    %181 = tpu.iota {dimensions = array<i32: 0>} : vector<32x1xi32>
    %c16_i32_73 = arith.constant 16 : i32
    %c0_i32_74 = arith.constant 0 : i32
    %182 = arith.cmpi eq, %c16_i32_73, %c0_i32_74 : i32
    %c1_i32_75 = arith.constant 1 : i32
    %183 = arith.select %182, %c1_i32_75, %c16_i32_73 : i32
    %184 = vector.broadcast %183 : i32 to vector<32x1xi32>
    %185 = arith.remsi %181, %184 : vector<32x1xi32>
    %c0_i32_76 = arith.constant 0 : i32
    %186 = vector.broadcast %c0_i32_76 : i32 to vector<32x1xi32>
    %187 = arith.cmpi ne, %185, %186 : vector<32x1xi32>
    %c0_i32_77 = arith.constant 0 : i32
    %188 = vector.broadcast %c0_i32_77 : i32 to vector<32x1xi32>
    %189 = arith.cmpi slt, %185, %188 : vector<32x1xi32>
    %c0_i32_78 = arith.constant 0 : i32
    %190 = arith.cmpi slt, %183, %c0_i32_78 : i32
    %191 = vector.broadcast %190 : i1 to vector<32x1xi1>
    %192 = vector.broadcast %191 : vector<32x1xi1> to vector<32x1xi1>
    %193 = arith.xori %189, %192 : vector<32x1xi1>
    %194 = arith.andi %193, %187 : vector<32x1xi1>
    %195 = vector.broadcast %183 : i32 to vector<32x1xi32>
    %196 = arith.addi %185, %195 : vector<32x1xi32>
    %197 = arith.select %194, %196, %185 : vector<32x1xi1>, vector<32x1xi32>
    %c0_i32_79 = arith.constant 0 : i32
    %198 = vector.broadcast %c0_i32_79 : i32 to vector<32x1xi32>
    %199 = arith.cmpi eq, %197, %198 : vector<32x1xi32>
    %c1_i32_80 = arith.constant 1 : i32
    %200 = tpu.dynamic_rotate %180 by %c1_i32_80 dim 0 : vector<32x256xf32>, i32 -> vector<32x256xf32>
    %cst_81 = arith.constant 0.000000e+00 : f32
    %201 = vector.shape_cast %199 : vector<32x1xi1> to vector<32x1xi1>
    %202 = vector.broadcast %201 : vector<32x1xi1> to vector<32x256xi1>
    %203 = vector.broadcast %cst_81 : f32 to vector<32x256xf32>
    %204 = arith.select %202, %203, %200 : vector<32x256xi1>, vector<32x256xf32>
    %c16_i32_82 = arith.constant 16 : i32
    %c0_i32_83 = arith.constant 0 : i32
    %205 = arith.cmpi eq, %c16_i32_82, %c0_i32_83 : i32
    %c1_i32_84 = arith.constant 1 : i32
    %206 = arith.select %205, %c1_i32_84, %c16_i32_82 : i32
    %207 = vector.broadcast %206 : i32 to vector<32x1xi32>
    %208 = arith.remsi %181, %207 : vector<32x1xi32>
    %c0_i32_85 = arith.constant 0 : i32
    %209 = vector.broadcast %c0_i32_85 : i32 to vector<32x1xi32>
    %210 = arith.cmpi ne, %208, %209 : vector<32x1xi32>
    %c0_i32_86 = arith.constant 0 : i32
    %211 = vector.broadcast %c0_i32_86 : i32 to vector<32x1xi32>
    %212 = arith.cmpi slt, %208, %211 : vector<32x1xi32>
    %c0_i32_87 = arith.constant 0 : i32
    %213 = arith.cmpi slt, %206, %c0_i32_87 : i32
    %214 = vector.broadcast %213 : i1 to vector<32x1xi1>
    %215 = vector.broadcast %214 : vector<32x1xi1> to vector<32x1xi1>
    %216 = arith.xori %212, %215 : vector<32x1xi1>
    %217 = arith.andi %216, %210 : vector<32x1xi1>
    %218 = vector.broadcast %206 : i32 to vector<32x1xi32>
    %219 = arith.addi %208, %218 : vector<32x1xi32>
    %220 = arith.select %217, %219, %208 : vector<32x1xi1>, vector<32x1xi32>
    %c15_i32_88 = arith.constant 15 : i32
    %221 = vector.broadcast %c15_i32_88 : i32 to vector<32x1xi32>
    %222 = arith.cmpi eq, %220, %221 : vector<32x1xi32>
    %c31_i32_89 = arith.constant 31 : i32
    %223 = tpu.dynamic_rotate %180 by %c31_i32_89 dim 0 : vector<32x256xf32>, i32 -> vector<32x256xf32>
    %cst_90 = arith.constant 0.000000e+00 : f32
    %224 = vector.shape_cast %222 : vector<32x1xi1> to vector<32x1xi1>
    %225 = vector.broadcast %224 : vector<32x1xi1> to vector<32x256xi1>
    %226 = vector.broadcast %cst_90 : f32 to vector<32x256xf32>
    %227 = arith.select %225, %226, %223 : vector<32x256xi1>, vector<32x256xf32>
    %228 = tpu.concatenate %204, %180, %227 in 1 : vector<32x256xf32>, vector<32x256xf32>, vector<32x256xf32> -> vector<32x768xf32>
    %229 = arith.truncf %228 : vector<32x768xf32> to vector<32x768xbf16>
    %c0_91 = arith.constant 0 : index
    %c0_92 = arith.constant 0 : index
    %230 = vector.load %arg10[%c0_91, %c0_92] : memref<768x256xbf16, #tpu.memory_space<vmem>>, vector<768x256xbf16>
    %cst_93 = arith.constant dense<0.000000e+00> : vector<32x256xf32>
    %231 = tpu.matmul %229, %230, %cst_93 {dimension_numbers = #tpu.dot_dimension_numbers<[1], [0], [0], [1], [0, 0, 1, 1], [], []>} : vector<32x768xbf16>, vector<768x256xbf16>, vector<32x256xf32> -> vector<32x256xf32>
    %c0_94 = arith.constant 0 : index
    %c0_95 = arith.constant 0 : index
    %232 = vector.load %arg11[%c0_94, %c0_95] : memref<1x256xf32, #tpu.memory_space<vmem>>, vector<1x256xf32>
    %233 = vector.broadcast %232 : vector<1x256xf32> to vector<32x256xf32>
    %234 = arith.addf %231, %233 : vector<32x256xf32>
    %cst_96 = arith.constant 0.000000e+00 : f32
    %235 = vector.broadcast %cst_96 : f32 to vector<32x256xf32>
    %236 = arith.maximumf %234, %235 : vector<32x256xf32>
    %c31_i32_97 = arith.constant 31 : i32
    %237 = tpu.dynamic_rotate %236 by %c31_i32_97 dim 0 : vector<32x256xf32>, i32 -> vector<32x256xf32>
    %238 = arith.maximumf %236, %237 : vector<32x256xf32>
    %c0_98 = arith.constant 0 : index
    %c0_99 = arith.constant 0 : index
    %239 = vector.load %arg13[%c0_98, %c0_99] : memref<16x32xbf16, #tpu.memory_space<vmem>>, vector<16x32xbf16>
    %240 = arith.truncf %238 : vector<32x256xf32> to vector<32x256xbf16>
    %cst_100 = arith.constant dense<0.000000e+00> : vector<16x256xf32>
    %241 = tpu.matmul %239, %240, %cst_100 {dimension_numbers = #tpu.dot_dimension_numbers<[1], [0], [0], [1], [0, 0, 1, 1], [], []>} : vector<16x32xbf16>, vector<32x256xbf16>, vector<16x256xf32> -> vector<16x256xf32>
    %242 = arith.truncf %241 : vector<16x256xf32> to vector<16x256xbf16>
    %c0_101 = arith.constant 0 : index
    %c0_102 = arith.constant 0 : index
    %243 = vector.load %arg12[%c0_101, %c0_102] : memref<256x256xbf16, #tpu.memory_space<vmem>>, vector<256x256xbf16>
    %cst_103 = arith.constant dense<0.000000e+00> : vector<16x256xf32>
    %244 = tpu.matmul %242, %243, %cst_103 {dimension_numbers = #tpu.dot_dimension_numbers<[1], [0], [0], [1], [0, 0, 1, 1], [], []>} : vector<16x256xbf16>, vector<256x256xbf16>, vector<16x256xf32> -> vector<16x256xf32>
    %245 = vector.extract_strided_slice %244 {offsets = [0, 0], sizes = [16, 128], strides = [1, 1]} : vector<16x256xf32> to vector<16x128xf32>
    %246 = vector.extract_strided_slice %244 {offsets = [0, 128], sizes = [16, 128], strides = [1, 1]} : vector<16x256xf32> to vector<16x128xf32>
    %247 = arith.maximumf %245, %246 : vector<16x128xf32>
    %248 = arith.truncf %247 : vector<16x128xf32> to vector<16x128xbf16>
    %c0_104 = arith.constant 0 : index
    %c0_105 = arith.constant 0 : index
    %c0_106 = arith.constant 0 : index
    %249 = vector.load %arg14[%c0_104, %c0_105, %c0_106] : memref<8x2x16xbf16, #tpu.memory_space<vmem>>, vector<1x2x16xbf16>
    %250 = vector.shape_cast %249 : vector<1x2x16xbf16> to vector<2x16xbf16>
    %cst_107 = arith.constant dense<0.000000e+00> : vector<2x128xf32>
    %251 = tpu.matmul %250, %248, %cst_107 {dimension_numbers = #tpu.dot_dimension_numbers<[1], [0], [0], [1], [0, 0, 1, 1], [], []>} : vector<2x16xbf16>, vector<16x128xbf16>, vector<2x128xf32> -> vector<2x128xf32>
    %c1 = arith.constant 1 : index
    %c0_108 = arith.constant 0 : index
    %c0_109 = arith.constant 0 : index
    %252 = vector.load %arg14[%c1, %c0_108, %c0_109] : memref<8x2x16xbf16, #tpu.memory_space<vmem>>, vector<1x2x16xbf16>
    %253 = vector.shape_cast %252 : vector<1x2x16xbf16> to vector<2x16xbf16>
    %cst_110 = arith.constant dense<0.000000e+00> : vector<2x128xf32>
    %254 = tpu.matmul %253, %248, %cst_110 {dimension_numbers = #tpu.dot_dimension_numbers<[1], [0], [0], [1], [0, 0, 1, 1], [], []>} : vector<2x16xbf16>, vector<16x128xbf16>, vector<2x128xf32> -> vector<2x128xf32>
    %c2 = arith.constant 2 : index
    %c0_111 = arith.constant 0 : index
    %c0_112 = arith.constant 0 : index
    %255 = vector.load %arg14[%c2, %c0_111, %c0_112] : memref<8x2x16xbf16, #tpu.memory_space<vmem>>, vector<1x2x16xbf16>
    %256 = vector.shape_cast %255 : vector<1x2x16xbf16> to vector<2x16xbf16>
    %cst_113 = arith.constant dense<0.000000e+00> : vector<2x128xf32>
    %257 = tpu.matmul %256, %248, %cst_113 {dimension_numbers = #tpu.dot_dimension_numbers<[1], [0], [0], [1], [0, 0, 1, 1], [], []>} : vector<2x16xbf16>, vector<16x128xbf16>, vector<2x128xf32> -> vector<2x128xf32>
    %c3 = arith.constant 3 : index
    %c0_114 = arith.constant 0 : index
    %c0_115 = arith.constant 0 : index
    %258 = vector.load %arg14[%c3, %c0_114, %c0_115] : memref<8x2x16xbf16, #tpu.memory_space<vmem>>, vector<1x2x16xbf16>
    %259 = vector.shape_cast %258 : vector<1x2x16xbf16> to vector<2x16xbf16>
    %cst_116 = arith.constant dense<0.000000e+00> : vector<2x128xf32>
    %260 = tpu.matmul %259, %248, %cst_116 {dimension_numbers = #tpu.dot_dimension_numbers<[1], [0], [0], [1], [0, 0, 1, 1], [], []>} : vector<2x16xbf16>, vector<16x128xbf16>, vector<2x128xf32> -> vector<2x128xf32>
    %c4 = arith.constant 4 : index
    %c0_117 = arith.constant 0 : index
    %c0_118 = arith.constant 0 : index
    %261 = vector.load %arg14[%c4, %c0_117, %c0_118] : memref<8x2x16xbf16, #tpu.memory_space<vmem>>, vector<1x2x16xbf16>
    %262 = vector.shape_cast %261 : vector<1x2x16xbf16> to vector<2x16xbf16>
    %cst_119 = arith.constant dense<0.000000e+00> : vector<2x128xf32>
    %263 = tpu.matmul %262, %248, %cst_119 {dimension_numbers = #tpu.dot_dimension_numbers<[1], [0], [0], [1], [0, 0, 1, 1], [], []>} : vector<2x16xbf16>, vector<16x128xbf16>, vector<2x128xf32> -> vector<2x128xf32>
    %c5 = arith.constant 5 : index
    %c0_120 = arith.constant 0 : index
    %c0_121 = arith.constant 0 : index
    %264 = vector.load %arg14[%c5, %c0_120, %c0_121] : memref<8x2x16xbf16, #tpu.memory_space<vmem>>, vector<1x2x16xbf16>
    %265 = vector.shape_cast %264 : vector<1x2x16xbf16> to vector<2x16xbf16>
    %cst_122 = arith.constant dense<0.000000e+00> : vector<2x128xf32>
    %266 = tpu.matmul %265, %248, %cst_122 {dimension_numbers = #tpu.dot_dimension_numbers<[1], [0], [0], [1], [0, 0, 1, 1], [], []>} : vector<2x16xbf16>, vector<16x128xbf16>, vector<2x128xf32> -> vector<2x128xf32>
    %c6 = arith.constant 6 : index
    %c0_123 = arith.constant 0 : index
    %c0_124 = arith.constant 0 : index
    %267 = vector.load %arg14[%c6, %c0_123, %c0_124] : memref<8x2x16xbf16, #tpu.memory_space<vmem>>, vector<1x2x16xbf16>
    %268 = vector.shape_cast %267 : vector<1x2x16xbf16> to vector<2x16xbf16>
    %cst_125 = arith.constant dense<0.000000e+00> : vector<2x128xf32>
    %269 = tpu.matmul %268, %248, %cst_125 {dimension_numbers = #tpu.dot_dimension_numbers<[1], [0], [0], [1], [0, 0, 1, 1], [], []>} : vector<2x16xbf16>, vector<16x128xbf16>, vector<2x128xf32> -> vector<2x128xf32>
    %c7 = arith.constant 7 : index
    %c0_126 = arith.constant 0 : index
    %c0_127 = arith.constant 0 : index
    %270 = vector.load %arg14[%c7, %c0_126, %c0_127] : memref<8x2x16xbf16, #tpu.memory_space<vmem>>, vector<1x2x16xbf16>
    %271 = vector.shape_cast %270 : vector<1x2x16xbf16> to vector<2x16xbf16>
    %cst_128 = arith.constant dense<0.000000e+00> : vector<2x128xf32>
    %272 = tpu.matmul %271, %248, %cst_128 {dimension_numbers = #tpu.dot_dimension_numbers<[1], [0], [0], [1], [0, 0, 1, 1], [], []>} : vector<2x16xbf16>, vector<16x128xbf16>, vector<2x128xf32> -> vector<2x128xf32>
    %273 = tpu.concatenate %251, %254, %257, %260, %263, %266, %269, %272 in 1 : vector<2x128xf32>, vector<2x128xf32>, vector<2x128xf32>, vector<2x128xf32>, vector<2x128xf32>, vector<2x128xf32>, vector<2x128xf32>, vector<2x128xf32> -> vector<2x1024xf32>
    %274 = arith.truncf %273 : vector<2x1024xf32> to vector<2x1024xbf16>
    %c0_129 = arith.constant 0 : index
    %c0_130 = arith.constant 0 : index
    %275 = vector.load %arg15[%c0_129, %c0_130] : memref<1024x128xbf16, #tpu.memory_space<vmem>>, vector<1024x128xbf16>
    %cst_131 = arith.constant dense<0.000000e+00> : vector<2x128xf32>
    %276 = tpu.matmul %274, %275, %cst_131 {dimension_numbers = #tpu.dot_dimension_numbers<[1], [0], [0], [1], [0, 0, 1, 1], [], []>} : vector<2x1024xbf16>, vector<1024x128xbf16>, vector<2x128xf32> -> vector<2x128xf32>
    %c0_132 = arith.constant 0 : index
    %c0_133 = arith.constant 0 : index
    %277 = vector.load %arg16[%c0_132, %c0_133] : memref<1x128xf32, #tpu.memory_space<vmem>>, vector<1x128xf32>
    %278 = vector.broadcast %277 : vector<1x128xf32> to vector<2x128xf32>
    %279 = arith.addf %276, %278 : vector<2x128xf32>
    %280 = vector.extract_strided_slice %279 {offsets = [0, 0], sizes = [2, 2], strides = [1, 1]} : vector<2x128xf32> to vector<2x2xf32>
    %281 = vector.extract_strided_slice %279 {offsets = [0, 2], sizes = [2, 2], strides = [1, 1]} : vector<2x128xf32> to vector<2x2xf32>
    %282 = math.exp %281 : vector<2x2xf32>
    %c0_134 = arith.constant 0 : index
    %c0_135 = arith.constant 0 : index
    %c0_136 = arith.constant 0 : index
    %283 = vector.load %arg17[%c0_134, %c0_135, %c0_136] : memref<1x2x2xf32, #tpu.memory_space<vmem>>, vector<1x2x2xf32>
    %284 = vector.shape_cast %283 : vector<1x2x2xf32> to vector<2x2xf32>
    %285 = arith.mulf %282, %284 : vector<2x2xf32>
    %286 = arith.addf %280, %285 : vector<2x2xf32>
    %287 = vector.extract_strided_slice %279 {offsets = [0, 0], sizes = [2, 4], strides = [1, 1]} : vector<2x128xf32> to vector<2x4xf32>
    %288 = vector.extract_strided_slice %279 {offsets = [0, 6], sizes = [2, 122], strides = [1, 1]} : vector<2x128xf32> to vector<2x122xf32>
    %289 = tpu.concatenate %287, %286, %288 in 1 : vector<2x4xf32>, vector<2x2xf32>, vector<2x122xf32> -> vector<2x128xf32>
    %c0_137 = arith.constant 0 : index
    %c0_138 = arith.constant 0 : index
    %c0_139 = arith.constant 0 : index
    %290 = vector.load %arg18[%c0_137, %c0_138, %c0_139] : memref<1x2x128xf32, #tpu.memory_space<vmem>>, vector<1x2x128xf32>
    %291 = vector.shape_cast %290 : vector<1x2x128xf32> to vector<2x128xf32>
    %292 = vector.shape_cast %289 : vector<2x128xf32> to vector<1x2x128xf32>
    tpu.vector_store %arg18[%c0_137, %c0_138, %c0_139], %292 {strides = array<i32>} : memref<1x2x128xf32, #tpu.memory_space<vmem>>, vector<1x2x128xf32>,
    return
  }
  func.func @transform_0(%arg0: i32) -> (i32, i32, i32) {
    %c0_i32 = arith.constant 0 : i32
    %c0_i32_0 = arith.constant 0 : i32
    %c0_i32_1 = arith.constant 0 : i32
    return %arg0, %c0_i32, %c0_i32_0 : i32, i32, i32
  }
  func.func @transform_1(%arg0: i32) -> (i32, i32) {
    %c0_i32 = arith.constant 0 : i32
    %c0_i32_0 = arith.constant 0 : i32
    %c0_i32_1 = arith.constant 0 : i32
    return %c0_i32, %c0_i32_0 : i32, i32
  }
  func.func @transform_2(%arg0: i32) -> (i32, i32) {
    %c0_i32 = arith.constant 0 : i32
    %c0_i32_0 = arith.constant 0 : i32
    %c0_i32_1 = arith.constant 0 : i32
    return %c0_i32, %c0_i32_0 : i32, i32
  }
  func.func @transform_3(%arg0: i32) -> (i32, i32) {
    %c0_i32 = arith.constant 0 : i32
    %c0_i32_0 = arith.constant 0 : i32
    %c0_i32_1 = arith.constant 0 : i32
    return %c0_i32, %c0_i32_0 : i32, i32
  }
  func.func @transform_4(%arg0: i32) -> (i32, i32) {
    %c0_i32 = arith.constant 0 : i32
    %c0_i32_0 = arith.constant 0 : i32
    %c0_i32_1 = arith.constant 0 : i32
    return %c0_i32, %c0_i32_0 : i32, i32
  }
  func.func @transform_5(%arg0: i32) -> (i32, i32) {
    %c0_i32 = arith.constant 0 : i32
    %c0_i32_0 = arith.constant 0 : i32
    %c0_i32_1 = arith.constant 0 : i32
    return %c0_i32, %c0_i32_0 : i32, i32
  }
  func.func @transform_6(%arg0: i32) -> (i32, i32) {
    %c0_i32 = arith.constant 0 : i32
    %c0_i32_0 = arith.constant 0 : i32
    %c0_i32_1 = arith.constant 0 : i32
    return %c0_i32, %c0_i32_0 : i32, i32
  }
  func.func @transform_7(%arg0: i32) -> (i32, i32) {
    %c0_i32 = arith.constant 0 : i32
    %c0_i32_0 = arith.constant 0 : i32
    %c0_i32_1 = arith.constant 0 : i32
    return %c0_i32, %c0_i32_0 : i32, i32
  }
  func.func @transform_8(%arg0: i32) -> (i32, i32) {
    %c0_i32 = arith.constant 0 : i32
    %c0_i32_0 = arith.constant 0 : i32
    %c0_i32_1 = arith.constant 0 : i32
    return %c0_i32, %c0_i32_0 : i32, i32
  }
  func.func @transform_9(%arg0: i32) -> (i32, i32) {
    %c0_i32 = arith.constant 0 : i32
    %c0_i32_0 = arith.constant 0 : i32
    %c0_i32_1 = arith.constant 0 : i32
    return %c0_i32, %c0_i32_0 : i32, i32
  }
  func.func @transform_10(%arg0: i32) -> (i32, i32) {
    %c0_i32 = arith.constant 0 : i32
    %c0_i32_0 = arith.constant 0 : i32
    %c0_i32_1 = arith.constant 0 : i32
    return %c0_i32, %c0_i32_0 : i32, i32
  }
  func.func @transform_11(%arg0: i32) -> (i32, i32) {
    %c0_i32 = arith.constant 0 : i32
    %c0_i32_0 = arith.constant 0 : i32
    %c0_i32_1 = arith.constant 0 : i32
    return %c0_i32, %c0_i32_0 : i32, i32
  }
  func.func @transform_12(%arg0: i32) -> (i32, i32) {
    %c0_i32 = arith.constant 0 : i32
    %c0_i32_0 = arith.constant 0 : i32
    %c0_i32_1 = arith.constant 0 : i32
    return %c0_i32, %c0_i32_0 : i32, i32
  }
  func.func @transform_13(%arg0: i32) -> (i32, i32, i32) {
    %c0_i32 = arith.constant 0 : i32
    %c0_i32_0 = arith.constant 0 : i32
    %c0_i32_1 = arith.constant 0 : i32
    %c0_i32_2 = arith.constant 0 : i32
    return %c0_i32, %c0_i32_0, %c0_i32_1 : i32, i32, i32
  }
  func.func @transform_14(%arg0: i32) -> (i32, i32) {
    %c0_i32 = arith.constant 0 : i32
    %c0_i32_0 = arith.constant 0 : i32
    %c0_i32_1 = arith.constant 0 : i32
    return %c0_i32, %c0_i32_0 : i32, i32
  }
  func.func @transform_15(%arg0: i32) -> (i32, i32) {
    %c0_i32 = arith.constant 0 : i32
    %c0_i32_0 = arith.constant 0 : i32
    %c0_i32_1 = arith.constant 0 : i32
    return %c0_i32, %c0_i32_0 : i32, i32
  }
  func.func @transform_16(%arg0: i32) -> (i32, i32, i32) {
    %c0_i32 = arith.constant 0 : i32
    %c0_i32_0 = arith.constant 0 : i32
    %c0_i32_1 = arith.constant 0 : i32
    return %arg0, %c0_i32, %c0_i32_0 : i32, i32, i32
  }
  func.func @transform_17(%arg0: i32) -> (i32, i32, i32) {
    %c0_i32 = arith.constant 0 : i32
    %c0_i32_0 = arith.constant 0 : i32
    %c0_i32_1 = arith.constant 0 : i32
    return %arg0, %c0_i32, %c0_i32_0 : i32, i32, i32
  }
}

</mosaic_0001>

<bundles_post_ra>
// kernel: vae_encoder_forward.1
= control target key start
LH: loop header
LB: loop body
LE: loop exit
PB: predicated region body
PF: predicated region fallthrough
CT: control target
= control target key end

     0   :  { %s8409_s0 = inlined_call_operand.hbm [shape: f32[2,64,32], index: 0, kind: input, shape index: {}]   ;;  %s8410_s1 = inlined_call_operand.hbm [shape: bf16[96,256], index: 1, kind: input, shape index: {}]   ;;  %s8411_s2 = inlined_call_operand.hbm [shape: f32[1,256], index: 2, kind: input, shape index: {}]   ;;  %s8412_s3 = inlined_call_operand.hbm [shape: bf16[768,256], index: 3, kind: input, shape index: {}]   ;;  %s8413_s4 = inlined_call_operand.hbm [shape: f32[1,256], index: 4, kind: input, shape index: {}]   ;;  %s8414_s5 = inlined_call_operand.hbm [shape: bf16[256,256], index: 5, kind: input, shape index: {}]   ;;  %s8415_s6 = inlined_call_operand.vmem [shape: bf16[32,64], index: 6, kind: input, shape index: {}]   ;;  %s8416_s7 = inlined_call_operand.hbm [shape: bf16[384,256], index: 7, kind: input, shape index: {}]   ;;  %s8417_s8 = inlined_call_operand.hbm [shape: f32[1,256], index: 8, kind: input, shape index: {}]   ;;  %s8418_s9 = inlined_call_operand.hbm [shape: bf16[768,256], index: 9, kind: input, shape index: {}]   ;;  %s8419_s10 = inlined_call_operand.hbm [shape: f32[1,256], index: 10, kind: input, shape index: {}]   ;;  %s8420_s11 = inlined_call_operand.hbm [shape: bf16[256,256], index: 11, kind: input, shape index: {}]   ;;  %s8421_s12 = inlined_call_operand.vmem [shape: bf16[16,32], index: 12, kind: input, shape index: {}]   ;;  %s8422_s13 = inlined_call_operand.vmem [shape: bf16[8,2,16], index: 13, kind: input, shape index: {}]   ;;  %s8423_s14 = inlined_call_operand.hbm [shape: bf16[1024,128], index: 14, kind: input, shape index: {}]   ;;  %s8424_s15 = inlined_call_operand.vmem [shape: f32[1,128], index: 15, kind: input, shape index: {}]   ;;  %s8425_s16 = inlined_call_operand.vmem [shape: f32[2,2,2], index: 16, kind: input, shape index: {}]   ;;  %s8426_s17 = inlined_call_operand.vmem [shape: f32[2,2,128], index: 17, kind: output, shape index: {}]  }
   0x1   :  { %8436 = sst [smem:[#allocation28_spill]] %s8409_s0 }
   0x2   :  { %8437 = sst [smem:[#allocation29_spill]] %s8410_s1 }
   0x3   :  { %8438 = sst [smem:[#allocation30_spill]] %s8411_s2 }
   0x4   :  { %8439 = sst [smem:[#allocation31_spill]] %s8412_s3 }
   0x5   :  { %8440 = sst [smem:[#allocation32_spill]] %s8413_s4 }
   0x6   :  { %8441 = sst [smem:[#allocation33_spill]] %s8414_s5 }
   0x7   :  { %8442 = sst [smem:[#allocation34_spill]] %s8424_s15 }
   0x8   :  { %8443 = sst [smem:[#allocation35_spill]] %s8425_s16 }
   0x9   :  { %8444 = sst [smem:[#allocation36_spill]] %s8426_s17 }
   0xa   :  { %22 = vsyncpa [#allocation3], 0 }
   0xb   :  { %24 = vsyncpa [#allocation3 + $0x1], 0 }
   0xc   :  { %25 = vsyncpa [#allocation5], 0 }
   0xd   :  { %26 = vsyncpa [#allocation8], 0 }
   0xe   :  { %27 = vsyncpa [#allocation11], 0 }
   0xf   :  { %28 = vsyncpa [#allocation14], 0 }
  0x10   :  { %29 = vsyncpa [#allocation17], 0 }
  0x11   :  { %30 = vsyncpa [#allocation20], 0  ;;  %s7360_s24 = smov 0   ;;  %s7362_s25 = smov 0  }
  0x12   :  { %s7364_s26 = smov 0   ;;  %s7366_s27 = smov 0  }
  0x13 LB: > { %s7245_s28 = smov [#allocation4]   ;;  %s7381_s0 = sadd.s32 4294967295, %s7243_s27   ;;  %s7243_s27 = sphi %s7366_s27, %s8500_s27   ;;  %s7239_s26 = sphi %s7364_s26, %s8499_s26   ;;  %s7235_s25 = sphi %s7362_s25, %s8498_s25   ;;  %s7231_s24 = sphi %s7360_s24, %s8497_s24  }
  0x14   : > { %s446_s29 = sshll.u32 %s7245_s28, 4  ;;  %p5449_p0 = scmp.ge.s32.totalorder %s7243_s27, 1  ;;  %s447_s29 = int_to_ptr.vmem [resolvable:$true] %s446_s29 }
  0x15   : > { %p8428_p1 = scmp.eq.s32.totalorder %s7381_s0, 0  ;;  %p434_p2 = scmp.lt.s32.totalorder %s7243_s27, 3 }
  0x16   : > { %s7246_s18 = smov [#allocation7]   ;;  %s7247_s20 = smov [#allocation10]  }
  0x17   : > { %p7386_p3 = pnand %p5449_p0, %p434_p2  ;;  %s470_s19 = sshll.u32 %s7246_s18, 4  ;;  %s7398_s19 = int_to_ptr.vmem [resolvable:$true] %s470_s19 }
  0x18   : > { %s494_s21 = sshll.u32 %s7247_s20, 4  ;;  %s6882_s23 = scalar_lea.vmem %s447_s29, 1536  ;;  %s7400_s21 = int_to_ptr.vmem [resolvable:$true] %s494_s21 }
  0x19   : > { %s8445_s30 = scalar_select %p7386_p3, 1, 0 }
  0x1a   : > { %p6171_p4 = pneg %p7386_p3  ;;  %p6883_p7 = scmp.ne.s32.totalorder %s447_s29, %s6882_s23 }
  0x1b   : > { %p6890_p10 = scmp.lt.s32.totalorder %s447_s29, %s447_s29  ;;  %p6891_p11 = scmp.lt.s32.totalorder %s6882_s23, %s6882_s23 }
  0x1c   : > { %p7394_p5 = pnand %p6171_p4, %p8428_p1 }
  0x1d   : > { %p6892_p12 = por %p6891_p11, %p6890_p10 }
  0x1e   : > { %p7404_p6 = pneg %p7394_p5 }
  0x20   : > { %p6885_p8 = pnand %p6883_p7, %p7404_p6 }
  0x22   : > { %p6886_p9 = pneg %p6885_p8 }
  0x24   : > { %p6893_p13 = pnand %p6892_p12, %p6886_p9 }
  0x26   : > { %6896 = shalt.err (!%p6893_p13)
}
  0x27   : > { %s8430_s28 = smov 128   ;;  %s8432_s18 = smov 8  }
  0x28   : > { %s8448_s15 = sld [smem:[#allocation29_spill]]  ;;  %s6908_s16 = scalar_lea.vmem %s7398_s19, 12288 }
  0x29   : > { %p6909_p0 = scmp.ne.s32.totalorder %s7398_s19, %s6908_s16  ;;  %p6916_p7 = scmp.lt.s32.totalorder %s7398_s19, %s7398_s19 }
  0x2a   : > { %p6917_p8 = scmp.lt.s32.totalorder %s6908_s16, %s6908_s16 }
  0x2b   : > { %p6911_p2 = pnand %p6909_p0, %p7404_p6 }
  0x2c   : > { %p6918_p9 = por %p6917_p8, %p6916_p7 }
  0x2d   : > { %p6912_p4 = pneg %p6911_p2 }
  0x2e   : > { %6174 = dma.hbm_to_vmem [thread:$0]  (!%p7394_p5), %s8448_s15, 1536, %s447_s29, [#allocation5], %s8430_s28, %s8430_s28, %s8432_s18  }
  0x2f   : > { %p6919_p10 = pnand %p6918_p9, %p6912_p4 }
  0x31   : > { %6922 = shalt.err (!%p6919_p10)
}
  0x32   : > { %s8449_s3 = sld [smem:[#allocation31_spill]]  ;;  %s6934_s15 = scalar_lea.vmem %s7400_s21, 4096 }
  0x33   : > { %p6935_p11 = scmp.ne.s32.totalorder %s7400_s21, %s6934_s15  ;;  %p6942_p0 = scmp.lt.s32.totalorder %s7400_s21, %s7400_s21 }
  0x34   : > { %p6943_p2 = scmp.lt.s32.totalorder %s6934_s15, %s6934_s15 }
  0x35   : > { %p6937_p12 = pnand %p6935_p11, %p7404_p6 }
  0x36   : > { %p6944_p4 = por %p6943_p2, %p6942_p0 }
  0x37   : > { %p6938_p13 = pneg %p6937_p12 }
  0x38   : > { %6180 = dma.hbm_to_vmem [thread:$0]  (!%p7394_p5), %s8449_s3, 12288, %s7398_s19, [#allocation8], %s8430_s28, %s8430_s28, %s8432_s18  }
  0x39   : > { %p6945_p7 = pnand %p6944_p4, %p6938_p13 }
  0x3b   : > { %6948 = shalt.err (!%p6945_p7)
}
  0x3c   : > { %s8450_s5 = sld [smem:[#allocation33_spill]]  ;;  %s7250_s19 = smov [#allocation13]  }
  0x3d   : > { %s524_s20 = sshll.u32 %s7250_s19, 4  ;;  %s7251_s23 = smov [#allocation16]   ;;  %s525_s20 = int_to_ptr.vmem [resolvable:$true] %s524_s20 }
  0x3e   : > { %s548_s17 = sshll.u32 %s7251_s23, 4  ;;  %s6960_s15 = scalar_lea.vmem %s525_s20, 32  ;;  %s549_s17 = int_to_ptr.vmem [resolvable:$true] %s548_s17 }
  0x3f   : > { %p6961_p8 = scmp.ne.s32.totalorder %s525_s20, %s6960_s15  ;;  %p6968_p11 = scmp.lt.s32.totalorder %s525_s20, %s525_s20 }
  0x40   : > { %p6969_p12 = scmp.lt.s32.totalorder %s6960_s15, %s6960_s15 }
  0x41   : > { %p6963_p9 = pnand %p6961_p8, %p7404_p6 }
  0x42   : > { %6186 = dma.hbm_to_vmem [thread:$0]  (!%p7394_p5), %s8450_s5, 4096, %s7400_s21, [#allocation11], %s8430_s28, %s8430_s28, %s8432_s18  }
  0x43   : > { %p6964_p10 = pneg %p6963_p9  ;;  %p6970_p13 = por %p6969_p12, %p6968_p11 }
  0x45   : > { %p6971_p0 = pnand %p6970_p13, %p6964_p10 }
  0x47   : > { %6974 = shalt.err (!%p6971_p0)
}
  0x48   : > { %6192 = dma.hbm_to_vmem [thread:$0]  (!%p7394_p5), %s8417_s8, 32, %s525_s20, [#allocation14]  }
  0x49   : > { %s6986_s21 = scalar_lea.vmem %s549_s17, 32  ;;  %p6994_p8 = scmp.lt.s32.totalorder %s549_s17, %s549_s17 }
  0x4a   : > { %p6987_p2 = scmp.ne.s32.totalorder %s549_s17, %s6986_s21  ;;  %p6995_p9 = scmp.lt.s32.totalorder %s6986_s21, %s6986_s21 }
  0x4c   : > { %p6989_p4 = pnand %p6987_p2, %p7404_p6  ;;  %p6996_p1 = por %p6995_p9, %p6994_p8 }
  0x4e   : > { %p6990_p7 = pneg %p6989_p4 }
  0x50   : > { %p6997_p3 = pnand %p6996_p1, %p6990_p7 }
  0x52   : > { %7000 = shalt.err (!%p6997_p3)
}
  0x53   : > { %6198 = dma.hbm_to_vmem [thread:$0]  (!%p7394_p5), %s8419_s10, 32, %s549_s17, [#allocation17]  }
  0x54   : > { %s7252_s15 = smov [#allocation6]   ;;  %s7253_s16 = smov [#allocation9]  }
  0x55   : > { %s460_s20 = sshll.u32 %s7252_s15, 4  ;;  %s484_s29 = sshll.u32 %s7253_s16, 4  ;;  %s461_s20 = int_to_ptr.vmem [resolvable:$true] %s460_s20  ;;  %s485_s29 = int_to_ptr.vmem [resolvable:$true] %s484_s29 }
  0x56   : > { %s7012_s28 = scalar_lea.vmem %s461_s20, 32  ;;  %p7020_p13 = scmp.lt.s32.totalorder %s461_s20, %s461_s20 }
  0x57   : > { %p7013_p10 = scmp.ne.s32.totalorder %s461_s20, %s7012_s28  ;;  %p7021_p1 = scmp.lt.s32.totalorder %s7012_s28, %s7012_s28 }
  0x59   : > { %p7015_p11 = pnand %p7013_p10, %p7404_p6  ;;  %p7022_p3 = por %p7021_p1, %p7020_p13 }
  0x5b   : > { %p7016_p12 = pneg %p7015_p11 }
  0x5d   : > { %p7023_p0 = pnand %p7022_p3, %p7016_p12 }
  0x5f   : > { %7026 = shalt.err (!%p7023_p0)
}
  0x60   : > { %s8451_s2 = sld [smem:[#allocation30_spill]]  ;;  %s7038_s17 = scalar_lea.vmem %s485_s29, 32 }
  0x61   : > { %p7039_p2 = scmp.ne.s32.totalorder %s485_s29, %s7038_s17  ;;  %p7046_p8 = scmp.lt.s32.totalorder %s485_s29, %s485_s29 }
  0x62   : > { %p7047_p9 = scmp.lt.s32.totalorder %s7038_s17, %s7038_s17 }
  0x63   : > { %p7041_p4 = pnand %p7039_p2, %p7404_p6 }
  0x64   : > { %p7048_p10 = por %p7047_p9, %p7046_p8 }
  0x65   : > { %p7042_p7 = pneg %p7041_p4 }
  0x66   : > { %6177 = dma.hbm_to_vmem [thread:$0]  (!%p7394_p5), %s8451_s2, 32, %s461_s20, [#allocation5]  }
  0x67   : > { %p7049_p11 = pnand %p7048_p10, %p7042_p7 }
  0x69   : > { %7052 = shalt.err (!%p7049_p11)
}
  0x6a   : > { %s8452_s4 = sld [smem:[#allocation32_spill]]  ;;  %s7254_s15 = smov [#allocation12]  }
  0x6b   : > { %s510_s20 = sshll.u32 %s7254_s15, 4  ;;  %s7255_s16 = smov [#allocation15]   ;;  %s511_s20 = int_to_ptr.vmem [resolvable:$true] %s510_s20 }
  0x6c   : > { %s534_s21 = sshll.u32 %s7255_s16, 4  ;;  %s7064_s19 = scalar_lea.vmem %s511_s20, 6144  ;;  %s535_s21 = int_to_ptr.vmem [resolvable:$true] %s534_s21 }
  0x6d   : > { %p7065_p12 = scmp.ne.s32.totalorder %s511_s20, %s7064_s19  ;;  %p7072_p3 = scmp.lt.s32.totalorder %s511_s20, %s511_s20 }
  0x6e   : > { %p7073_p0 = scmp.lt.s32.totalorder %s7064_s19, %s7064_s19 }
  0x6f   : > { %p7067_p13 = pnand %p7065_p12, %p7404_p6 }
  0x70   : > { %6183 = dma.hbm_to_vmem [thread:$0]  (!%p7394_p5), %s8452_s4, 32, %s485_s29, [#allocation8]  }
  0x71   : > { %p7068_p1 = pneg %p7067_p13  ;;  %p7074_p2 = por %p7073_p0, %p7072_p3 }
  0x73   : > { %p7075_p4 = pnand %p7074_p2, %p7068_p1 }
  0x75   : > { %7078 = shalt.err (!%p7075_p4)
}
  0x76   : > { %s8453_s17 = smov 128   ;;  %s7090_s23 = scalar_lea.vmem %s535_s21, 12288 }
  0x77   : > { %6189 = dma.hbm_to_vmem [thread:$0]  (!%p7394_p5), %s8416_s7, 6144, %s511_s20, [#allocation11], %s8453_s17, %s8453_s17, %s8432_s18  }
  0x78   : > { %p7091_p7 = scmp.ne.s32.totalorder %s535_s21, %s7090_s23  ;;  %p7098_p10 = scmp.lt.s32.totalorder %s535_s21, %s535_s21 }
  0x79   : > { %p7099_p11 = scmp.lt.s32.totalorder %s7090_s23, %s7090_s23 }
  0x7a   : > { %p7093_p8 = pnand %p7091_p7, %p7404_p6 }
  0x7b   : > { %p7100_p12 = por %p7099_p11, %p7098_p10 }
  0x7c   : > { %p7094_p9 = pneg %p7093_p8 }
  0x7e   : > { %p7101_p13 = pnand %p7100_p12, %p7094_p9 }
  0x80   : > { %7104 = shalt.err (!%p7101_p13)
}
  0x81   : > { %6195 = dma.hbm_to_vmem [thread:$0]  (!%p7394_p5), %s8418_s9, 12288, %s535_s21, [#allocation14], %s8453_s17, %s8453_s17, %s8432_s18  }
  0x82   : > { %s7256_s20 = smov [#allocation18]   ;;  %s7257_s29 = smov [#allocation19]  }
  0x83   : > { %s558_s19 = sshll.u32 %s7256_s20, 4  ;;  %s577_s28 = sshll.u32 %s7257_s29, 4  ;;  %s559_s19 = int_to_ptr.vmem [resolvable:$true] %s558_s19  ;;  %s578_s28 = int_to_ptr.vmem [resolvable:$true] %s577_s28 }
  0x84   : > { %s7116_s2 = scalar_lea.vmem %s559_s19, 4096  ;;  %p7124_p2 = scmp.lt.s32.totalorder %s559_s19, %s559_s19 }
  0x85   : > { %p7117_p1 = scmp.ne.s32.totalorder %s559_s19, %s7116_s2  ;;  %p7125_p4 = scmp.lt.s32.totalorder %s7116_s2, %s7116_s2 }
  0x87   : > { %p7119_p3 = pnand %p7117_p1, %p7404_p6  ;;  %p7126_p7 = por %p7125_p4, %p7124_p2 }
  0x89   : > { %p7120_p0 = pneg %p7119_p3 }
  0x8b   : > { %p7127_p8 = pnand %p7126_p7, %p7120_p0 }
  0x8d   : > { %7130 = shalt.err (!%p7127_p8)
}
  0x8e   : > { %6201 = dma.hbm_to_vmem [thread:$0]  (!%p7394_p5), %s8420_s11, 4096, %s559_s19, [#allocation17], %s8453_s17, %s8453_s17, %s8432_s18  }
  0x8f   : > { %s7142_s15 = scalar_lea.vmem %s578_s28, 8192  ;;  %p7150_p12 = scmp.lt.s32.totalorder %s578_s28, %s578_s28 }
  0x90   : > { %p7143_p9 = scmp.ne.s32.totalorder %s578_s28, %s7142_s15  ;;  %p7151_p13 = scmp.lt.s32.totalorder %s7142_s15, %s7142_s15 }
  0x92   : > { %p7145_p10 = pnand %p7143_p9, %p7404_p6  ;;  %p7152_p1 = por %p7151_p13, %p7150_p12 }
  0x94   : > { %p7146_p11 = pneg %p7145_p10 }
  0x96   : > { %p7153_p3 = pnand %p7152_p1, %p7146_p11 }
  0x98   : > { %7156 = shalt.err (!%p7153_p3)
}
  0x99   : > { %s7258_s2 = smov 64   ;;  %s7259_s22 = smov 4  }
  0x9a   : > { %6204 = dma.hbm_to_vmem [thread:$0]  (!%p7394_p5), %s8423_s14, 8192, %s578_s28, [#allocation20], %s7258_s2, %s7258_s2, %s7259_s22  }
  0x9b   : > { %s7514_s19 = sadd.s32 1, %s7243_s27   ;;  %s43_s21 = sadd.s32 1, %s7239_s26 }
  0x9c   : > { %s40_s29 = ssub.s32 %s7243_s27, %s7514_s19  ;;  %p50_p0 = scmp.ne.s32.totalorder %s7239_s26, %s7235_s25 }
  0x9d   : > { %p41_p6 = scmp.eq.s32.totalorder %s40_s29, 0  ;;  %p51_p2 = scmp.eq.s32.totalorder %s7243_s27, 0 }
  0x9e   : > { %p56_p4 = scmp.ne.s32.totalorder %s7235_s25, %s7231_s24  ;;  %p8454_p8 = scmp.eq.s32.totalorder %s7381_s0, 0 }
  0x9f   : > { %s7525_s23 = scalar_select %p41_p6, %s7239_s26, %s43_s21  }
  0xa0   : > { %p52_p7 = por %p51_p2, %p50_p0  ;;  %p7529_p9 = por %p8454_p8, %p56_p4 }
  0xa1   : > { %p6220_p10 = scmp.lt.s32.totalorder %s7243_s27, 2  ;;  %s594_s1 = sand.u32 1, %s7239_s26  }
  0xa2   : > { %s8455_s15 = scalar_select %p7529_p9, 1, 0 }
  0xa3   : > { %s5462_s28 = sshll.u32 %s594_s1, 6  ;;  %s5968_s2 = sshll.u32 %s7243_s27, 10 }
  0xa4   : > { %s8456_s20 = sld [smem:[#allocation28_spill]]  ;;  %s598_s24 = scalar_lea.vmem [#allocation2], %s5462_s28 }
  0xa5   : > { %s605_s29 = sshll.u32 %s598_s24, 4  ;;  %p7543_p5 = pnand %p6220_p10, %p52_p7  ;;  %s7541_s29 = int_to_ptr.vmem [resolvable:$true] %s605_s29 }
  0xa6   : > { %s7547_s3 = scalar_lea.sflag [#allocation3], %s594_s1 }
  0xa7   : > { %p7159_p12 = pneg %p7543_p5 }
  0xaa   : > { %s7539_s18 = scalar_lea.hbm %s8456_s20, %s5968_s2  ;;  %s7162_s28 = scalar_lea.hbm %s8456_s20, 2048 }
  0xab   : > { %s7157_s27 = scalar_lea.hbm %s7539_s18, 1024  ;;  %p7163_p3 = scmp.lt.s32.totalorder %s7539_s18, %s8456_s20 }
  0xac   : > { %p7158_p11 = scmp.ne.s32.totalorder %s7539_s18, %s7157_s27  ;;  %p7164_p6 = scmp.lt.s32.totalorder %s7162_s28, %s7157_s27 }
  0xae   : > { %p7160_p13 = pnand %p7159_p12, %p7158_p11  ;;  %p7165_p0 = por %p7164_p6, %p7163_p3 }
  0xb0   : > { %p7161_p1 = pneg %p7160_p13 }
  0xb2   : > { %p7166_p2 = pnand %p7165_p0, %p7161_p1 }
  0xb4   : > { %7169 = shalt.err (!%p7166_p2)
}
  0xb5   : > { %s7170_s1 = scalar_lea.vmem %s7541_s29, 1024  ;;  %s7260_s4 = smov [#allocation2]  }
  0xb6   : > { %p7171_p4 = scmp.ne.s32.totalorder %s7541_s29, %s7170_s1  ;;  %s7175_s5 = sshll.u32 %s7260_s4, 4  ;;  %s7176_s5 = int_to_ptr.vmem [resolvable:$false] %s7175_s5 }
  0xb7   : > { %s7177_s2 = scalar_lea.vmem %s7176_s5, 2048  ;;  %p7178_p10 = scmp.lt.s32.totalorder %s7541_s29, %s7176_s5 }
  0xb8   : > { %p7173_p7 = pnand %p7171_p4, %p7159_p12  ;;  %p7179_p11 = scmp.lt.s32.totalorder %s7177_s2, %s7170_s1 }
  0xba   : > { %p7174_p8 = pneg %p7173_p7  ;;  %p7180_p13 = por %p7179_p11, %p7178_p10 }
  0xbc   : > { %p7181_p9 = pnand %p7180_p13, %p7174_p8 }
  0xbe   : > { %7184 = shalt.err (!%p7181_p9)
}
  0xbf   : > { %s8458_s27 = smov 8   ;;  %p8459_p12 = scmp.ne.s32.totalorder %s8445_s30, 0 }
  0xc0   : > { %6208 = dma.hbm_to_vmem [thread:$0]  (!%p7543_p5), %s7539_s18, 1024, %s7541_s29, %s7547_s3, %s8453_s17, %s8453_s17, %s8458_s27  }
  0xc1   : > { %624 = sbr.rel (%p8459_p12) target bundleno = 2929 (0xb71), region = 88  ;;  %s626_s4 = sand.u32 (!%p8459_p12), 1, %s7235_s25  }
  0xc2   : > { %s5466_s5 = sshll.u32 (!%p8459_p12), %s626_s4, 6  ;;  %s627_s22 = scalar_lea.sflag (!%p8459_p12), [#allocation3], %s626_s4 }
  0xc3   : > { %s7574_s28 = scalar_lea.vmem (!%p8459_p12), [#allocation2], %s5466_s5  ;;  %p8460_p9 = scmp.ne.s32.totalorder (!%p8459_p12), %s8455_s15, 0 }
  0xc6   : > { %7202 = dma.done.wait (%p8460_p9), %s627_s22, 1024  }
  0xc7   : > { %7204 = vsyncadd (%p8460_p9), %s627_s22, 4294966272  ;;  %p8461_p1 = scmp.eq.s32.totalorder %s7381_s0, 0 }
  0xc9   : > { %7206 = dma.done.wait (%p8461_p1), [#allocation5], 1568   ;;  %p8462_p5 = pmov %p8461_p1 }
  0xca   : > { %p8463_p3 = pmov %p8461_p1 }
  0xcb   : > { %7208 = vsyncadd (%p8462_p5), [#allocation5], 4294965728 }
  0xcc   : > { %7210 = dma.done.wait (%p8463_p3), [#allocation8], 12320   ;;  %p8464_p6 = pmov %p8461_p1 }
  0xcd   : > { %p8465_p0 = pmov %p8461_p1 }
  0xce   : > { %7212 = vsyncadd (%p8464_p6), [#allocation8], 4294954976 }
  0xcf   : > { %7214 = dma.done.wait (%p8465_p0), [#allocation11], 10240   ;;  %p8466_p2 = pmov %p8465_p0 }
  0xd0   : > { %p8467_p4 = pmov %p8465_p0 }
  0xd1   : > { %7216 = vsyncadd (%p8466_p2), [#allocation11], 4294957056 }
  0xd2   : > { %7218 = dma.done.wait (%p8467_p4), [#allocation14], 12320   ;;  %p8468_p7 = pmov %p8465_p0 }
  0xd3   : > { %p8469_p8 = pmov %p8465_p0 }
  0xd4   : > { %7220 = vsyncadd (%p8468_p7), [#allocation14], 4294954976 }
  0xd5   : > { %7222 = dma.done.wait (%p8469_p8), [#allocation17], 4128   ;;  %p8470_p10 = pmov %p8465_p0 }
  0xd6   : > { %p8471_p11 = pmov %p8465_p0 }
  0xd7   : > { %7224 = vsyncadd (%p8470_p10), [#allocation17], 4294963168 }
  0xd8   : > { %7226 = dma.done.wait (%p8471_p11), [#allocation20], 8192   ;;  %p8472_p13 = pmov %p8465_p0 }
  0xd9   : > { %v745_v0 = vlaneseq  ;;  %v8434_v5 = vmov 0   ;;  %v737_v6 = vld [vmem:[%s7574_s28] sm:$0xff]  ;;  %v7614_v7 = vld [vmem:[%s7574_s28 + $0x8] sm:$0xff]  ;;  %v7617_v8 = vld [vmem:[%s7574_s28 + $0x10] sm:$0xff]  ;;  %s7262_s3 = smov 32   ;;  %s7263_s30 = smov 64  }
  0xda   : > { %7228 = vsyncadd (%p8472_p13), [#allocation20], 4294959104  ;;  %1163 = vmatprep.mubr.bf16.mxu0 %v8434_v5  ;;  %v908_v9 = vrot.slane %v7614_v7, 1  ;;  %v6288_v10 = vpack.i.bf16 %v7614_v7, %v737_v6  ;;  %v7623_v11 = vld [vmem:[%s7574_s28 + $0x18] sm:$0xff]  ;;  %v7626_v12 = vld [vmem:[%s7574_s28 + $0x20] sm:$0xff]  ;;  %v859_v15 = vrot.slane %v7614_v7, 7 }
  0xdb   : > { %v7604_v1 = vshrl.u32 %v745_v0, 7  ;;  %v7629_v13 = vld [vmem:[%s7574_s28 + $0x28] sm:$0xff]  ;;  %v907_v16 = vrot.slane %v737_v6, 1  ;;  %v909_v17 = vrot.slane %v7617_v8, 1  ;;  %v910_v18 = vrot.slane %v7623_v11, 1  ;;  %v7635_v19 = vld [vmem:[%s7574_s28 + $0x30] sm:$0xff] }
  0xdc   : > { %v7638_v20 = vld [vmem:[%s7574_s28 + $0x38] sm:$0xff]  ;;  %6289 = vrot.lane.b32.xlu0 %v6288_v10, %s7262_s3  ;;  %v858_v21 = vrot.slane %v737_v6, 7  ;;  %v6298_v22 = vpack.i.bf16 %v7623_v11, %v7617_v8  ;;  %v911_v24 = vrot.slane %v7626_v12, 1  ;;  %v912_v28 = vrot.slane %v7629_v13, 1  ;;  %v6331_v34 = vld [vmem:[#allocation4 + $0x44] ss:$8 sps:$4 sm:$0xff]  }
  0xdd   : > { %v7607_v2 = vadd.s32 24, %v7604_v1  ;;  %v753_v3 = vadd.s32 56, %v7604_v1  ;;  %vm915_vm0 = vcmp.lt.s32.totalorder %v7604_v1, 7  ;;  %v6328_v29 = vld [vmem:[#allocation4 + $0x54] ss:$8 sps:$4 sm:$0xff]   ;;  %v913_v33 = vrot.slane %v7635_v19, 1 }
  0xde   : > { %v921_v25 = vsel %vm915_vm0, %v908_v9, %v909_v17  ;;  %v922_v26 = vsel %vm915_vm0, %v907_v16, %v908_v9  ;;  %v920_v27 = vsel %vm915_vm0, %v909_v17, %v910_v18  ;;  %v6330_v30 = vld [vmem:[#allocation4 + $0x50] ss:$8 sps:$4 sm:$0xff]   ;;  %6299 = vrot.lane.b32.xlu1 %v6298_v22, %s7262_s3  ;;  %v919_v32 = vsel %vm915_vm0, %v910_v18, %v911_v24  ;;  %v6333_v43 = vld [vmem:[#allocation4 + $0x40] ss:$8 sps:$4 sm:$0xff]   ;;  %v6334_v46 = vld [vmem:[#allocation4 + $0x34] ss:$8 sps:$4 sm:$0xff]  }
  0xdf   : > { %v779_v4 = vand.u32 31, %v7607_v2  ;;  %v807_v14 = vand.u32 31, %v753_v3  ;;  %v6293_v31 = vpack.i.bf16 %v921_v25, %v922_v26  ;;  %vm866_vm2 = vcmp.lt.s32.totalorder %v7604_v1, 1  ;;  %1135 = vmatprep.subr.bf16.mxu0 %v6328_v29  ;;  %v6336_v53 = vld [vmem:[#allocation4 + $0x30] ss:$8 sps:$4 sm:$0xff]   ;;  %p728_p12 = scmp.lt.s32.totalorder %s7381_s0, 1 }
  0xe0   : > { %v918_v36 = vsel %vm915_vm0, %v911_v24, %v912_v28  ;;  %v865_v37 = vrot.slane %v7638_v20, 7  ;;  %v914_v38 = vrot.slane %v7638_v20, 1  ;;  %v6308_v40 = vpack.i.bf16 %v7629_v13, %v7626_v12  ;;  %1136 = vmatpush1.bf16.msra.mxu0 %v6330_v30  ;;  %v6337_v56 = vld [vmem:[#allocation4 + $0x24] ss:$8 sps:$4 sm:$0xff]   ;;  %v6339_v61 = vld [vmem:[#allocation4 + $0x20] ss:$8 sps:$4 sm:$0xff]  }
  0xe1   : > { %vm7643_vm1 = vcmp.eq.s32.totalorder %v779_v4, 31  ;;  %6294 = vrot.lane.b32.xlu0 %v6293_v31, %s7263_s30  ;;  %v917_v41 = vsel %vm915_vm0, %v912_v28, %v913_v33  ;;  %vm7671_vm3 = vcmp.eq.s32.totalorder %v807_v14, 31  ;;  %v861_v44 = vrot.slane %v7623_v11, 7  ;;  %1137 = vmatprep.subr.bf16.mxu0 %v6331_v34  ;;  %v6340_v0 = vld [vmem:[#allocation4 + $0x14] ss:$8 sps:$4 sm:$0xff]   ;;  %s8502_s0 = smov (!%p728_p12, %s7381_s0), 1 }
  0xe2   : > { %v943_v35 = vsel %vm7643_vm1, 0.0, %v919_v32  ;;  %v923_v45 = vsel %vm915_vm0, %v914_v38, %v907_v16  ;;  %v7680_v47 = vsel %vm866_vm2, %v858_v21, %v859_v15  ;;  %v863_v48 = vrot.slane %v7629_v13, 7  ;;  %v6342_v4 = vld [vmem:[#allocation4 + $0x10] ss:$8 sps:$4 sm:$0xff]   ;;  %v6345_v9 = vld [vmem:[#allocation4] ss:$8 sps:$4 sm:$0xff]   ;;  %vm5608_vm14 = vmneg %vm7643_vm1 }
  0xe3   : > { %v6303_v39 = vpack.i.bf16 %v943_v35, %v920_v27  ;;  %v6313_v49 = vpack.i.bf16 %v917_v41, %v918_v36  ;;  %v7686_v50 = vsel %vm866_vm2, %v865_v37, %v858_v21  ;;  %v916_v51 = vsel %vm915_vm0, %v913_v33, %v914_v38  ;;  %v6348_v10 = vld [vmem:[#allocation7 + $0x174] ss:$8 sps:$4 sm:$0xff]   ;;  %v6373_v13 = vld [vmem:[#allocation7 + $0x64] ss:$8 sps:$4 sm:$0xff]   ;;  %v6375_v14 = vld [vmem:[#allocation7 + $0x60] ss:$8 sps:$4 sm:$0xff]  }
  0xe4   : > { %v947_v52 = vsel %vm7671_vm3, 0.0, %v923_v45  ;;  %v860_v54 = vrot.slane %v7617_v8, 7  ;;  %v6318_v55 = vpack.i.bf16 %v7638_v20, %v7635_v19  ;;  %1138 = vmatpush1.bf16.msra.mxu0 %v6333_v43  ;;  %v862_v57 = vrot.slane %v7626_v12, 7  ;;  %v6343_v8 = vld [vmem:[#allocation4 + $0x4] ss:$8 sps:$4 sm:$0xff]   ;;  %vm5616_vm1 = vmneg %vm7671_vm3  ;;  %s5478_s24 = sshll.u32 %s8502_s0, 1 }
  0xe5   : > { %6304 = vrot.lane.b32.xlu1 %v6303_v39, %s7263_s30  ;;  %6309 = vrot.lane.b32.xlu0 %v6308_v40, %s7262_s3  ;;  %v6323_v60 = vpack.i.bf16 %v947_v52, %v916_v51  ;;  %v864_v3 = vrot.slane %v7635_v19, 7  ;;  %v6367_v11 = vld [vmem:[#allocation7 + $0x74] ss:$8 sps:$4 sm:$0xff]   ;;  %v6369_v12 = vld [vmem:[#allocation7 + $0x70] ss:$8 sps:$4 sm:$0xff]   ;;  %v758_v24 = vand.u32 31, %v7604_v1 }
  0xe6   : > { %1139 = vmatprep.subr.bf16.mxu0 %v6334_v46  ;;  %v7699_v58 = vsel %vm866_vm2, %v860_v54, %v861_v44  ;;  %v7703_v59 = vsel %vm866_vm2, %v859_v15, %v860_v54  ;;  %v7708_v62 = vsel %vm866_vm2, %v862_v57, %v863_v48  ;;  %v7712_v63 = vsel %vm866_vm2, %v861_v44, %v862_v57  ;;  %v6379_v15 = vld [vmem:[#allocation7 + $0x54] ss:$8 sps:$4 sm:$0xff]   ;;  %v6381_v16 = vld [vmem:[#allocation7 + $0x50] ss:$8 sps:$4 sm:$0xff]   ;;  %v6385_v17 = vld [vmem:[#allocation7 + $0x44] ss:$8 sps:$4 sm:$0xff]  }
  0xe7   : > { %v7719_v6 = vsel %vm866_vm2, %v864_v3, %v865_v37  ;;  %v7723_v7 = vsel %vm866_vm2, %v863_v48, %v864_v3  ;;  %1928 = vmatprep.subr.bf16.mxu1 %v6367_v11  ;;  %v6387_v18 = vld [vmem:[#allocation7 + $0x40] ss:$8 sps:$4 sm:$0xff]   ;;  %v6391_v19 = vld [vmem:[#allocation7 + $0x34] ss:$8 sps:$4 sm:$0xff]   ;;  %v6393_v20 = vld [vmem:[#allocation7 + $0x30] ss:$8 sps:$4 sm:$0xff]  }
  0xe8   : > { %1140 = vmatpush1.bf16.msra.mxu0 %v6336_v53  ;;  %1929 = vmatpush1.bf16.msra.mxu1 %v6369_v12  ;;  %v6397_v21 = vld [vmem:[#allocation7 + $0x24] ss:$8 sps:$4 sm:$0xff]   ;;  %v6399_v22 = vld [vmem:[#allocation7 + $0x20] ss:$8 sps:$4 sm:$0xff]   ;;  %v750_v25 = vadd.s32 32, %v7604_v1  ;;  %vm7727_vm4 = vcmp.eq.s32.totalorder %v758_v24, 0 }
  0xe9   : > { %6314 = vrot.lane.b32.xlu1 %v6313_v49, %s7263_s30  ;;  %6319 = vrot.lane.b32.xlu0 %v6318_v55, %s7262_s3  ;;  %vm1012_vm5 = vcmask 261120   ;;  %v891_v32 = vsel %vm7727_vm4, 0.0, %v7686_v50  ;;  %vm1021_vm6 = vcmask 523264   ;;  %vm1118_vm7 = vcmask 785408   ;;  %v6346_v39 = vld [vmem:[#allocation7 + $0x170] ss:$8 sps:$4 sm:$0xff]   ;;  %vm5592_vm9 = vmneg %vm7727_vm4 }
  0xea   : > { %1141 = vmatprep.subr.bf16.mxu0 %v6337_v56  ;;  %1930 = vmatprep.subr.bf16.mxu1 %v6373_v13  ;;  %v786_v28 = vand.u32 31, %v750_v25  ;;  %v6351_v46 = vld [vmem:[#allocation7 + $0x164] ss:$8 sps:$4 sm:$0xff]   ;;  %v6352_v13 = vld [vmem:[#allocation7 + $0x150] ss:$8 sps:$4 sm:$0xff]   ;;  %vm7264_vm10 = vmmov 1  }
  0xeb   : > { %v6360_v25 = vld [vmem:[#allocation7 + $0x134] ss:$8 sps:$4 sm:$0xff]   ;;  %vm7941_vm11 = vmpackc.low %vm7264_vm10, %vm5592_vm9  ;;  %v6453_v38 = vld [vmem:[#allocation7 + $0x244] ss:$8 sps:$4 sm:$0xff]   ;;  %s8494_s27 = sld [smem:[#allocation35_spill]]  ;;  %s7267_s5 = smov 2  }
  0xec   : > { %1142 = vmatpush1.bf16.msra.mxu0 %v6339_v61  ;;  %1931 = vmatpush1.bf16.msra.mxu1 %v6375_v14  ;;  %vm7734_vm8 = vcmp.eq.s32.totalorder %v786_v28, 0  ;;  %v6354_v61 = vld [vmem:[#allocation7 + $0x154] ss:$8 sps:$4 sm:$0xff]   ;;  %vm5609_vm15 = vmpackc.low %vm5608_vm14, %vm7264_vm10  ;;  %s8495_s3 = sld [smem:[#allocation34_spill]]  ;;  %s7269_s18 = smov 4  }
  0xed   : > { %6324 = vrot.lane.b32.xlu1 %v6323_v60, %s7263_s30  ;;  %1143 = vmatprep.subr.bf16.mxu0 %v6340_v0  ;;  %v895_v53 = vsel %vm7734_vm8, 0.0, %v7712_v63  ;;  %v6366_v28 = vld [vmem:[#allocation7 + $0x114] ss:$8 sps:$4 sm:$0xff]   ;;  %vm5600_vm12 = vmneg %vm7734_vm8  ;;  %s7268_s30 = smov 126   ;;  %s8496_s29 = sld [smem:[#allocation36_spill]] }
  0xee   : > { %1932 = vmatprep.subr.bf16.mxu1 %v6379_v15  ;;  %vm7991_vm13 = vmpackc.low %vm7264_vm10, %vm5600_vm12 }
  0xef   : > { %vm5617_vm4 = vmpackc.low %vm5616_vm1, %vm7264_vm10 }
  0xf0   : > { %1144 = vmatpush1.bf16.msra.mxu0 %v6342_v4  ;;  %1933 = vmatpush1.bf16.msra.mxu1 %v6381_v16  ;;  %v6357_v16 = vld [vmem:[#allocation7 + $0x144] ss:$8 sps:$4 sm:$0xff]  }
  0xf1   : > { %1145 = vmatprep.subr.bf16.mxu0 %v6343_v8  ;;  %1934 = vmatprep.subr.bf16.mxu1 %v6385_v17  ;;  %s731_s4 = scalar_lea.vmem %s8494_s27, %s5478_s24 }
  0xf3   : > { %s735_s21 = scalar_lea.vmem %s8496_s29, %s5478_s24 }
  0xf4   : > { %1146 = vmatpush1.bf16.msra.mxu0 %v6345_v9  ;;  %1935 = vmatpush1.bf16.msra.mxu1 %v6387_v18 }
  0xf5   : > { %2001 = vmatprep.subr.bf16.mxu0 %v6348_v10  ;;  %1936 = vmatprep.subr.bf16.mxu1 %v6391_v19 }
  0xf8   : > { %1937 = vmatpush1.bf16.msra.mxu1 %v6393_v20 }
  0xf9   : > { %1938 = vmatprep.subr.bf16.mxu1 %v6397_v21 }
  0xfc   : > { %1939 = vmatpush1.bf16.msra.mxu1 %v6399_v22  ;;  %v6355_v22 = vld [vmem:[#allocation7 + $0x140] ss:$8 sps:$4 sm:$0xff]  }
 0x14e   : > { %v6290_v27 = vpop.permute.xlu0 %6289 }
 0x14f   : > { %v6292_v29 = vunpack.i.h.bf16 %v6290_v27  ;;  %v6291_v30 = vunpack.i.l.bf16 %v6290_v27  ;;  %v6363_v27 = vld [vmem:[#allocation7 + $0x124] ss:$8 sps:$4 sm:$0xff]  }
 0x150   : > { %v6300_v31 = vpop.permute.xlu1 %6299 }
 0x151   : > { %v6302_v33 = vunpack.i.h.bf16 %v6300_v31  ;;  %v6301_v34 = vunpack.i.l.bf16 %v6300_v31  ;;  %v1013_v40 = vsel %vm1012_vm5, %v891_v32, %v6291_v30  ;;  %v1014_v41 = vsel %vm1012_vm5, %v7680_v47, %v6292_v29  ;;  %v6364_v29 = vld [vmem:[#allocation7 + $0x110] ss:$8 sps:$4 sm:$0xff]   ;;  %v6372_v30 = vld [vmem:[#allocation7 + $0x104] ss:$8 sps:$4 sm:$0xff]   ;;  %v6370_v31 = vld [vmem:[#allocation7 + $0x100] ss:$8 sps:$4 sm:$0xff]  }
 0x152   : > { %v6378_v32 = vld [vmem:[#allocation7 + $0x1f4] ss:$8 sps:$4 sm:$0xff]  }
 0x153   : > { %v6295_v35 = vpop.permute.xlu0 %6294  ;;  %v1015_v43 = vsel %vm1012_vm5, %v7703_v59, %v6301_v34  ;;  %v1016_v44 = vsel %vm1012_vm5, %v7699_v58, %v6302_v33  ;;  %v6349_v58 = vld [vmem:[#allocation7 + $0x160] ss:$8 sps:$4 sm:$0xff]   ;;  %v6376_v33 = vld [vmem:[#allocation7 + $0x1f0] ss:$8 sps:$4 sm:$0xff]   ;;  %v6384_v34 = vld [vmem:[#allocation7 + $0x1e4] ss:$8 sps:$4 sm:$0xff]  }
 0x154   : > { %v6297_v36 = vunpack.i.h.bf16 %v6295_v35  ;;  %v6296_v37 = vunpack.i.l.bf16 %v6295_v35  ;;  %v6382_v35 = vld [vmem:[#allocation7 + $0x1e0] ss:$8 sps:$4 sm:$0xff]  }
 0x156   : > { %v1022_v48 = vsel %vm1021_vm6, %v1013_v40, %v6296_v37  ;;  %v1023_v49 = vsel %vm1021_vm6, %v1014_v41, %v6297_v36  ;;  %v6390_v36 = vld [vmem:[#allocation7 + $0x1d4] ss:$8 sps:$4 sm:$0xff]   ;;  %v6388_v37 = vld [vmem:[#allocation7 + $0x1d0] ss:$8 sps:$4 sm:$0xff]   ;;  %v6394_v40 = vld [vmem:[#allocation7 + $0x1c0] ss:$8 sps:$4 sm:$0xff]  }
 0x157   : > { %v6305_v45 = vpop.permute.xlu1 %6304  ;;  %v1030_v52 = vpack.c.bf16 %v1023_v49, %v1022_v48  ;;  %v6310_v47 = vpop.permute.xlu0 %6309  ;;  %v6402_v41 = vld [vmem:[#allocation7 + $0x1b4] ss:$8 sps:$4 sm:$0xff]   ;;  %v6406_v48 = vld [vmem:[#allocation7 + $0x1a0] ss:$8 sps:$4 sm:$0xff]   ;;  %v6409_v49 = vld [vmem:[#allocation7 + $0x4] ss:$8 sps:$4 sm:$0xff]  }
 0x158   : > { %v6307_v50 = vunpack.i.h.bf16 %v6305_v45  ;;  %v6306_v51 = vunpack.i.l.bf16 %v6305_v45  ;;  %v6312_v56 = vunpack.i.h.bf16 %v6310_v47  ;;  %v6311_v57 = vunpack.i.l.bf16 %v6310_v47  ;;  %v6405_v45 = vld [vmem:[#allocation7 + $0x10] ss:$8 sps:$4 sm:$0xff]  }
 0x159   : > { %5492 = vmatmul.mubr.msk.bf16.vlgmr.msra.gmra.mxu0 %vm1118_vm7, %v1030_v52  ;;  %v6412_v52 = vld [vmem:[#allocation7 + $0x190] ss:$8 sps:$4 sm:$0xff]  }
 0x15a   : > { %v1024_v54 = vsel %vm1021_vm6, %v1015_v43, %v6306_v51  ;;  %v1025_v55 = vsel %vm1021_vm6, %v1016_v44, %v6307_v50  ;;  %1173 = vmatprep.mubr.bf16.mxu0 %v8434_v5  ;;  %v1018_v0 = vsel %vm1012_vm5, %v7708_v62, %v6312_v56  ;;  %v1017_v63 = vsel %vm1012_vm5, %v895_v53, %v6311_v57  ;;  %v6400_v43 = vld [vmem:[#allocation7 + $0x1b0] ss:$8 sps:$4 sm:$0xff]   ;;  %v6403_v44 = vld [vmem:[#allocation7 + $0x14] ss:$8 sps:$4 sm:$0xff]   ;;  %v6411_v50 = vld [vmem:[#allocation7] ss:$8 sps:$4 sm:$0xff]  }
 0x15b   : > { %v1031_v59 = vpack.c.bf16 %v1025_v55, %v1024_v54  ;;  %v6315_v60 = vpop.permute.xlu1 %6314  ;;  %2002 = vmatpush1.bf16.msra.mxu0 %v6346_v39  ;;  %v6320_v8 = vpop.permute.xlu0 %6319  ;;  %v6396_v39 = vld [vmem:[#allocation7 + $0x1c4] ss:$8 sps:$4 sm:$0xff]   ;;  %1940 = vmatprep.subr.bf16.mxu1 %v6403_v44  ;;  %v6414_v51 = vld [vmem:[#allocation7 + $0x194] ss:$8 sps:$4 sm:$0xff]   ;;  %v6417_v47 = vld [vmem:[#allocation7 + $0xf0] ss:$8 sps:$4 sm:$0xff]  }
 0x15c   : > { %v6317_v3 = vunpack.i.h.bf16 %v6315_v60  ;;  %v6316_v4 = vunpack.i.l.bf16 %v6315_v60  ;;  %2003 = vmatprep.subr.bf16.mxu0 %v6351_v46  ;;  %v6322_v11 = vunpack.i.h.bf16 %v6320_v8  ;;  %v6321_v12 = vunpack.i.l.bf16 %v6320_v8  ;;  %v6408_v46 = vld [vmem:[#allocation7 + $0x1a4] ss:$8 sps:$4 sm:$0xff]   ;;  %1941 = vmatpush1.bf16.msra.mxu1 %v6405_v45  ;;  %v6415_v53 = vld [vmem:[#allocation7 + $0xf4] ss:$8 sps:$4 sm:$0xff]   ;;  %v6418_v55 = vld [vmem:[#allocation7 + $0x180] ss:$8 sps:$4 sm:$0xff]  }
 0x15d   : > { %1942 = vmatprep.subr.bf16.mxu1 %v6409_v49  ;;  %v6420_v54 = vld [vmem:[#allocation7 + $0x184] ss:$8 sps:$4 sm:$0xff]   ;;  %v6423_v57 = vld [vmem:[#allocation7 + $0xe0] ss:$8 sps:$4 sm:$0xff]   ;;  %v6436_v8 = vld [vmem:[#allocation7 + $0x94] ss:$8 sps:$4 sm:$0xff]  }
 0x15e   : > { %v1026_v9 = vsel %vm1021_vm6, %v1017_v63, %v6316_v4  ;;  %v1027_v10 = vsel %vm1021_vm6, %v1018_v0, %v6317_v3  ;;  %v1020_v62 = vsel %vm1012_vm5, %v7719_v6, %v6322_v11  ;;  %v1019_v17 = vsel %vm1012_vm5, %v7723_v7, %v6321_v12  ;;  %v6358_v6 = vld [vmem:[#allocation7 + $0x130] ss:$8 sps:$4 sm:$0xff]   ;;  %v6361_v7 = vld [vmem:[#allocation7 + $0x120] ss:$8 sps:$4 sm:$0xff]   ;;  %v6421_v56 = vld [vmem:[#allocation7 + $0xe4] ss:$8 sps:$4 sm:$0xff]  }
 0x15f   : > { %v1032_v14 = vpack.c.bf16 %v1027_v10, %v1026_v9  ;;  %v6325_v15 = vpop.permute.xlu1 %6324  ;;  %2004 = vmatpush1.bf16.msra.mxu0 %v6349_v58  ;;  %v6424_v58 = vld [vmem:[#allocation7 + $0xd4] ss:$8 sps:$4 sm:$0xff]   ;;  %v6427_v60 = vld [vmem:[#allocation7 + $0xc4] ss:$8 sps:$4 sm:$0xff]   ;;  %v6432_v63 = vld [vmem:[#allocation7 + $0xb0] ss:$8 sps:$4 sm:$0xff]  }
 0x160   : > { %v6327_v18 = vunpack.i.h.bf16 %v6325_v15  ;;  %v6326_v19 = vunpack.i.l.bf16 %v6325_v15  ;;  %2005 = vmatprep.subr.bf16.mxu0 %v6354_v61  ;;  %1943 = vmatpush1.bf16.msra.mxu1 %v6411_v50  ;;  %v6429_v61 = vld [vmem:[#allocation7 + $0xc0] ss:$8 sps:$4 sm:$0xff]   ;;  %v6430_v0 = vld [vmem:[#allocation7 + $0xb4] ss:$8 sps:$4 sm:$0xff]   ;;  %v6433_v3 = vld [vmem:[#allocation7 + $0xa4] ss:$8 sps:$4 sm:$0xff]  }
 0x161   : > { %5493 = vmatmul.mubr.msk.bf16.gmra.mxu0 %vm1118_vm7, %v1031_v59  ;;  %1944 = vmatprep.subr.bf16.mxu1 %v6415_v53  ;;  %v6426_v59 = vld [vmem:[#allocation7 + $0xd0] ss:$8 sps:$4 sm:$0xff]   ;;  %v6435_v4 = vld [vmem:[#allocation7 + $0xa0] ss:$8 sps:$4 sm:$0xff]   ;;  %v6439_v10 = vld [vmem:[#allocation7 + $0x84] ss:$8 sps:$4 sm:$0xff]  }
 0x162   : > { %v1028_v20 = vsel %vm1021_vm6, %v1019_v17, %v6326_v19  ;;  %v1029_v21 = vsel %vm1021_vm6, %v1020_v62, %v6327_v18  ;;  %1183 = vmatprep.mubr.bf16.mxu0 %v8434_v5  ;;  %v6438_v9 = vld [vmem:[#allocation7 + $0x90] ss:$8 sps:$4 sm:$0xff]   ;;  %v6441_v11 = vld [vmem:[#allocation7 + $0x80] ss:$8 sps:$4 sm:$0xff]   ;;  %v6444_v12 = vld [vmem:[#allocation7 + $0x274] ss:$8 sps:$4 sm:$0xff]  }
 0x163   : > { %v1033_v24 = vpack.c.bf16 %v1029_v21, %v1028_v20  ;;  %2006 = vmatpush1.bf16.msra.mxu0 %v6352_v13  ;;  %v7771_v13 = vsub.s32 0, %v7604_v1 }
 0x164   : > { %2007 = vmatprep.subr.bf16.mxu0 %v6357_v16  ;;  %1945 = vmatpush2.bf16.msra.mxu1 %v6417_v47  ;;  %v7777_v16 = vsub.s32 1, %v7604_v1 }
 0x165   : > { %1946 = vmatprep.subr.bf16.mxu1 %v6421_v56 }
 0x167   : > { %2008 = vmatpush1.bf16.msra.mxu0 %v6355_v22 }
 0x168   : > { %2009 = vmatprep.subr.bf16.mxu0 %v6360_v25  ;;  %1947 = vmatpush2.bf16.msra.mxu1 %v6423_v57 }
 0x169   : > { %5494 = vmatmul.mubr.msk.bf16.gmra.mxu0 %vm1118_vm7, %v1032_v14  ;;  %1948 = vmatprep.subr.bf16.mxu1 %v6424_v58  ;;  %v1046_v14 = vld [vmem:[#allocation6] sm:$0x3] }
 0x16a   : > { %1193 = vmatprep.mubr.bf16.mxu0 %v8434_v5  ;;  %v7774_v15 = vrot.slane %v1046_v14, %v7771_v13  ;;  %v7781_v18 = vrot.slane %v1046_v14, %v7777_v16 }
 0x16b   : > { %2010 = vmatpush1.bf16.msra.mxu0 %v6358_v6 }
 0x16c   : > { %2011 = vmatprep.subr.bf16.mxu0 %v6363_v27  ;;  %1949 = vmatpush2.bf16.msra.mxu1 %v6426_v59 }
 0x16d   : > { %1950 = vmatprep.subr.bf16.mxu1 %v6427_v60 }
 0x16f   : > { %2012 = vmatpush1.bf16.msra.mxu0 %v6361_v7 }
 0x170   : > { %2013 = vmatprep.subr.bf16.mxu0 %v6366_v28  ;;  %1951 = vmatpush2.bf16.msra.mxu1 %v6429_v61 }
 0x171   : > { %5495 = vmatmul.mubr.msk.bf16.gmra.mxu0 %vm1118_vm7, %v1033_v24  ;;  %1952 = vmatprep.subr.bf16.mxu1 %v6430_v0 }
 0x173   : > { %2014 = vmatpush1.bf16.msra.mxu0 %v6364_v29 }
 0x174   : > { %2015 = vmatprep.subr.bf16.mxu0 %v6372_v30  ;;  %1953 = vmatpush2.bf16.msra.mxu1 %v6432_v63 }
 0x175   : > { %1954 = vmatprep.subr.bf16.mxu1 %v6433_v3 }
 0x177   : > { %2016 = vmatpush1.bf16.msra.mxu0 %v6370_v31 }
 0x178   : > { %2017 = vmatprep.subr.bf16.mxu0 %v6378_v32  ;;  %1955 = vmatpush2.bf16.msra.mxu1 %v6435_v4 }
 0x179   : > { %1956 = vmatprep.subr.bf16.mxu1 %v6436_v8 }
 0x17b   : > { %2018 = vmatpush2.bf16.msra.mxu0 %v6376_v33 }
 0x17c   : > { %2019 = vmatprep.subr.bf16.mxu0 %v6384_v34  ;;  %1957 = vmatpush2.bf16.msra.mxu1 %v6438_v9 }
 0x17d   : > { %1958 = vmatprep.subr.bf16.mxu1 %v6439_v10 }
 0x17f   : > { %2020 = vmatpush2.bf16.msra.mxu0 %v6382_v35 }
 0x180   : > { %2021 = vmatprep.subr.bf16.mxu0 %v6390_v36  ;;  %1959 = vmatpush2.bf16.msra.mxu1 %v6441_v11 }
 0x181   : > { %2074 = vmatprep.subr.bf16.mxu1 %v6444_v12 }
 0x183   : > { %2022 = vmatpush2.bf16.msra.mxu0 %v6388_v37 }
 0x184   : > { %2023 = vmatprep.subr.bf16.mxu0 %v6396_v39 }
 0x187   : > { %2024 = vmatpush2.bf16.msra.mxu0 %v6394_v40 }
 0x188   : > { %2025 = vmatprep.subr.bf16.mxu0 %v6402_v41 }
 0x18b   : > { %2026 = vmatpush2.bf16.msra.mxu0 %v6400_v43 }
 0x18c   : > { %2027 = vmatprep.subr.bf16.mxu0 %v6408_v46 }
 0x18f   : > { %2028 = vmatpush2.bf16.msra.mxu0 %v6406_v48 }
 0x190   : > { %2029 = vmatprep.subr.bf16.mxu0 %v6414_v51 }
 0x193   : > { %2030 = vmatpush2.bf16.msra.mxu0 %v6412_v52 }
 0x194   : > { %2031 = vmatprep.subr.bf16.mxu0 %v6420_v54 }
 0x197   : > { %2032 = vmatpush2.bf16.msra.mxu0 %v6418_v55 }
 0x219   : > { %v1165_v62 = vpop.f32.mrf.mxu0 }
 0x21a   : > { %v1166_v17 = vadd.f32 %v1165_v62, %v7774_v15 }
 0x21b   : > { %v1167_v19 = vpop.f32.mrf.mxu0 }
 0x21c   : > { %v7783_v21 = vmax.f32 %v1166_v17, 0.0  ;;  %v1168_v24 = vadd.f32 %v1167_v19, %v7781_v18 }
 0x21d   : > { %v1169_v20 = vpop.f32.mrf.mxu0 }
 0x21e   : > { %v1170_v22 = vadd.f32 %v1169_v20, %v7774_v15  ;;  %v1268_v28 = vrot.slane %v7783_v21, 1  ;;  %v7794_v31 = vmax.f32 %v1168_v24, 0.0 }
 0x21f   : > { %v1171_v25 = vpop.f32.mrf.mxu0 }
 0x220   : > { %v7787_v6 = vmax.f32 %v1170_v22, 0.0  ;;  %v1172_v27 = vadd.f32 %v1171_v25, %v7781_v18 }
 0x221   : > { %v1175_v7 = vpop.f32.mrf.mxu0 }
 0x222   : > { %v1270_v29 = vrot.slane %v7787_v6, 1  ;;  %v7792_v30 = vmax.f32 %v1172_v27, 0.0  ;;  %v1176_v32 = vadd.f32 %v1175_v7, %v7774_v15  ;;  %v1318_v39 = vpack.c.bf16 %v7787_v6, %v7783_v21 }
 0x223   : > { %v1177_v33 = vpop.f32.mrf.mxu0 }
 0x224   : > { %v7801_v34 = vsel %vm915_vm0, %v1268_v28, %v1270_v29  ;;  %v7803_v35 = vmax.f32 %v1176_v32, 0.0  ;;  %v1319_v37 = vpack.c.bf16 %v7792_v30, %v7794_v31  ;;  %v1178_v40 = vadd.f32 %v1177_v33, %v7781_v18 }
 0x225   : > { %v1179_v36 = vpop.f32.mrf.mxu0 }
 0x226   : > { %v1180_v41 = vadd.f32 %v1179_v36, %v7774_v15  ;;  %v1272_v43 = vrot.slane %v7803_v35, 1  ;;  %2033 = vmatprep.mubr.bf16.mxu0 %v1319_v37  ;;  %v7821_v51 = vmax.f32 %v1178_v40, 0.0 }
 0x227   : > { %v1181_v44 = vpop.f32.mrf.mxu0  ;;  %2034 = vmatmul.mubr.bf16.vlgmr.msra.gmra.mxu0 %v1318_v39 }
 0x228   : > { %v7812_v45 = vmax.f32 %v1180_v41, 0.0  ;;  %v1182_v46 = vadd.f32 %v1181_v44, %v7781_v18  ;;  %v7817_v48 = vsel %vm915_vm0, %v1270_v29, %v1272_v43  ;;  %v1273_v14 = vrot.slane %v7821_v51, 1 }
 0x229   : > { %v1185_v49 = vpop.f32.mrf.mxu0  ;;  %v1320_v50 = vpack.c.bf16 %v7817_v48, %v7801_v34 }
 0x22a   : > { %v1274_v52 = vrot.slane %v7812_v45, 1  ;;  %v7824_v53 = vmax.f32 %v1182_v46, 0.0  ;;  %v1186_v47 = vadd.f32 %v1185_v49, %v7774_v15  ;;  %v1324_v0 = vpack.c.bf16 %v7812_v45, %v7803_v35 }
 0x22b   : > { %v1187_v54 = vpop.f32.mrf.mxu0 }
 0x22c   : > { %v1188_v55 = vadd.f32 %v1187_v54, %v7781_v18  ;;  %v1325_v56 = vpack.c.bf16 %v7824_v53, %v7821_v51  ;;  %v7830_v57 = vmax.f32 %v1186_v47, 0.0  ;;  %v7834_v59 = vsel %vm915_vm0, %v1272_v43, %v1274_v52 }
 0x22d   : > { %v1189_v58 = vpop.f32.mrf.mxu0  ;;  %v1275_v4 = vrot.slane %v7824_v53, 1  ;;  %v1220_v54 = vrot.slane %v7783_v21, 7 }
 0x22e   : > { %v7836_v60 = vmax.f32 %v1188_v55, 0.0  ;;  %v1190_v61 = vadd.f32 %v1189_v58, %v7774_v15  ;;  %2043 = vmatprep.mubr.bf16.mxu0 %v1325_v56  ;;  %v1276_v63 = vrot.slane %v7830_v57, 1  ;;  %v1223_v55 = vrot.slane %v7792_v30, 7 }
 0x22f   : > { %v1191_v3 = vpop.f32.mrf.mxu0  ;;  %2044 = vmatmul.mubr.bf16.gmra.mxu0 %v1324_v0  ;;  %v7870_v29 = vsel %vm915_vm0, %v1273_v14, %v1275_v4  ;;  %v1227_v58 = vrot.slane %v7824_v53, 7 }
 0x230   : > { %v1277_v8 = vrot.slane %v7836_v60, 1  ;;  %v7844_v9 = vmax.f32 %v1190_v61, 0.0  ;;  %v1192_v10 = vadd.f32 %v1191_v3, %v7781_v18  ;;  %v7849_v12 = vsel %vm915_vm0, %v1274_v52, %v1276_v63 }
 0x231   : > { %v1195_v11 = vpop.f32.mrf.mxu0  ;;  %v5614_v24 = vpack.c.bf16 %v7849_v12, %v7834_v59  ;;  %v1222_v3 = vrot.slane %v7787_v6, 7 }
 0x232   : > { %v1278_v62 = vrot.slane %v7844_v9, 1  ;;  %v7853_v17 = vmax.f32 %v1192_v10, 0.0  ;;  %v1196_v19 = vadd.f32 %v1195_v11, %v7774_v15  ;;  %v7858_v22 = vsel %vm915_vm0, %v1275_v4, %v1277_v8 }
 0x233   : > { %v1197_v20 = vpop.f32.mrf.mxu0  ;;  %v5610_v36 = vpack.c.bf16 %v7858_v22, %v7870_v29  ;;  %v1330_v43 = vpack.c.bf16 %v7844_v9, %v7830_v57 }
 0x234   : > { %v1279_v25 = vrot.slane %v7853_v17, 1  ;;  %v7863_v27 = vmax.f32 %v1196_v19, 0.0  ;;  %v1198_v7 = vadd.f32 %v1197_v20, %v7781_v18  ;;  %v1331_v33 = vpack.c.bf16 %v7853_v17, %v7836_v60 }
 0x235   : > { %v1199_v32 = vpop.f32.mrf.mxu0  ;;  %v7878_v37 = vsel %vm915_vm0, %v1276_v63, %v1278_v62 }
 0x236   : > { %v1280_v39 = vrot.slane %v7863_v27, 1  ;;  %v7881_v40 = vmax.f32 %v1198_v7, 0.0  ;;  %v1200_v41 = vadd.f32 %v1199_v32, %v7774_v15  ;;  %2053 = vmatprep.mubr.bf16.mxu0 %v1331_v33  ;;  %v7888_v46 = vsel %vm915_vm0, %v1277_v8, %v1279_v25  ;;  %v6475_v33 = vld [vmem:[#allocation7 + $0x2c0] ss:$8 sps:$4 sm:$0xff]  }
 0x237   : > { %v1201_v44 = vpop.f32.mrf.mxu0  ;;  %2054 = vmatmul.mubr.bf16.gmra.mxu0 %v1330_v43  ;;  %v1221_v15 = vrot.slane %v7794_v31, 7  ;;  %v1225_v8 = vrot.slane %v7821_v51, 7  ;;  %v6463_v51 = vld [vmem:[#allocation7 + $0x200] ss:$8 sps:$4 sm:$0xff]  }
 0x238   : > { %v1281_v49 = vrot.slane %v7881_v40, 1  ;;  %v7891_v52 = vmax.f32 %v1200_v41, 0.0  ;;  %v1202_v47 = vadd.f32 %v1201_v44, %v7781_v18  ;;  %v7899_v56 = vsel %vm915_vm0, %v1278_v62, %v1280_v39  ;;  %v6442_v44 = vld [vmem:[#allocation7 + $0x270] ss:$8 sps:$4 sm:$0xff]  }
 0x239   : > { %v1269_v18 = vrot.slane %v7794_v31, 1  ;;  %v1332_v53 = vpack.c.bf16 %v7899_v56, %v7878_v37  ;;  %v1249_v6 = vsel %vm866_vm2, %v1221_v15, %v1223_v55  ;;  %v6472_v31 = vld [vmem:[#allocation7 + $0x2d0] ss:$8 sps:$4 sm:$0xff]  }
 0x23a   : > { %v1234_v61 = vrot.slane %v7891_v52, 7  ;;  %v1282_v0 = vrot.slane %v7891_v52, 1  ;;  %v7904_v63 = vmax.f32 %v1202_v47, 0.0  ;;  %v7912_v4 = vsel %vm915_vm0, %v1279_v25, %v1281_v49 }
 0x23b   : > { %v1333_v20 = vpack.c.bf16 %v7912_v4, %v7888_v46  ;;  %v1336_v7 = vpack.c.bf16 %v7891_v52, %v7863_v27  ;;  %v1248_v47 = vsel %vm866_vm2, %v1220_v54, %v1222_v3  ;;  %v6465_v52 = vld [vmem:[#allocation7 + $0x204] ss:$8 sps:$4 sm:$0xff]  }
 0x23c   : > { %v1235_v10 = vrot.slane %v7904_v63, 7  ;;  %v1283_v11 = vrot.slane %v7904_v63, 1  ;;  %v1337_v62 = vpack.c.bf16 %v7904_v63, %v7881_v40  ;;  %v1250_v19 = vsel %vm866_vm2, %v1234_v61, %v1220_v54 }
 0x23d   : > { %v7931_v25 = vsel %vm915_vm0, %v1280_v39, %v1282_v0  ;;  %v1245_v39 = vsel %vm866_vm2, %v1225_v8, %v1227_v58  ;;  %v1247_v63 = vsel %vm866_vm2, %v1223_v55, %v1225_v8  ;;  %v1224_v55 = vrot.slane %v7803_v35, 7 }
 0x23e   : > { %2063 = vmatprep.mubr.bf16.mxu0 %v1337_v62  ;;  %v1251_v32 = vsel %vm866_vm2, %v1235_v10, %v1221_v15  ;;  %v7949_v41 = vsel %vm915_vm0, %v1281_v49, %v1283_v11  ;;  %v7957_v26 = vsel %vm915_vm0, %v1283_v11, %v1269_v18  ;;  %v7963_v15 = vsel %vm915_vm0, %v1282_v0, %v1268_v28  ;;  %v6447_v62 = vld [vmem:[#allocation7 + $0x264] ss:$8 sps:$4 sm:$0xff]   ;;  %v6445_v0 = vld [vmem:[#allocation7 + $0x260] ss:$8 sps:$4 sm:$0xff]  }
 0x23f   : > { %v5594_v43 = vpack.c.bf16 %v1249_v6, %v1251_v32  ;;  %2064 = vmatmul.mubr.bf16.gmra.mxu0 %v1336_v7  ;;  %v5598_v49 = vpack.c.bf16 %v1248_v47, %v1250_v19  ;;  %v5618_v54 = vpack.c.bf16 %v7957_v26, %v7949_v41  ;;  %v5622_v6 = vpack.c.bf16 %v7963_v15, %v7931_v25  ;;  %v6448_v7 = vld [vmem:[#allocation7 + $0x250] ss:$8 sps:$4 sm:$0xff]  }
 0x240   : > { %v1226_v11 = vrot.slane %v7812_v45, 7  ;;  %v1323_v21 = vpack.c.bf16 %v1245_v39, %v1247_v63  ;;  %2271 = vmatprep.mubr.bf16.mxu0 %v8434_v5  ;;  %v1231_v28 = vrot.slane %v7853_v17, 7  ;;  %v1229_v8 = vrot.slane %v7836_v60, 7  ;;  %v6450_v45 = vld [vmem:[#allocation7 + $0x254] ss:$8 sps:$4 sm:$0xff]  }
 0x241   : > { %5595 = vmatprep.mubr.msk.bf16.mxu1 %vm7941_vm11, %v5594_v43  ;;  %v1246_v35 = vsel %vm866_vm2, %v1222_v3, %v1224_v55  ;;  %v1230_v39 = vrot.slane %v7844_v9, 7  ;;  %v6451_v3 = vld [vmem:[#allocation7 + $0x240] ss:$8 sps:$4 sm:$0xff]   ;;  %v1233_v47 = vrot.slane %v7881_v40, 7  ;;  %v6454_v9 = vld [vmem:[#allocation7 + $0x230] ss:$8 sps:$4 sm:$0xff]  }
 0x242   : > { %5599 = vmatmul.mubr.msk.bf16.vlgmr.msra.gmra.mxu1 %vm7941_vm11, %v5598_v49  ;;  %v1244_v19 = vsel %vm866_vm2, %v1224_v55, %v1226_v11  ;;  %v1241_v17 = vsel %vm866_vm2, %v1229_v8, %v1231_v28  ;;  %v1243_v60 = vsel %vm866_vm2, %v1227_v58, %v1229_v8  ;;  %v6456_v58 = vld [vmem:[#allocation7 + $0x234] ss:$8 sps:$4 sm:$0xff]   ;;  %v6459_v55 = vld [vmem:[#allocation7 + $0x224] ss:$8 sps:$4 sm:$0xff]   ;;  %v1271_v8 = vrot.slane %v7792_v30, 1 }
 0x243   : > { %2075 = vmatpush1.bf16.msra.mxu1 %v6442_v44  ;;  %1970 = vmatprep.mubr.bf16.mxu1 %v1323_v21  ;;  %v1322_v32 = vpack.c.bf16 %v1244_v19, %v1246_v35  ;;  %v5602_v43 = vpack.c.bf16 %v1241_v17, %v1243_v60  ;;  %v1228_v44 = vrot.slane %v7830_v57, 7  ;;  %v1237_v63 = vsel %vm866_vm2, %v1233_v47, %v1235_v10  ;;  %v6457_v10 = vld [vmem:[#allocation7 + $0x220] ss:$8 sps:$4 sm:$0xff]   ;;  %v6460_v19 = vld [vmem:[#allocation7 + $0x210] ss:$8 sps:$4 sm:$0xff]  }
 0x244   : > { %2076 = vmatprep.subr.bf16.mxu1 %v6447_v62  ;;  %v1239_v21 = vsel %vm866_vm2, %v1231_v28, %v1233_v47  ;;  %v1295_v28 = vsel %vm915_vm0, %v1271_v8, %v1273_v14  ;;  %v1297_v30 = vsel %vm915_vm0, %v1269_v18, %v1271_v8  ;;  %v6468_v14 = vld [vmem:[#allocation7 + $0x2f4] ss:$8 sps:$4 sm:$0xff]   ;;  %v6471_v35 = vld [vmem:[#allocation7 + $0x2e4] ss:$8 sps:$4 sm:$0xff]   ;;  %v6484_v47 = vld [vmem:[#allocation7 + $0x290] ss:$8 sps:$4 sm:$0xff]  }
 0x245   : > { %v1240_v49 = vsel %vm866_vm2, %v1228_v44, %v1230_v39  ;;  %v1242_v57 = vsel %vm866_vm2, %v1226_v11, %v1228_v44  ;;  %v1335_v40 = vpack.c.bf16 %v1237_v63, %v1239_v21  ;;  %v6474_v60 = vld [vmem:[#allocation7 + $0x2d4] ss:$8 sps:$4 sm:$0xff]   ;;  %v6477_v18 = vld [vmem:[#allocation7 + $0x2c4] ss:$8 sps:$4 sm:$0xff]   ;;  %v6481_v44 = vld [vmem:[#allocation7 + $0x2a0] ss:$8 sps:$4 sm:$0xff]  }
 0x246   : > { %v5606_v62 = vpack.c.bf16 %v1240_v49, %v1242_v57  ;;  %v6487_v49 = vld [vmem:[#allocation7 + $0x280] ss:$8 sps:$4 sm:$0xff]  }
 0x247   : > { %2077 = vmatpush1.bf16.msra.mxu1 %v6445_v0  ;;  %v1232_v0 = vrot.slane %v7863_v27, 7 }
 0x248   : > { %2078 = vmatprep.subr.bf16.mxu1 %v6450_v45  ;;  %v6462_v45 = vld [vmem:[#allocation7 + $0x214] ss:$8 sps:$4 sm:$0xff]  }
 0x249   : > { %v1236_v11 = vsel %vm866_vm2, %v1232_v0, %v1234_v61  ;;  %v1238_v27 = vsel %vm866_vm2, %v1230_v39, %v1232_v0  ;;  %v6466_v61 = vld [vmem:[#allocation7 + $0x2f0] ss:$8 sps:$4 sm:$0xff]   ;;  %v1436_v0 = vld [vmem:[#allocation9] sm:$0x3] }
 0x24a   : > { %1971 = vmatmul.mubr.bf16.gmra.mxu1 %v1322_v32  ;;  %v1334_v17 = vpack.c.bf16 %v1236_v11, %v1238_v27  ;;  %v6469_v32 = vld [vmem:[#allocation7 + $0x2e0] ss:$8 sps:$4 sm:$0xff]   ;;  %v6478_v39 = vld [vmem:[#allocation7 + $0x2b0] ss:$8 sps:$4 sm:$0xff]   ;;  %v1441_v11 = vrot.slane %v1436_v0, %v7771_v13 }
 0x24b   : > { %2079 = vmatpush1.bf16.msra.mxu1 %v6448_v7  ;;  %5603 = vmatprep.mubr.msk.bf16.mxu1 %vm7991_vm13, %v5602_v43  ;;  %v1321_v7 = vpack.c.bf16 %v1295_v28, %v1297_v30  ;;  %v6483_v43 = vld [vmem:[#allocation7 + $0x2a4] ss:$8 sps:$4 sm:$0xff]  }
 0x24c   : > { %2080 = vmatprep.subr.bf16.mxu1 %v6453_v38  ;;  %v6480_v38 = vld [vmem:[#allocation7 + $0x2b4] ss:$8 sps:$4 sm:$0xff]  }
 0x24f   : > { %2081 = vmatpush1.bf16.msra.mxu1 %v6451_v3  ;;  %v6486_v3 = vld [vmem:[#allocation7 + $0x294] ss:$8 sps:$4 sm:$0xff]  }
 0x250   : > { %2082 = vmatprep.subr.bf16.mxu1 %v6456_v58  ;;  %v6489_v58 = vld [vmem:[#allocation7 + $0x284] ss:$8 sps:$4 sm:$0xff]  }
 0x252   : > { %5607 = vmatmul.mubr.msk.bf16.gmra.mxu1 %vm7991_vm13, %v5606_v62 }
 0x253   : > { %2083 = vmatpush1.bf16.msra.mxu1 %v6454_v9  ;;  %1990 = vmatprep.mubr.bf16.mxu1 %v1335_v40 }
 0x254   : > { %2084 = vmatprep.subr.bf16.mxu1 %v6459_v55 }
 0x257   : > { %2085 = vmatpush1.bf16.msra.mxu1 %v6457_v10 }
 0x258   : > { %2086 = vmatprep.subr.bf16.mxu1 %v6462_v45 }
 0x25a   : > { %1991 = vmatmul.mubr.bf16.gmra.mxu1 %v1334_v17 }
 0x25b   : > { %2087 = vmatpush1.bf16.msra.mxu1 %v6460_v19  ;;  %2106 = vmatprep.mubr.bf16.mxu1 %v1321_v7  ;;  %v1445_v19 = vrot.slane %v1436_v0, %v7777_v16 }
 0x25c   : > { %2088 = vmatprep.subr.bf16.mxu1 %v6465_v52 }
 0x25f   : > { %2089 = vmatpush1.bf16.msra.mxu1 %v6463_v51 }
 0x260   : > { %2090 = vmatprep.subr.bf16.mxu1 %v6468_v14 }
 0x263   : > { %2091 = vmatpush2.bf16.msra.mxu1 %v6466_v61 }
 0x264   : > { %2092 = vmatprep.subr.bf16.mxu1 %v6471_v35 }
 0x267   : > { %2093 = vmatpush2.bf16.msra.mxu1 %v6469_v32 }
 0x268   : > { %2094 = vmatprep.subr.bf16.mxu1 %v6474_v60 }
 0x26b   : > { %2095 = vmatpush2.bf16.msra.mxu1 %v6472_v31 }
 0x26c   : > { %2096 = vmatprep.subr.bf16.mxu1 %v6477_v18 }
 0x26f   : > { %2097 = vmatpush2.bf16.msra.mxu1 %v6475_v33 }
 0x270   : > { %2098 = vmatprep.subr.bf16.mxu1 %v6480_v38 }
 0x273   : > { %2099 = vmatpush2.bf16.msra.mxu1 %v6478_v39 }
 0x274   : > { %2100 = vmatprep.subr.bf16.mxu1 %v6483_v43 }
 0x277   : > { %2101 = vmatpush2.bf16.msra.mxu1 %v6481_v44 }
 0x278   : > { %2102 = vmatprep.subr.bf16.mxu1 %v6486_v3 }
 0x27b   : > { %2103 = vmatpush2.bf16.msra.mxu1 %v6484_v47 }
 0x27c   : > { %2104 = vmatprep.subr.bf16.mxu1 %v6489_v58 }
 0x27f   : > { %2105 = vmatpush2.bf16.msra.mxu1 %v6487_v49 }
 0x282   : > { %2107 = vmatmul.mubr.bf16.vlgmr.msra.gmra.mxu1 %v1320_v50 }
 0x283   : > { %5611 = vmatprep.mubr.msk.bf16.mxu1 %vm5609_vm15, %v5610_v36 }
 0x28a   : > { %5615 = vmatmul.mubr.msk.bf16.gmra.mxu1 %vm5609_vm15, %v5614_v24 }
 0x28b   : > { %2126 = vmatprep.mubr.bf16.mxu1 %v1333_v20 }
 0x292   : > { %2127 = vmatmul.mubr.bf16.gmra.mxu1 %v1332_v53 }
 0x293   : > { %5619 = vmatprep.mubr.msk.bf16.mxu1 %vm5617_vm4, %v5618_v54 }
 0x29a   : > { %5623 = vmatmul.mubr.msk.bf16.gmra.mxu1 %vm5617_vm4, %v5622_v6 }
 0x2e7   : > { %v2035_v22 = vpop.f32.mrf.mxu0 }
 0x2e9   : > { %v2037_v29 = vpop.f32.mrf.mxu0 }
 0x2eb   : > { %v2039_v37 = vpop.f32.mrf.mxu0 }
 0x2ed   : > { %v2041_v56 = vpop.f32.mrf.mxu0 }
 0x2ef   : > { %v2045_v53 = vpop.f32.mrf.mxu0 }
 0x2f1   : > { %v2047_v41 = vpop.f32.mrf.mxu0 }
 0x2f3   : > { %v2049_v26 = vpop.f32.mrf.mxu0 }
 0x2f5   : > { %v2051_v54 = vpop.f32.mrf.mxu0 }
 0x2f7   : > { %v2055_v63 = vpop.f32.mrf.mxu0 }
 0x2f9   : > { %v2057_v62 = vpop.f32.mrf.mxu0 }
 0x2fb   : > { %v2059_v40 = vpop.f32.mrf.mxu0 }
 0x2fd   : > { %v2061_v45 = vpop.f32.mrf.mxu0 }
 0x2ff   : > { %v2065_v17 = vpop.f32.mrf.mxu0 }
 0x301   : > { %v2067_v61 = vpop.f32.mrf.mxu0 }
 0x302   : > { %v1962_v23 = vpop.f32.mrf.mxu1 }
 0x303   : > { %v1963_v30 = vadd.f32 %v1962_v23, %v1441_v11  ;;  %v2069_v49 = vpop.f32.mrf.mxu0 }
 0x304   : > { %v1964_v34 = vpop.f32.mrf.mxu1 }
 0x305   : > { %v1965_v7 = vadd.f32 %v1964_v34, %v1445_v19  ;;  %v2036_v32 = vadd.f32 %v2035_v22, %v1963_v30 }
 0x306   : > { %v1966_v48 = vpop.f32.mrf.mxu1 }
 0x307   : > { %v1967_v51 = vadd.f32 %v1966_v48, %v1441_v11  ;;  %v2038_v39 = vadd.f32 %v2037_v29, %v1965_v7 }
 0x308   : > { %v1968_v50 = vpop.f32.mrf.mxu1 }
 0x309   : > { %v1969_v35 = vadd.f32 %v1968_v50, %v1445_v19  ;;  %v2040_v47 = vadd.f32 %v2039_v37, %v1967_v51 }
 0x30a   : > { %v1972_v42 = vpop.f32.mrf.mxu1 }
 0x30b   : > { %v1973_v18 = vadd.f32 %v1972_v42, %v1441_v11  ;;  %v2042_v0 = vadd.f32 %v2041_v56, %v1969_v35 }
 0x30c   : > { %v1974_v59 = vpop.f32.mrf.mxu1 }
 0x30d   : > { %v1975_v43 = vadd.f32 %v1974_v59, %v1445_v19  ;;  %v2046_v29 = vadd.f32 %v2045_v53, %v1973_v18 }
 0x30e   : > { %v1976_v12 = vpop.f32.mrf.mxu1 }
 0x30f   : > { %v1977_v44 = vadd.f32 %v1976_v12, %v1441_v11  ;;  %v2048_v12 = vadd.f32 %v2047_v41, %v1975_v43 }
 0x310   : > { %v1978_v24 = vpop.f32.mrf.mxu1 }
 0x311   : > { %v1979_v23 = vadd.f32 %v1978_v24, %v1445_v19  ;;  %v2071_v24 = vpop.f32.mrf.mxu0 }
 0x312   : > { %v1982_v36 = vpop.f32.mrf.mxu1 }
 0x313   : > { %v1983_v34 = vadd.f32 %v1982_v36, %v1441_v11  ;;  %v2052_v36 = vadd.f32 %v2051_v54, %v1979_v23 }
 0x314   : > { %v1984_v46 = vpop.f32.mrf.mxu1 }
 0x315   : > { %v1985_v3 = vadd.f32 %v1984_v46, %v1445_v19  ;;  %v2050_v46 = vadd.f32 %v2049_v26, %v1977_v44 }
 0x316   : > { %v1986_v4 = vpop.f32.mrf.mxu1 }
 0x317   : > { %v1987_v5 = vadd.f32 %v1986_v4, %v1441_v11  ;;  %v2058_v37 = vadd.f32 %v2057_v62, %v1985_v3 }
 0x318   : > { %v1988_v20 = vpop.f32.mrf.mxu1 }
 0x319   : > { %v1989_v60 = vadd.f32 %v1988_v20, %v1445_v19 }
 0x31a   : > { %v1992_v25 = vpop.f32.mrf.mxu1 }
 0x31b   : > { %v1993_v33 = vadd.f32 %v1992_v25, %v1441_v11  ;;  %v2062_v20 = vadd.f32 %v2061_v45, %v1989_v60 }
 0x31c   : > { %v1994_v15 = vpop.f32.mrf.mxu1 }
 0x31d   : > { %v1995_v48 = vadd.f32 %v1994_v15, %v1445_v19  ;;  %v2066_v59 = vadd.f32 %v2065_v17, %v1993_v33  ;;  %v2056_v15 = vadd.f32 %v2055_v63, %v1983_v34 }
 0x31e   : > { %v1996_v6 = vpop.f32.mrf.mxu1 }
 0x31f   : > { %v1997_v50 = vadd.f32 %v1996_v6, %v1441_v11  ;;  %v2068_v4 = vadd.f32 %v2067_v61, %v1995_v48 }
 0x320   : > { %v1998_v9 = vpop.f32.mrf.mxu1 }
 0x321   : > { %v1999_v22 = vadd.f32 %v1998_v9, %v1445_v19  ;;  %v2060_v9 = vadd.f32 %v2059_v40, %v1987_v5  ;;  %v2070_v11 = vadd.f32 %v2069_v49, %v1997_v50 }
 0x323   : > { %v2072_v19 = vadd.f32 %v2071_v24, %v1999_v22 }
 0x342   : > { %v2108_v57 = vpop.f32.mrf.mxu1 }
 0x343   : > { %v8063_v38 = vadd.f32 %v2108_v57, %v2036_v32 }
 0x344   : > { %v2110_v21 = vpop.f32.mrf.mxu1 }
 0x345   : > { %v2147_v42 = vmax.f32 %v8063_v38, 0.0  ;;  %v8066_v25 = vadd.f32 %v2110_v21, %v2038_v39  ;;  %v6500_v38 = vld [vmem:[#allocation10 + $0x54] ss:$8 sps:$4 sm:$0xff]  }
 0x346   : > { %v2112_v55 = vpop.f32.mrf.mxu1 }
 0x347   : > { %v8070_v21 = vrot.slane %v2147_v42, 1  ;;  %v2148_v53 = vmax.f32 %v8066_v25, 0.0  ;;  %v8073_v41 = vadd.f32 %v2112_v55, %v2040_v47  ;;  %v8485_v25 = vmov 0  }
 0x348   : > { %v8053_v10 = vpop.f32.mrf.mxu1 }
 0x349   : > { %v8076_v61 = vadd.f32 %v8053_v10, %v2042_v0 }
 0x34a   : > { %v8055_v8 = vpop.f32.mrf.mxu1 }
 0x34b   : > { %v8079_v32 = vadd.f32 %v8055_v8, %v2046_v29  ;;  %v2150_v47 = vmax.f32 %v8076_v61, 0.0 }
 0x34c   : > { %v8058_v28 = vpop.f32.mrf.mxu1 }
 0x34d   : > { %v2121_v60 = vadd.f32 %v8058_v28, %v2048_v12  ;;  %v2151_v28 = vmax.f32 %v8079_v32, 0.0 }
 0x34e   : > { %v8061_v27 = vpop.f32.mrf.mxu1 }
 0x34f   : > { %v2123_v55 = vadd.f32 %v8061_v27, %v2050_v46  ;;  %v2152_v27 = vmax.f32 %v2121_v60, 0.0 }
 0x350   : > { %v2124_v52 = vpop.f32.mrf.mxu1 }
 0x351   : > { %v2125_v62 = vadd.f32 %v2124_v52, %v2052_v36  ;;  %v2164_v52 = vrot.slane %v2148_v53, 1  ;;  %v2153_v23 = vmax.f32 %v2123_v55, 0.0 }
 0x352   : > { %v2128_v14 = vpop.f32.mrf.mxu1 }
 0x353   : > { %v2129_v17 = vadd.f32 %v2128_v14, %v2056_v15  ;;  %v2154_v10 = vmax.f32 %v2125_v62, 0.0 }
 0x354   : > { %v2130_v31 = vpop.f32.mrf.mxu1 }
 0x355   : > { %v2131_v6 = vadd.f32 %v2130_v31, %v2058_v37  ;;  %v2155_v43 = vmax.f32 %v2129_v17, 0.0 }
 0x356   : > { %v2132_v58 = vpop.f32.mrf.mxu1 }
 0x357   : > { %v2133_v54 = vadd.f32 %v2132_v58, %v2060_v9  ;;  %v2156_v31 = vmax.f32 %v2131_v6, 0.0  ;;  %v2169_v9 = vrot.slane %v2153_v23, 1 }
 0x358   : > { %v2134_v30 = vpop.f32.mrf.mxu1 }
 0x359   : > { %v2135_v57 = vadd.f32 %v2134_v30, %v2062_v20  ;;  %v2157_v44 = vmax.f32 %v2133_v54, 0.0  ;;  %v2172_v34 = vrot.slane %v2156_v31, 1  ;;  %v2170_v20 = vrot.slane %v2154_v10, 1 }
 0x35a   : > { %v2138_v7 = vpop.f32.mrf.mxu1  ;;  %v2171_v30 = vrot.slane %v2155_v43, 1 }
 0x35b   : > { %v2139_v56 = vadd.f32 %v2138_v7, %v2066_v59  ;;  %v2158_v63 = vmax.f32 %v2135_v57, 0.0  ;;  %v2173_v29 = vrot.slane %v2157_v44, 1  ;;  %v2186_v6 = vsel %vm915_vm0, %v2170_v20, %v2172_v34 }
 0x35c   : > { %v2140_v45 = vpop.f32.mrf.mxu1  ;;  %v2202_v61 = vmax.f32 %v2154_v10, %v2186_v6  ;;  %v6528_v6 = vld [vmem:[#allocation10 + $0xb0] ss:$8 sps:$4 sm:$0xff]  }
 0x35d   : > { %v2141_v26 = vadd.f32 %v2140_v45, %v2068_v4  ;;  %v2159_v5 = vmax.f32 %v2139_v56, 0.0  ;;  %v2174_v3 = vrot.slane %v2158_v63, 1  ;;  %v2149_v56 = vmax.f32 %v8073_v41, 0.0 }
 0x35e   : > { %v2142_v51 = vpop.f32.mrf.mxu1  ;;  %v2168_v4 = vrot.slane %v2152_v27, 1  ;;  %v2183_v45 = vsel %vm915_vm0, %v2171_v30, %v2173_v29  ;;  %v2185_v41 = vsel %vm915_vm0, %v2169_v9, %v2171_v30  ;;  %v6512_v30 = vld [vmem:[#allocation10 + $0x14] ss:$8 sps:$4 sm:$0xff]  }
 0x35f   : > { %v2160_v40 = vmax.f32 %v2141_v26, 0.0  ;;  %v2143_v35 = vadd.f32 %v2142_v51, %v2070_v11  ;;  %v2175_v8 = vrot.slane %v2159_v5, 1  ;;  %v2184_v59 = vsel %vm915_vm0, %v2172_v34, %v2174_v3  ;;  %v6503_v34 = vld [vmem:[#allocation10 + $0x44] ss:$8 sps:$4 sm:$0xff]  }
 0x360   : > { %v2144_v18 = vpop.f32.mrf.mxu1  ;;  %v2166_v26 = vrot.slane %v2150_v47, 1  ;;  %v2188_v54 = vsel %vm915_vm0, %v2168_v4, %v2170_v20  ;;  %v2167_v51 = vrot.slane %v2151_v28, 1  ;;  %v2201_v55 = vmax.f32 %v2153_v23, %v2185_v41  ;;  %v6498_v23 = vld [vmem:[#allocation10 + $0x50] ss:$8 sps:$4 sm:$0xff]   ;;  %v6507_v20 = vld [vmem:[#allocation10 + $0x20] ss:$8 sps:$4 sm:$0xff]  }
 0x361   : > { %v2176_v14 = vrot.slane %v2160_v40, 1  ;;  %v2161_v33 = vmax.f32 %v2143_v35, 0.0  ;;  %v2145_v39 = vadd.f32 %v2144_v18, %v2072_v19  ;;  %v2181_v7 = vsel %vm915_vm0, %v2173_v29, %v2175_v8  ;;  %v6510_v29 = vld [vmem:[#allocation10 + $0x10] ss:$8 sps:$4 sm:$0xff]   ;;  %v6543_v41 = vld [vmem:[#allocation12 + $0x60] ss:$8 sps:$4 sm:$0xff]  }
 0x362   : > { %v2204_v19 = vmax.f32 %v2156_v31, %v2184_v59  ;;  %v2205_v62 = vmax.f32 %v2157_v44, %v2181_v7  ;;  %v2165_v35 = vrot.slane %v2149_v56, 1  ;;  %v2187_v32 = vsel %vm915_vm0, %v2167_v51, %v2169_v9  ;;  %v6515_v59 = vld [vmem:[#allocation10 + $0x4] ss:$8 sps:$4 sm:$0xff]   ;;  %v6519_v7 = vld [vmem:[#allocation10 + $0xe0] ss:$8 sps:$4 sm:$0xff]  }
 0x363   : > { %v2177_v58 = vrot.slane %v2161_v33, 1  ;;  %v2162_v49 = vmax.f32 %v2145_v39, 0.0  ;;  %v2182_v22 = vsel %vm915_vm0, %v2174_v3, %v2176_v14  ;;  %v2200_v60 = vmax.f32 %v2152_v27, %v2188_v54  ;;  %v6497_v27 = vld [vmem:[#allocation10 + $0x64] ss:$8 sps:$4 sm:$0xff]   ;;  %v6542_v54 = vld [vmem:[#allocation12 + $0x74] ss:$8 sps:$4 sm:$0xff]  }
 0x364   : > { %v2206_v15 = vmax.f32 %v2158_v63, %v2182_v22  ;;  %v2192_v18 = vsel %vm915_vm0, %v2164_v52, %v2166_v26  ;;  %v2199_v10 = vmax.f32 %v2151_v28, %v2187_v32  ;;  %v6490_v28 = vld [vmem:[%s8415_s6] sm:$0xff]   ;;  %v6509_v22 = vld [vmem:[#allocation10 + $0x24] ss:$8 sps:$4 sm:$0xff]   ;;  %2947 = vmatprep.subr.bf16.mxu1 %v6542_v54 }
 0x365   : > { %v2179_v48 = vsel %vm915_vm0, %v2175_v8, %v2177_v58  ;;  %v2193_v0 = vsel %vm915_vm0, %v2177_v58, %v8070_v21  ;;  %v2178_v50 = vrot.slane %v2162_v49, 1  ;;  %v2196_v44 = vmax.f32 %v2148_v53, %v2192_v18  ;;  %v6495_v53 = vld [vmem:[#allocation10 + $0x60] ss:$8 sps:$4 sm:$0xff]   ;;  %v6533_v9 = vld [vmem:[#allocation10 + $0xa4] ss:$8 sps:$4 sm:$0xff]  }
 0x366   : > { %v2207_v12 = vmax.f32 %v2159_v5, %v2179_v48  ;;  %v2209_v46 = vmax.f32 %v2161_v33, %v2193_v0  ;;  %v2220_v63 = vpack.c.bf16 %v2206_v15, %v2204_v19  ;;  %v2203_v5 = vmax.f32 %v2155_v43, %v2183_v45  ;;  %v6501_v48 = vld [vmem:[#allocation10 + $0x40] ss:$8 sps:$4 sm:$0xff]   ;;  %v6506_v0 = vld [vmem:[#allocation10 + $0x34] ss:$8 sps:$4 sm:$0xff]   ;;  %v6527_v15 = vld [vmem:[#allocation10 + $0xc4] ss:$8 sps:$4 sm:$0xff]  }
 0x367   : > { %v2194_v37 = vsel %vm915_vm0, %v2178_v50, %v2164_v52  ;;  %v2180_v57 = vsel %vm915_vm0, %v2176_v14, %v2178_v50  ;;  %v2189_v14 = vsel %vm915_vm0, %v2165_v35, %v2167_v51  ;;  %v2218_v33 = vpack.c.bf16 %v2202_v61, %v2200_v60  ;;  %v6504_v50 = vld [vmem:[#allocation10 + $0x30] ss:$8 sps:$4 sm:$0xff]   ;;  %v6531_v45 = vld [vmem:[#allocation10 + $0xa0] ss:$8 sps:$4 sm:$0xff]   ;;  %v6536_v19 = vld [vmem:[#allocation10 + $0x94] ss:$8 sps:$4 sm:$0xff]  }
 0x368   : > { %v2210_v24 = vmax.f32 %v2162_v49, %v2194_v37  ;;  %v2208_v36 = vmax.f32 %v2160_v40, %v2180_v57  ;;  %v2221_v17 = vpack.c.bf16 %v2209_v46, %v2207_v12  ;;  %v2190_v40 = vsel %vm915_vm0, %v2166_v26, %v2168_v4  ;;  %v6494_v49 = vld [vmem:[#allocation10 + $0x74] ss:$8 sps:$4 sm:$0xff]   ;;  %v6513_v12 = vld [vmem:[#allocation10] ss:$8 sps:$4 sm:$0xff]   ;;  %v6516_v37 = vld [vmem:[#allocation10 + $0xf0] ss:$8 sps:$4 sm:$0xff]  }
 0x369   : > { %v2219_v31 = vpack.c.bf16 %v2205_v62, %v2203_v5  ;;  %v2198_v39 = vmax.f32 %v2150_v47, %v2190_v40  ;;  %v2191_v43 = vsel %vm915_vm0, %v8070_v21, %v2165_v35  ;;  %v2197_v3 = vmax.f32 %v2149_v56, %v2189_v14  ;;  %v6492_v21 = vld [vmem:[#allocation10 + $0x70] ss:$8 sps:$4 sm:$0xff]   ;;  %v6518_v46 = vld [vmem:[#allocation10 + $0xf4] ss:$8 sps:$4 sm:$0xff]   ;;  %v6521_v57 = vld [vmem:[#allocation10 + $0xe4] ss:$8 sps:$4 sm:$0xff]  }
 0x36a   : > { %v2222_v11 = vpack.c.bf16 %v2210_v24, %v2208_v36  ;;  %v2217_v8 = vpack.c.bf16 %v2201_v55, %v2199_v10  ;;  %v2195_v52 = vmax.f32 %v2147_v42, %v2191_v43  ;;  %v6491_v42 = vld [vmem:[%s8415_s6 + $0x8] sm:$0xff]   ;;  %v6524_v24 = vld [vmem:[#allocation10 + $0xd4] ss:$8 sps:$4 sm:$0xff]   ;;  %v6522_v36 = vld [vmem:[#allocation10 + $0xd0] ss:$8 sps:$4 sm:$0xff]  }
 0x36b   : > { %v2216_v58 = vpack.c.bf16 %v2198_v39, %v2196_v44  ;;  %v6525_v56 = vld [vmem:[#allocation10 + $0xc0] ss:$8 sps:$4 sm:$0xff]   ;;  %v6530_v4 = vld [vmem:[#allocation10 + $0xb4] ss:$8 sps:$4 sm:$0xff]   ;;  %v6539_v26 = vld [vmem:[#allocation10 + $0x84] ss:$8 sps:$4 sm:$0xff]  }
 0x36c   : > { %2247 = vmatprep.subr.bf16.mxu0 %v2222_v11  ;;  %v2215_v47 = vpack.c.bf16 %v2197_v3, %v2195_v52  ;;  %v6534_v11 = vld [vmem:[#allocation10 + $0x90] ss:$8 sps:$4 sm:$0xff]   ;;  %v6537_v62 = vld [vmem:[#allocation10 + $0x80] ss:$8 sps:$4 sm:$0xff]   ;;  %v6545_v51 = vld [vmem:[#allocation12 + $0x64] ss:$8 sps:$4 sm:$0xff]  }
 0x36d   : > { %2248 = vmatpush1.bf16.msra.mxu0 %v2221_v17  ;;  %v6540_v17 = vld [vmem:[#allocation12 + $0x70] ss:$8 sps:$4 sm:$0xff]   ;;  %v6566_v61 = vld [vmem:[#allocation12 + $0x174] ss:$8 sps:$4 sm:$0xff]   ;;  %v6551_v40 = vld [vmem:[#allocation12 + $0x44] ss:$8 sps:$4 sm:$0xff]  }
 0x36e   : > { %2249 = vmatprep.subr.bf16.mxu0 %v2220_v63  ;;  %2948 = vmatpush1.bf16.msra.mxu1 %v6540_v17  ;;  %v6548_v63 = vld [vmem:[#allocation12 + $0x54] ss:$8 sps:$4 sm:$0xff]   ;;  %v6546_v5 = vld [vmem:[#allocation12 + $0x50] ss:$8 sps:$4 sm:$0xff]   ;;  %v6549_v35 = vld [vmem:[#allocation12 + $0x40] ss:$8 sps:$4 sm:$0xff]  }
 0x36f   : > { %2949 = vmatprep.subr.bf16.mxu1 %v6545_v51  ;;  %v6554_v32 = vld [vmem:[#allocation12 + $0x34] ss:$8 sps:$4 sm:$0xff]   ;;  %v6552_v60 = vld [vmem:[#allocation12 + $0x30] ss:$8 sps:$4 sm:$0xff]   ;;  %v6557_v55 = vld [vmem:[#allocation12 + $0x24] ss:$8 sps:$4 sm:$0xff]  }
 0x370   : > { %v6560_v18 = vld [vmem:[#allocation12 + $0x14] ss:$8 sps:$4 sm:$0xff]   ;;  %v6558_v14 = vld [vmem:[#allocation12 + $0x10] ss:$8 sps:$4 sm:$0xff]   ;;  %v6561_v39 = vld [vmem:[#allocation12] ss:$8 sps:$4 sm:$0xff]  }
 0x371   : > { %2250 = vmatpush1.bf16.msra.mxu0 %v2219_v31  ;;  %v6555_v31 = vld [vmem:[#allocation12 + $0x20] ss:$8 sps:$4 sm:$0xff]   ;;  %v6569_v10 = vld [vmem:[#allocation12 + $0xf4] ss:$8 sps:$4 sm:$0xff]   ;;  %v6567_v43 = vld [vmem:[#allocation12 + $0xf0] ss:$8 sps:$4 sm:$0xff]  }
 0x372   : > { %2251 = vmatprep.subr.bf16.mxu0 %v2218_v33  ;;  %2950 = vmatpush1.bf16.msra.mxu1 %v6543_v41  ;;  %v6563_v33 = vld [vmem:[#allocation12 + $0x4] ss:$8 sps:$4 sm:$0xff]   ;;  %v6573_v3 = vld [vmem:[#allocation12 + $0xe0] ss:$8 sps:$4 sm:$0xff]  }
 0x373   : > { %2951 = vmatprep.subr.bf16.mxu1 %v6548_v63  ;;  %v6575_v44 = vld [vmem:[#allocation12 + $0xe4] ss:$8 sps:$4 sm:$0xff]   ;;  %v6609_v17 = vld [vmem:[#allocation12 + $0x80] ss:$8 sps:$4 sm:$0xff]  }
 0x374   : > { %v6614_v54 = vld [vmem:[#allocation15 + $0x174] ss:$8 sps:$4 sm:$0xff]  }
 0x375   : > { %2252 = vmatpush1.bf16.msra.mxu0 %v2217_v8  ;;  %v6581_v8 = vld [vmem:[#allocation12 + $0xd4] ss:$8 sps:$4 sm:$0xff]  }
 0x376   : > { %2253 = vmatprep.subr.bf16.mxu0 %v2216_v58  ;;  %2952 = vmatpush1.bf16.msra.mxu1 %v6546_v5  ;;  %v6579_v58 = vld [vmem:[#allocation12 + $0xd0] ss:$8 sps:$4 sm:$0xff]   ;;  %v747_v5 = vadd.s32 8, %v7604_v1 }
 0x377   : > { %2953 = vmatprep.subr.bf16.mxu1 %v6551_v40  ;;  %v6623_v51 = vld [vmem:[#allocation15 + $0x74] ss:$8 sps:$4 sm:$0xff]  }
 0x379   : > { %2254 = vmatpush1.bf16.msra.mxu0 %v2215_v47 }
 0x37a   : > { %2488 = vmatprep.subr.bf16.mxu0 %v6494_v49  ;;  %2954 = vmatpush1.bf16.msra.mxu1 %v6549_v35 }
 0x37b   : > { %2955 = vmatprep.subr.bf16.mxu1 %v6554_v32 }
 0x37c   : > { %5626 = vmatmul.mubr.msk.bf16.vlgmr.msra.gmra.mxu0 %vm1021_vm6, %v6490_v28 }
 0x37d   : > { %2281 = vmatprep.mubr.bf16.mxu0 %v8485_v25  ;;  %2489 = vmatpush1.bf16.msra.mxu0 %v6492_v21 }
 0x37e   : > { %2490 = vmatprep.subr.bf16.mxu0 %v6497_v27  ;;  %2956 = vmatpush1.bf16.msra.mxu1 %v6552_v60  ;;  %v6564_v27 = vld [vmem:[#allocation12 + $0x170] ss:$8 sps:$4 sm:$0xff]  }
 0x37f   : > { %2957 = vmatprep.subr.bf16.mxu1 %v6557_v55  ;;  %v2556_v55 = vand.u32 15, %v747_v5  ;;  %v6636_v5 = vld [vmem:[#allocation15 + $0x120] ss:$8 sps:$4 sm:$0xff]  }
 0x381   : > { %2491 = vmatpush1.bf16.msra.mxu0 %v6495_v53  ;;  %vm5971_vm3 = vcmp.ne.s32.totalorder %v2556_v55, 15  ;;  %v6659_v55 = vld [vmem:[#allocation15 + $0x14] ss:$8 sps:$4 sm:$0xff]  }
 0x382   : > { %2492 = vmatprep.subr.bf16.mxu0 %v6500_v38  ;;  %2958 = vmatpush1.bf16.msra.mxu1 %v6555_v31 }
 0x383   : > { %2959 = vmatprep.subr.bf16.mxu1 %v6560_v18 }
 0x384   : > { %5627 = vmatmul.mubr.msk.bf16.gmra.mxu0 %vm1021_vm6, %v6491_v42  ;;  %v6572_v42 = vld [vmem:[#allocation12 + $0x164] ss:$8 sps:$4 sm:$0xff]   ;;  %vm8148_vm6 = vmpackc.low %vm5971_vm3, %vm7264_vm10 }
 0x385   : > { %2493 = vmatpush1.bf16.msra.mxu0 %v6498_v23 }
 0x386   : > { %2494 = vmatprep.subr.bf16.mxu0 %v6503_v34  ;;  %2960 = vmatpush1.bf16.msra.mxu1 %v6558_v14  ;;  %v6570_v34 = vld [vmem:[#allocation12 + $0x160] ss:$8 sps:$4 sm:$0xff]  }
 0x387   : > { %2961 = vmatprep.subr.bf16.mxu1 %v6563_v33 }
 0x389   : > { %2495 = vmatpush1.bf16.msra.mxu0 %v6501_v48 }
 0x38a   : > { %2496 = vmatprep.subr.bf16.mxu0 %v6506_v0  ;;  %2962 = vmatpush1.bf16.msra.mxu1 %v6561_v39  ;;  %v6578_v0 = vld [vmem:[#allocation12 + $0x154] ss:$8 sps:$4 sm:$0xff]  }
 0x38b   : > { %2963 = vmatprep.subr.bf16.mxu1 %v6569_v10  ;;  %v2549_v10 = vand.u32 15, %v7604_v1 }
 0x38d   : > { %2497 = vmatpush1.bf16.msra.mxu0 %v6504_v50  ;;  %vm5969_vm7 = vcmp.ne.s32.totalorder %v2549_v10, 0  ;;  %v6663_v10 = vld [vmem:[#allocation15] ss:$8 sps:$4 sm:$0xff]  }
 0x38e   : > { %2498 = vmatprep.subr.bf16.mxu0 %v6509_v22  ;;  %2964 = vmatpush2.bf16.msra.mxu1 %v6567_v43  ;;  %vm8161_vm8 = vmpackc.low %vm7264_vm10, %vm5969_vm7 }
 0x38f   : > { %2965 = vmatprep.subr.bf16.mxu1 %v6575_v44 }
 0x391   : > { %2499 = vmatpush1.bf16.msra.mxu0 %v6507_v20  ;;  %v6576_v20 = vld [vmem:[#allocation12 + $0x150] ss:$8 sps:$4 sm:$0xff]  }
 0x392   : > { %2500 = vmatprep.subr.bf16.mxu0 %v6512_v30  ;;  %2966 = vmatpush2.bf16.msra.mxu1 %v6573_v3 }
 0x393   : > { %2967 = vmatprep.subr.bf16.mxu1 %v6581_v8 }
 0x395   : > { %2501 = vmatpush1.bf16.msra.mxu0 %v6510_v29  ;;  %v6584_v29 = vld [vmem:[#allocation12 + $0x144] ss:$8 sps:$4 sm:$0xff]  }
 0x396   : > { %2502 = vmatprep.subr.bf16.mxu0 %v6515_v59  ;;  %2968 = vmatpush2.bf16.msra.mxu1 %v6579_v58  ;;  %v6582_v59 = vld [vmem:[#allocation12 + $0x140] ss:$8 sps:$4 sm:$0xff]  }
 0x399   : > { %2503 = vmatpush1.bf16.msra.mxu0 %v6513_v12  ;;  %v6587_v12 = vld [vmem:[#allocation12 + $0xc4] ss:$8 sps:$4 sm:$0xff]  }
 0x39a   : > { %2504 = vmatprep.subr.bf16.mxu0 %v6518_v46  ;;  %v6590_v46 = vld [vmem:[#allocation12 + $0x134] ss:$8 sps:$4 sm:$0xff]   ;;  %2969 = vmatprep.subr.bf16.mxu1 %v6587_v12 }
 0x39d   : > { %2505 = vmatpush2.bf16.msra.mxu0 %v6516_v37  ;;  %v6585_v37 = vld [vmem:[#allocation12 + $0xc0] ss:$8 sps:$4 sm:$0xff]  }
 0x39e   : > { %2506 = vmatprep.subr.bf16.mxu0 %v6521_v57  ;;  %v6588_v57 = vld [vmem:[#allocation12 + $0x130] ss:$8 sps:$4 sm:$0xff]   ;;  %2970 = vmatpush2.bf16.msra.mxu1 %v6585_v37 }
 0x39f   : > { %v6620_v37 = vld [vmem:[#allocation15 + $0x154] ss:$8 sps:$4 sm:$0xff]  }
 0x3a1   : > { %2507 = vmatpush2.bf16.msra.mxu0 %v6519_v7  ;;  %v6593_v7 = vld [vmem:[#allocation12 + $0xb4] ss:$8 sps:$4 sm:$0xff]  }
 0x3a2   : > { %2508 = vmatprep.subr.bf16.mxu0 %v6524_v24  ;;  %v6596_v24 = vld [vmem:[#allocation12 + $0x124] ss:$8 sps:$4 sm:$0xff]   ;;  %2971 = vmatprep.subr.bf16.mxu1 %v6593_v7 }
 0x3a5   : > { %2509 = vmatpush2.bf16.msra.mxu0 %v6522_v36  ;;  %v6591_v36 = vld [vmem:[#allocation12 + $0xb0] ss:$8 sps:$4 sm:$0xff]  }
 0x3a6   : > { %2510 = vmatprep.subr.bf16.mxu0 %v6527_v15  ;;  %v6594_v15 = vld [vmem:[#allocation12 + $0x120] ss:$8 sps:$4 sm:$0xff]   ;;  %2972 = vmatpush2.bf16.msra.mxu1 %v6591_v36 }
 0x3a9   : > { %2511 = vmatpush2.bf16.msra.mxu0 %v6525_v56  ;;  %v6599_v56 = vld [vmem:[#allocation12 + $0xa4] ss:$8 sps:$4 sm:$0xff]  }
 0x3aa   : > { %2512 = vmatprep.subr.bf16.mxu0 %v6530_v4  ;;  %v6602_v4 = vld [vmem:[#allocation12 + $0x114] ss:$8 sps:$4 sm:$0xff]   ;;  %2973 = vmatprep.subr.bf16.mxu1 %v6599_v56 }
 0x3ab   : > { %v6635_v56 = vld [vmem:[#allocation15 + $0x54] ss:$8 sps:$4 sm:$0xff]  }
 0x3ad   : > { %2513 = vmatpush2.bf16.msra.mxu0 %v6528_v6  ;;  %v6597_v6 = vld [vmem:[#allocation12 + $0xa0] ss:$8 sps:$4 sm:$0xff]  }
 0x3ae   : > { %2514 = vmatprep.subr.bf16.mxu0 %v6533_v9  ;;  %v6600_v9 = vld [vmem:[#allocation12 + $0x110] ss:$8 sps:$4 sm:$0xff]   ;;  %2974 = vmatpush2.bf16.msra.mxu1 %v6597_v6 }
 0x3af   : > { %v6626_v6 = vld [vmem:[#allocation15 + $0x144] ss:$8 sps:$4 sm:$0xff]  }
 0x3b1   : > { %2515 = vmatpush2.bf16.msra.mxu0 %v6531_v45  ;;  %v6605_v45 = vld [vmem:[#allocation12 + $0x94] ss:$8 sps:$4 sm:$0xff]  }
 0x3b2   : > { %2516 = vmatprep.subr.bf16.mxu0 %v6536_v19  ;;  %v6603_v19 = vld [vmem:[#allocation12 + $0x90] ss:$8 sps:$4 sm:$0xff]   ;;  %2975 = vmatprep.subr.bf16.mxu1 %v6605_v45 }
 0x3b3   : > { %2976 = vmatpush2.bf16.msra.mxu1 %v6603_v19  ;;  %v6731_v45 = vld [vmem:[#allocation15 + $0x204] ss:$8 sps:$4 sm:$0xff]  }
 0x3b5   : > { %2517 = vmatpush2.bf16.msra.mxu0 %v6534_v11  ;;  %v6608_v11 = vld [vmem:[#allocation12 + $0x104] ss:$8 sps:$4 sm:$0xff]  }
 0x3b6   : > { %2518 = vmatprep.subr.bf16.mxu0 %v6539_v26  ;;  %v6606_v26 = vld [vmem:[#allocation12 + $0x100] ss:$8 sps:$4 sm:$0xff]  }
 0x3b9   : > { %2519 = vmatpush2.bf16.msra.mxu0 %v6537_v62  ;;  %v6611_v62 = vld [vmem:[#allocation12 + $0x84] ss:$8 sps:$4 sm:$0xff]  }
 0x3ba   : > { %3000 = vmatprep.subr.bf16.mxu0 %v6566_v61  ;;  %2977 = vmatprep.subr.bf16.mxu1 %v6611_v62  ;;  %v6641_v62 = vld [vmem:[#allocation15 + $0x44] ss:$8 sps:$4 sm:$0xff]  }
 0x3bb   : > { %2978 = vmatpush2.bf16.msra.mxu1 %v6609_v17  ;;  %v6632_v17 = vld [vmem:[#allocation15 + $0x134] ss:$8 sps:$4 sm:$0xff]  }
 0x3bc   : > { %3709 = vmatprep.subr.bf16.mxu1 %v6623_v51  ;;  %v6630_v51 = vld [vmem:[#allocation15 + $0x130] ss:$8 sps:$4 sm:$0xff]  }
 0x43c   : > { %v2273_v52 = vpop.f32.mrf.mxu0 }
 0x43e   : > { %v2275_v49 = vpop.f32.mrf.mxu0 }
 0x440   : > { %v2277_v47 = vpop.f32.mrf.mxu0 }
 0x441   : > { %v2292_v53 = vpack.c.bf16 %v2277_v47, %v2273_v52 }
 0x442   : > { %v2279_v28 = vpop.f32.mrf.mxu0 }
 0x443   : > { %v2293_v21 = vpack.c.bf16 %v2279_v28, %v2275_v49 }
 0x444   : > { %v2283_v38 = vpop.f32.mrf.mxu0 }
 0x445   : > { %2520 = vmatprep.mubr.bf16.mxu0 %v2293_v21  ;;  %v2570_v21 = vand.u32 15, %v7607_v2  ;;  %v6621_v2 = vld [vmem:[#allocation15 + $0x70] ss:$8 sps:$4 sm:$0xff]  }
 0x446   : > { %v2285_v23 = vpop.f32.mrf.mxu0  ;;  %2521 = vmatmul.mubr.bf16.vlgmr.msra.gmra.mxu0 %v2292_v53  ;;  %v6612_v53 = vld [vmem:[#allocation15 + $0x170] ss:$8 sps:$4 sm:$0xff]  }
 0x447   : > { %3001 = vmatpush1.bf16.msra.mxu0 %v6564_v27  ;;  %v748_v27 = vadd.s32 16, %v7604_v1  ;;  %vm5972_vm9 = vcmp.ne.s32.totalorder %v2570_v21, 15  ;;  %v6674_v21 = vld [vmem:[#allocation15 + $0x1c4] ss:$8 sps:$4 sm:$0xff]  }
 0x448   : > { %v2287_v48 = vpop.f32.mrf.mxu0  ;;  %3002 = vmatprep.subr.bf16.mxu0 %v6572_v42  ;;  %vm8173_vm11 = vmpackc.low %vm5972_vm9, %vm7264_vm10  ;;  %v6762_v1 = vld [vmem:[#allocation18 + $0x64] ss:$8 sps:$4 sm:$0xff]  }
 0x449   : > { %v2294_v30 = vpack.c.bf16 %v2287_v48, %v2283_v38 }
 0x44a   : > { %v2289_v50 = vpop.f32.mrf.mxu0 }
 0x44b   : > { %v2295_v22 = vpack.c.bf16 %v2289_v50, %v2285_v23  ;;  %3003 = vmatpush1.bf16.msra.mxu0 %v6570_v34  ;;  %v6617_v34 = vld [vmem:[#allocation15 + $0x164] ss:$8 sps:$4 sm:$0xff]  }
 0x44c   : > { %3004 = vmatprep.subr.bf16.mxu0 %v6578_v0 }
 0x44d   : > { %2530 = vmatprep.mubr.bf16.mxu0 %v2295_v22 }
 0x44e   : > { %2531 = vmatmul.mubr.bf16.gmra.mxu0 %v2294_v30  ;;  %v6615_v30 = vld [vmem:[#allocation15 + $0x160] ss:$8 sps:$4 sm:$0xff]  }
 0x44f   : > { %3005 = vmatpush1.bf16.msra.mxu0 %v6576_v20  ;;  %3032 = vmatprep.mubr.bf16.mxu0 %v8485_v25  ;;  %v2563_v20 = vand.u32 15, %v748_v27  ;;  %v6675_v27 = vld [vmem:[#allocation15 + $0xe0] ss:$8 sps:$4 sm:$0xff]  }
 0x450   : > { %3006 = vmatprep.subr.bf16.mxu0 %v6584_v29  ;;  %v6629_v29 = vld [vmem:[#allocation15 + $0x64] ss:$8 sps:$4 sm:$0xff]  }
 0x451   : > { %vm5970_vm12 = vcmp.ne.s32.totalorder %v2563_v20, 0  ;;  %v6692_v20 = vld [vmem:[#allocation15 + $0x194] ss:$8 sps:$4 sm:$0xff]  }
 0x452   : > { %vm8184_vm13 = vmpackc.low %vm7264_vm10, %vm5970_vm12  ;;  %vm5263_vm10 = vcmask 48128  }
 0x453   : > { %3007 = vmatpush1.bf16.msra.mxu0 %v6582_v59 }
 0x454   : > { %3008 = vmatprep.subr.bf16.mxu0 %v6590_v46 }
 0x457   : > { %3009 = vmatpush1.bf16.msra.mxu0 %v6588_v57 }
 0x458   : > { %3010 = vmatprep.subr.bf16.mxu0 %v6596_v24  ;;  %v6627_v24 = vld [vmem:[#allocation15 + $0x60] ss:$8 sps:$4 sm:$0xff]  }
 0x45b   : > { %3011 = vmatpush1.bf16.msra.mxu0 %v6594_v15  ;;  %v6618_v15 = vld [vmem:[#allocation15 + $0x150] ss:$8 sps:$4 sm:$0xff]  }
 0x45c   : > { %3012 = vmatprep.subr.bf16.mxu0 %v6602_v4 }
 0x45f   : > { %3013 = vmatpush1.bf16.msra.mxu0 %v6600_v9 }
 0x460   : > { %3014 = vmatprep.subr.bf16.mxu0 %v6608_v11  ;;  %v6633_v11 = vld [vmem:[#allocation15 + $0x50] ss:$8 sps:$4 sm:$0xff]  }
 0x463   : > { %3015 = vmatpush1.bf16.msra.mxu0 %v6606_v26  ;;  %v6624_v26 = vld [vmem:[#allocation15 + $0x140] ss:$8 sps:$4 sm:$0xff]  }
 0x464   : > { %3762 = vmatprep.subr.bf16.mxu0 %v6614_v54  ;;  %v6639_v54 = vld [vmem:[#allocation15 + $0x40] ss:$8 sps:$4 sm:$0xff]  }
 0x506   : > { %v2522_v41 = vpop.f32.mrf.mxu0 }
 0x508   : > { %v2524_v63 = vpop.f32.mrf.mxu0 }
 0x509   : > { %v2541_v35 = vmax.f32 %v2522_v41, %v2524_v63  ;;  %v6647_v41 = vld [vmem:[#allocation15 + $0x34] ss:$8 sps:$4 sm:$0xff]   ;;  %v6638_v63 = vld [vmem:[#allocation15 + $0x124] ss:$8 sps:$4 sm:$0xff]  }
 0x50a   : > { %v2526_v61 = vpop.f32.mrf.mxu0 }
 0x50b   : > { %v2621_v43 = vrot.slane %v2541_v35, 1  ;;  %v2597_v38 = vrot.slane %v2541_v35, 7 }
 0x50c   : > { %v2528_v40 = vpop.f32.mrf.mxu0 }
 0x50d   : > { %v8137_v32 = vmax.f32 %v2526_v61, %v2528_v40  ;;  %v6645_v61 = vld [vmem:[#allocation15 + $0x30] ss:$8 sps:$4 sm:$0xff]   ;;  %v6653_v40 = vld [vmem:[#allocation15 + $0x24] ss:$8 sps:$4 sm:$0xff]  }
 0x50e   : > { %v2532_v60 = vpop.f32.mrf.mxu0 }
 0x50f   : > { %v2642_v31 = vpack.c.bf16 %v8137_v32, %v2541_v35  ;;  %v2622_v14 = vrot.slane %v8137_v32, 1  ;;  %v2598_v8 = vrot.slane %v8137_v32, 7  ;;  %v6644_v35 = vld [vmem:[#allocation15 + $0x114] ss:$8 sps:$4 sm:$0xff]   ;;  %v6651_v32 = vld [vmem:[#allocation15 + $0x20] ss:$8 sps:$4 sm:$0xff]  }
 0x510   : > { %v2534_v18 = vpop.f32.mrf.mxu0 }
 0x511   : > { %v2543_v33 = vmax.f32 %v2532_v60, %v2534_v18  ;;  %2979 = vmatprep.mubr.bf16.mxu1 %v2642_v31  ;;  %v2627_v58 = vsel %vm915_vm0, %v2621_v43, %v2622_v14  ;;  %v2603_v48 = vsel %vm866_vm2, %v2597_v38, %v2598_v8  ;;  %v6642_v60 = vld [vmem:[#allocation15 + $0x110] ss:$8 sps:$4 sm:$0xff]   ;;  %v6650_v31 = vld [vmem:[#allocation15 + $0x104] ss:$8 sps:$4 sm:$0xff]  }
 0x512   : > { %v2536_v39 = vpop.f32.mrf.mxu0  ;;  %v6657_v18 = vld [vmem:[#allocation15 + $0x10] ss:$8 sps:$4 sm:$0xff]  }
 0x513   : > { %v2623_v44 = vrot.slane %v2543_v33, 1  ;;  %v2599_v57 = vrot.slane %v2543_v33, 7 }
 0x514   : > { %v2538_v3 = vpop.f32.mrf.mxu0 }
 0x515   : > { %v2626_v52 = vsel %vm915_vm0, %v2622_v14, %v2623_v44  ;;  %v2544_v49 = vmax.f32 %v2536_v39, %v2538_v3  ;;  %v2602_v9 = vsel %vm866_vm2, %v2598_v8, %v2599_v57  ;;  %v6648_v14 = vld [vmem:[#allocation15 + $0x100] ss:$8 sps:$4 sm:$0xff]   ;;  %v6656_v39 = vld [vmem:[#allocation15 + $0x1f4] ss:$8 sps:$4 sm:$0xff]   ;;  %v6662_v3 = vld [vmem:[#allocation15 + $0x1e4] ss:$8 sps:$4 sm:$0xff]  }
 0x516   : > { %v5718_v28 = vpack.c.bf16 %v2626_v52, %v2627_v58  ;;  %v6669_v8 = vld [vmem:[#allocation15 + $0xf0] ss:$8 sps:$4 sm:$0xff]   ;;  %v6660_v58 = vld [vmem:[#allocation15 + $0x1e0] ss:$8 sps:$4 sm:$0xff]   ;;  %v6668_v52 = vld [vmem:[#allocation15 + $0x1d4] ss:$8 sps:$4 sm:$0xff]  }
 0x517   : > { %v2600_v42 = vrot.slane %v2544_v49, 7  ;;  %v2624_v23 = vrot.slane %v2544_v49, 1  ;;  %v2645_v59 = vpack.c.bf16 %v2544_v49, %v2543_v33  ;;  %v6665_v33 = vld [vmem:[#allocation15 + $0x4] ss:$8 sps:$4 sm:$0xff]   ;;  %v6666_v49 = vld [vmem:[#allocation15 + $0x1d0] ss:$8 sps:$4 sm:$0xff]  }
 0x518   : > { %5719 = vmatmul.mubr.msk.bf16.vlgmr.msra.gmra.mxu0 %vm8148_vm6, %v5718_v28  ;;  %v6672_v28 = vld [vmem:[#allocation15 + $0x1c0] ss:$8 sps:$4 sm:$0xff]  }
 0x519   : > { %v2604_v0 = vsel %vm866_vm2, %v2600_v42, %v2597_v38  ;;  %3042 = vmatprep.mubr.bf16.mxu0 %v8485_v25  ;;  %3763 = vmatpush1.bf16.msra.mxu0 %v6612_v53  ;;  %v2625_v12 = vsel %vm915_vm0, %v2623_v44, %v2624_v23  ;;  %v2628_v46 = vsel %vm915_vm0, %v2624_v23, %v2621_v43  ;;  %v6654_v43 = vld [vmem:[#allocation15 + $0x1f0] ss:$8 sps:$4 sm:$0xff]   ;;  %v6671_v44 = vld [vmem:[#allocation15 + $0xf4] ss:$8 sps:$4 sm:$0xff]   ;;  %v6677_v53 = vld [vmem:[#allocation15 + $0xe4] ss:$8 sps:$4 sm:$0xff]  }
 0x51a   : > { %v5710_v22 = vpack.c.bf16 %v2603_v48, %v2604_v0  ;;  %3764 = vmatprep.subr.bf16.mxu0 %v6617_v34  ;;  %v5722_v36 = vpack.c.bf16 %v2628_v46, %v2625_v12  ;;  %v2601_v4 = vsel %vm866_vm2, %v2599_v57, %v2600_v42  ;;  %v6680_v38 = vld [vmem:[#allocation15 + $0x1b4] ss:$8 sps:$4 sm:$0xff]   ;;  %v6678_v42 = vld [vmem:[#allocation15 + $0x1b0] ss:$8 sps:$4 sm:$0xff]   ;;  %v6686_v48 = vld [vmem:[#allocation15 + $0x1a4] ss:$8 sps:$4 sm:$0xff]  }
 0x51b   : > { %v5714_v19 = vpack.c.bf16 %v2601_v4, %v2602_v9  ;;  %v6683_v23 = vld [vmem:[#allocation15 + $0xd4] ss:$8 sps:$4 sm:$0xff]   ;;  %v6681_v34 = vld [vmem:[#allocation15 + $0xd0] ss:$8 sps:$4 sm:$0xff]   ;;  %v6684_v0 = vld [vmem:[#allocation15 + $0x1a0] ss:$8 sps:$4 sm:$0xff]  }
 0x51c   : > { %5711 = vmatmul.mubr.msk.bf16.vlgmr.msra.gmra.mxu1 %vm8161_vm8, %v5710_v22  ;;  %v6687_v22 = vld [vmem:[#allocation15 + $0xc0] ss:$8 sps:$4 sm:$0xff]   ;;  %v6698_v12 = vld [vmem:[#allocation15 + $0x184] ss:$8 sps:$4 sm:$0xff]   ;;  %v6710_v4 = vld [vmem:[#allocation15 + $0x274] ss:$8 sps:$4 sm:$0xff]  }
 0x51d   : > { %2989 = vmatprep.mubr.bf16.mxu1 %v2645_v59  ;;  %3710 = vmatpush1.bf16.msra.mxu1 %v6621_v2  ;;  %v6689_v2 = vld [vmem:[#allocation15 + $0xc4] ss:$8 sps:$4 sm:$0xff]   ;;  %v6693_v59 = vld [vmem:[#allocation15 + $0xb0] ss:$8 sps:$4 sm:$0xff]   ;;  %v6696_v46 = vld [vmem:[#allocation15 + $0x180] ss:$8 sps:$4 sm:$0xff]  }
 0x51e   : > { %3765 = vmatpush1.bf16.msra.mxu0 %v6615_v30  ;;  %3711 = vmatprep.subr.bf16.mxu1 %v6629_v29  ;;  %v6690_v30 = vld [vmem:[#allocation15 + $0x190] ss:$8 sps:$4 sm:$0xff]   ;;  %v6695_v29 = vld [vmem:[#allocation15 + $0xb4] ss:$8 sps:$4 sm:$0xff]   ;;  %v6699_v57 = vld [vmem:[#allocation15 + $0xa0] ss:$8 sps:$4 sm:$0xff]  }
 0x51f   : > { %3766 = vmatprep.subr.bf16.mxu0 %v6620_v37  ;;  %v6701_v37 = vld [vmem:[#allocation15 + $0xa4] ss:$8 sps:$4 sm:$0xff]  }
 0x520   : > { %5723 = vmatmul.mubr.msk.bf16.gmra.mxu0 %vm8173_vm11, %v5722_v36  ;;  %v6702_v36 = vld [vmem:[#allocation15 + $0x90] ss:$8 sps:$4 sm:$0xff]  }
 0x521   : > { %3712 = vmatpush1.bf16.msra.mxu1 %v6627_v24  ;;  %v6704_v24 = vld [vmem:[#allocation15 + $0x94] ss:$8 sps:$4 sm:$0xff]  }
 0x522   : > { %3767 = vmatpush1.bf16.msra.mxu0 %v6618_v15  ;;  %3713 = vmatprep.subr.bf16.mxu1 %v6635_v56  ;;  %v6705_v15 = vld [vmem:[#allocation15 + $0x80] ss:$8 sps:$4 sm:$0xff]   ;;  %v6707_v56 = vld [vmem:[#allocation15 + $0x84] ss:$8 sps:$4 sm:$0xff]  }
 0x523   : > { %3768 = vmatprep.subr.bf16.mxu0 %v6626_v6  ;;  %v2695_v6 = vld [vmem:[#allocation13] sm:$0x3] }
 0x524   : > { %5715 = vmatmul.mubr.msk.bf16.gmra.mxu1 %vm8184_vm13, %v5714_v19 }
 0x525   : > { %3714 = vmatpush1.bf16.msra.mxu1 %v6633_v11  ;;  %v2700_v11 = vrot.slane %v2695_v6, %v7771_v13 }
 0x526   : > { %3769 = vmatpush1.bf16.msra.mxu0 %v6624_v26  ;;  %3715 = vmatprep.subr.bf16.mxu1 %v6641_v62 }
 0x527   : > { %3770 = vmatprep.subr.bf16.mxu0 %v6632_v17  ;;  %v2704_v17 = vrot.slane %v2695_v6, %v7777_v16 }
 0x529   : > { %3716 = vmatpush1.bf16.msra.mxu1 %v6639_v54 }
 0x52a   : > { %3771 = vmatpush1.bf16.msra.mxu0 %v6630_v51  ;;  %3717 = vmatprep.subr.bf16.mxu1 %v6647_v41 }
 0x52b   : > { %3772 = vmatprep.subr.bf16.mxu0 %v6638_v63 }
 0x52d   : > { %3718 = vmatpush1.bf16.msra.mxu1 %v6645_v61 }
 0x52e   : > { %3773 = vmatpush1.bf16.msra.mxu0 %v6636_v5  ;;  %3719 = vmatprep.subr.bf16.mxu1 %v6653_v40 }
 0x52f   : > { %3774 = vmatprep.subr.bf16.mxu0 %v6644_v35 }
 0x531   : > { %3720 = vmatpush1.bf16.msra.mxu1 %v6651_v32 }
 0x532   : > { %3775 = vmatpush1.bf16.msra.mxu0 %v6642_v60  ;;  %3721 = vmatprep.subr.bf16.mxu1 %v6659_v55 }
 0x533   : > { %3776 = vmatprep.subr.bf16.mxu0 %v6650_v31 }
 0x535   : > { %3722 = vmatpush1.bf16.msra.mxu1 %v6657_v18 }
 0x536   : > { %3777 = vmatpush1.bf16.msra.mxu0 %v6648_v14  ;;  %3723 = vmatprep.subr.bf16.mxu1 %v6665_v33 }
 0x537   : > { %3778 = vmatprep.subr.bf16.mxu0 %v6656_v39 }
 0x539   : > { %3724 = vmatpush1.bf16.msra.mxu1 %v6663_v10 }
 0x53a   : > { %3779 = vmatpush2.bf16.msra.mxu0 %v6654_v43  ;;  %3725 = vmatprep.subr.bf16.mxu1 %v6671_v44 }
 0x53b   : > { %3780 = vmatprep.subr.bf16.mxu0 %v6662_v3 }
 0x53d   : > { %3726 = vmatpush2.bf16.msra.mxu1 %v6669_v8 }
 0x53e   : > { %3781 = vmatpush2.bf16.msra.mxu0 %v6660_v58  ;;  %3727 = vmatprep.subr.bf16.mxu1 %v6677_v53 }
 0x53f   : > { %3782 = vmatprep.subr.bf16.mxu0 %v6668_v52 }
 0x541   : > { %3728 = vmatpush2.bf16.msra.mxu1 %v6675_v27 }
 0x542   : > { %3783 = vmatpush2.bf16.msra.mxu0 %v6666_v49  ;;  %3729 = vmatprep.subr.bf16.mxu1 %v6683_v23 }
 0x543   : > { %3784 = vmatprep.subr.bf16.mxu0 %v6674_v21 }
 0x545   : > { %3730 = vmatpush2.bf16.msra.mxu1 %v6681_v34 }
 0x546   : > { %3785 = vmatpush2.bf16.msra.mxu0 %v6672_v28  ;;  %3731 = vmatprep.subr.bf16.mxu1 %v6689_v2 }
 0x547   : > { %3786 = vmatprep.subr.bf16.mxu0 %v6680_v38 }
 0x549   : > { %3732 = vmatpush2.bf16.msra.mxu1 %v6687_v22 }
 0x54a   : > { %3787 = vmatpush2.bf16.msra.mxu0 %v6678_v42  ;;  %3733 = vmatprep.subr.bf16.mxu1 %v6695_v29 }
 0x54b   : > { %3788 = vmatprep.subr.bf16.mxu0 %v6686_v48 }
 0x54d   : > { %3734 = vmatpush2.bf16.msra.mxu1 %v6693_v59 }
 0x54e   : > { %3789 = vmatpush2.bf16.msra.mxu0 %v6684_v0  ;;  %3735 = vmatprep.subr.bf16.mxu1 %v6701_v37 }
 0x54f   : > { %3790 = vmatprep.subr.bf16.mxu0 %v6692_v20 }
 0x551   : > { %3736 = vmatpush2.bf16.msra.mxu1 %v6699_v57 }
 0x552   : > { %3791 = vmatpush2.bf16.msra.mxu0 %v6690_v30  ;;  %3737 = vmatprep.subr.bf16.mxu1 %v6704_v24 }
 0x553   : > { %3792 = vmatprep.subr.bf16.mxu0 %v6698_v12 }
 0x555   : > { %3738 = vmatpush2.bf16.msra.mxu1 %v6702_v36 }
 0x556   : > { %3793 = vmatpush2.bf16.msra.mxu0 %v6696_v46  ;;  %3739 = vmatprep.subr.bf16.mxu1 %v6707_v56 }
 0x559   : > { %3740 = vmatpush2.bf16.msra.mxu1 %v6705_v15 }
 0x55a   : > { %3815 = vmatprep.subr.bf16.mxu1 %v6710_v4 }
 0x5d8   : > { %v3034_v9 = vpop.f32.mrf.mxu0 }
 0x5da   : > { %v3036_v19 = vpop.f32.mrf.mxu0 }
 0x5dc   : > { %v2981_v26 = vpop.f32.mrf.mxu1  ;;  %v3038_v62 = vpop.f32.mrf.mxu0 }
 0x5dd   : > { %v2982_v54 = vadd.f32 %v2981_v26, %v2700_v11 }
 0x5de   : > { %v2983_v51 = vpop.f32.mrf.mxu1  ;;  %v3040_v41 = vpop.f32.mrf.mxu0 }
 0x5df   : > { %v3035_v63 = vadd.f32 %v3034_v9, %v2982_v54  ;;  %v2984_v61 = vadd.f32 %v2983_v51, %v2704_v17 }
 0x5e0   : > { %v2985_v5 = vpop.f32.mrf.mxu1  ;;  %v3044_v40 = vpop.f32.mrf.mxu0 }
 0x5e1   : > { %v2986_v35 = vadd.f32 %v2985_v5, %v2700_v11  ;;  %v3053_v60 = vmax.f32 %v3035_v63, 0.0  ;;  %v3037_v31 = vadd.f32 %v3036_v19, %v2984_v61  ;;  %v6708_v5 = vld [vmem:[#allocation15 + $0x270] ss:$8 sps:$4 sm:$0xff]  }
 0x5e2   : > { %v2987_v32 = vpop.f32.mrf.mxu1  ;;  %v3046_v14 = vpop.f32.mrf.mxu0 }
 0x5e3   : > { %v3039_v55 = vadd.f32 %v3038_v62, %v2986_v35  ;;  %v2988_v18 = vadd.f32 %v2987_v32, %v2704_v17  ;;  %v3085_v3 = vrot.slane %v3053_v60, 1  ;;  %v8195_v52 = vmax.f32 %v3037_v31, 0.0 }
 0x5e4   : > { %v2991_v33 = vpop.f32.mrf.mxu1  ;;  %v3048_v28 = vpop.f32.mrf.mxu0  ;;  %v3061_v56 = vrot.slane %v3053_v60, 7 }
 0x5e5   : > { %v8192_v39 = vmax.f32 %v3039_v55, 0.0  ;;  %v2992_v10 = vadd.f32 %v2991_v33, %v2700_v11  ;;  %v3041_v43 = vadd.f32 %v3040_v41, %v2988_v18  ;;  %v3062_v6 = vrot.slane %v8195_v52, 7  ;;  %v6711_v33 = vld [vmem:[#allocation15 + $0x260] ss:$8 sps:$4 sm:$0xff]  }
 0x5e6   : > { %v2993_v44 = vpop.f32.mrf.mxu1  ;;  %v3050_v30 = vpop.f32.mrf.mxu0 }
 0x5e7   : > { %v3087_v8 = vrot.slane %v8192_v39, 1  ;;  %v3045_v58 = vadd.f32 %v3044_v40, %v2992_v10  ;;  %v8197_v49 = vmax.f32 %v3041_v43, 0.0  ;;  %v2994_v21 = vadd.f32 %v2993_v44, %v2704_v17  ;;  %v6716_v10 = vld [vmem:[#allocation15 + $0x254] ss:$8 sps:$4 sm:$0xff]   ;;  %v6714_v44 = vld [vmem:[#allocation15 + $0x250] ss:$8 sps:$4 sm:$0xff]  }
 0x5e8   : > { %v2995_v27 = vpop.f32.mrf.mxu1  ;;  %v3111_v0 = vpack.c.bf16 %v8192_v39, %v3053_v60  ;;  %v3063_v4 = vrot.slane %v8192_v39, 7  ;;  %v6713_v60 = vld [vmem:[#allocation15 + $0x264] ss:$8 sps:$4 sm:$0xff]  }
 0x5e9   : > { %v8201_v53 = vsel %vm915_vm0, %v3085_v3, %v3087_v8  ;;  %v3057_v38 = vmax.f32 %v3045_v58, 0.0  ;;  %v2996_v42 = vadd.f32 %v2995_v27, %v2700_v11  ;;  %v3047_v23 = vadd.f32 %v3046_v14, %v2994_v21  ;;  %v6717_v21 = vld [vmem:[#allocation15 + $0x240] ss:$8 sps:$4 sm:$0xff]   ;;  %v6722_v27 = vld [vmem:[#allocation15 + $0x234] ss:$8 sps:$4 sm:$0xff]  }
 0x5ea   : > { %v2997_v34 = vpop.f32.mrf.mxu1  ;;  %v3112_v48 = vpack.c.bf16 %v8197_v49, %v8195_v52  ;;  %v3064_v57 = vrot.slane %v8197_v49, 7  ;;  %v3073_v63 = vsel %vm866_vm2, %v3061_v56, %v3063_v4  ;;  %v3088_v39 = vrot.slane %v8197_v49, 1  ;;  %v6719_v49 = vld [vmem:[#allocation15 + $0x244] ss:$8 sps:$4 sm:$0xff]  }
 0x5eb   : > { %v3089_v2 = vrot.slane %v3057_v38, 1  ;;  %v3049_v22 = vadd.f32 %v3048_v28, %v2996_v42  ;;  %v2998_v20 = vadd.f32 %v2997_v34, %v2704_v17  ;;  %v8210_v59 = vmax.f32 %v3047_v23, 0.0  ;;  %v6725_v42 = vld [vmem:[#allocation15 + $0x224] ss:$8 sps:$4 sm:$0xff]   ;;  %v6723_v23 = vld [vmem:[#allocation15 + $0x220] ss:$8 sps:$4 sm:$0xff]  }
 0x5ec   : > { %3794 = vmatprep.mubr.bf16.mxu0 %v3112_v48  ;;  %v3074_v54 = vsel %vm866_vm2, %v3062_v6, %v3064_v57  ;;  %v3065_v14 = vrot.slane %v3057_v38, 7  ;;  %v6728_v34 = vld [vmem:[#allocation15 + $0x214] ss:$8 sps:$4 sm:$0xff]   ;;  %v6726_v48 = vld [vmem:[#allocation15 + $0x210] ss:$8 sps:$4 sm:$0xff]  }
 0x5ed   : > { %v8208_v29 = vsel %vm915_vm0, %v3087_v8, %v3089_v2  ;;  %v3059_v12 = vmax.f32 %v3049_v22, 0.0  ;;  %v3051_v46 = vadd.f32 %v3050_v30, %v2998_v20  ;;  %3795 = vmatmul.mubr.bf16.vlgmr.msra.gmra.mxu0 %v3111_v0  ;;  %v3066_v9 = vrot.slane %v8210_v59, 7  ;;  %v6729_v0 = vld [vmem:[#allocation15 + $0x200] ss:$8 sps:$4 sm:$0xff]   ;;  %v6732_v22 = vld [vmem:[#allocation15 + $0x2f0] ss:$8 sps:$4 sm:$0xff]  }
 0x5ee   : > { %v5842_v37 = vpack.c.bf16 %v8208_v29, %v8201_v53  ;;  %v3090_v18 = vrot.slane %v8210_v59, 1  ;;  %v6737_v20 = vld [vmem:[#allocation15 + $0x2e4] ss:$8 sps:$4 sm:$0xff]   ;;  %v6735_v30 = vld [vmem:[#allocation15 + $0x2e0] ss:$8 sps:$4 sm:$0xff]  }
 0x5ef   : > { %v3067_v24 = vrot.slane %v3059_v12, 7  ;;  %v3091_v36 = vrot.slane %v3059_v12, 1  ;;  %v8215_v15 = vmax.f32 %v3051_v46, 0.0  ;;  %v3117_v17 = vpack.c.bf16 %v3059_v12, %v3057_v38  ;;  %v6720_v38 = vld [vmem:[#allocation15 + $0x230] ss:$8 sps:$4 sm:$0xff]  }
 0x5f0   : > { %v3072_v32 = vsel %vm866_vm2, %v3064_v57, %v3066_v9  ;;  %v3096_v50 = vsel %vm915_vm0, %v3088_v39, %v3090_v18  ;;  %v6740_v12 = vld [vmem:[#allocation15 + $0x2d4] ss:$8 sps:$4 sm:$0xff]   ;;  %v6738_v46 = vld [vmem:[#allocation15 + $0x2d0] ss:$8 sps:$4 sm:$0xff]   ;;  %v6743_v57 = vld [vmem:[#allocation15 + $0x2c4] ss:$8 sps:$4 sm:$0xff]  }
 0x5f1   : > { %v3068_v11 = vrot.slane %v8215_v15, 7  ;;  %v3118_v19 = vpack.c.bf16 %v8215_v15, %v8210_v59  ;;  %v3075_v26 = vsel %vm866_vm2, %v3067_v24, %v3061_v56  ;;  %v8227_v62 = vsel %vm915_vm0, %v3089_v2, %v3091_v36  ;;  %v6734_v2 = vld [vmem:[#allocation15 + $0x2f4] ss:$8 sps:$4 sm:$0xff]   ;;  %v6744_v56 = vld [vmem:[#allocation15 + $0x2b0] ss:$8 sps:$4 sm:$0xff]  }
 0x5f2   : > { %v8239_v40 = vsel %vm915_vm0, %v3091_v36, %v3085_v3  ;;  %v5826_v35 = vpack.c.bf16 %v3073_v63, %v3075_v26  ;;  %v3069_v43 = vsel %vm866_vm2, %v3065_v14, %v3067_v24  ;;  %v3071_v3 = vsel %vm866_vm2, %v3063_v4, %v3065_v14  ;;  %v6741_v24 = vld [vmem:[#allocation15 + $0x2c0] ss:$8 sps:$4 sm:$0xff]   ;;  %v6746_v36 = vld [vmem:[#allocation15 + $0x2b4] ss:$8 sps:$4 sm:$0xff]   ;;  %v6749_v4 = vld [vmem:[#allocation15 + $0x2a4] ss:$8 sps:$4 sm:$0xff]  }
 0x5f3   : > { %3804 = vmatprep.mubr.bf16.mxu0 %v3118_v19  ;;  %v3076_v51 = vsel %vm866_vm2, %v3068_v11, %v3062_v6  ;;  %v3070_v41 = vsel %vm866_vm2, %v3066_v9, %v3068_v11  ;;  %v5850_v55 = vpack.c.bf16 %v8239_v40, %v8227_v62  ;;  %v5834_v8 = vpack.c.bf16 %v3069_v43, %v3071_v3  ;;  %v6747_v6 = vld [vmem:[#allocation15 + $0x2a0] ss:$8 sps:$4 sm:$0xff]   ;;  %v6752_v9 = vld [vmem:[#allocation15 + $0x294] ss:$8 sps:$4 sm:$0xff]   ;;  %v6750_v11 = vld [vmem:[#allocation15 + $0x290] ss:$8 sps:$4 sm:$0xff]  }
 0x5f4   : > { %v5822_v61 = vpack.c.bf16 %v3074_v54, %v3076_v51  ;;  %v5830_v31 = vpack.c.bf16 %v3070_v41, %v3072_v32  ;;  %v6755_v19 = vld [vmem:[#allocation15 + $0x284] ss:$8 sps:$4 sm:$0xff]   ;;  %v3092_v26 = vrot.slane %v8215_v15, 1  ;;  %v3217_v32 = vld [vmem:[#allocation16] sm:$0x3]  ;;  %vm4198_vm2 = vcmask 130048  }
 0x5f5   : > { %3805 = vmatmul.mubr.bf16.gmra.mxu0 %v3117_v17  ;;  %v6753_v17 = vld [vmem:[#allocation15 + $0x280] ss:$8 sps:$4 sm:$0xff]   ;;  %v3226_v62 = vrot.slane %v3217_v32, %v7777_v16 }
 0x5f6   : > { %5823 = vmatprep.mubr.msk.bf16.mxu1 %vm8161_vm8, %v5822_v61  ;;  %3946 = vmatprep.mubr.bf16.mxu0 %v8485_v25  ;;  %v3086_v25 = vrot.slane %v8195_v52, 1  ;;  %v3094_v54 = vsel %vm915_vm0, %v3090_v18, %v3092_v26  ;;  %v3222_v18 = vrot.slane %v3217_v32, %v7771_v13 }
 0x5f7   : > { %5827 = vmatmul.mubr.msk.bf16.vlgmr.msra.gmra.mxu1 %vm8161_vm8, %v5826_v35 }
 0x5f8   : > { %3816 = vmatpush1.bf16.msra.mxu1 %v6708_v5  ;;  %5831 = vmatprep.mubr.msk.bf16.mxu1 %vm8184_vm13, %v5830_v31  ;;  %v3098_v58 = vsel %vm915_vm0, %v3086_v25, %v3088_v39  ;;  %v3100_v51 = vsel %vm915_vm0, %v3092_v26, %v3086_v25 }
 0x5f9   : > { %3817 = vmatprep.subr.bf16.mxu1 %v6713_v60  ;;  %v5838_v28 = vpack.c.bf16 %v3096_v50, %v3098_v58  ;;  %v5846_v41 = vpack.c.bf16 %v3100_v51, %v3094_v54 }
 0x5fc   : > { %3818 = vmatpush1.bf16.msra.mxu1 %v6711_v33 }
 0x5fd   : > { %3819 = vmatprep.subr.bf16.mxu1 %v6716_v10 }
 0x5ff   : > { %5835 = vmatmul.mubr.msk.bf16.gmra.mxu1 %vm8184_vm13, %v5834_v8 }
 0x600   : > { %3820 = vmatpush1.bf16.msra.mxu1 %v6714_v44  ;;  %5839 = vmatprep.mubr.msk.bf16.mxu1 %vm8148_vm6, %v5838_v28 }
 0x601   : > { %3821 = vmatprep.subr.bf16.mxu1 %v6719_v49 }
 0x604   : > { %3822 = vmatpush1.bf16.msra.mxu1 %v6717_v21 }
 0x605   : > { %3823 = vmatprep.subr.bf16.mxu1 %v6722_v27 }
 0x608   : > { %3824 = vmatpush1.bf16.msra.mxu1 %v6720_v38 }
 0x609   : > { %3825 = vmatprep.subr.bf16.mxu1 %v6725_v42 }
 0x60c   : > { %3826 = vmatpush1.bf16.msra.mxu1 %v6723_v23 }
 0x60d   : > { %3827 = vmatprep.subr.bf16.mxu1 %v6728_v34 }
 0x610   : > { %3828 = vmatpush1.bf16.msra.mxu1 %v6726_v48 }
 0x611   : > { %3829 = vmatprep.subr.bf16.mxu1 %v6731_v45 }
 0x614   : > { %3830 = vmatpush1.bf16.msra.mxu1 %v6729_v0 }
 0x615   : > { %3831 = vmatprep.subr.bf16.mxu1 %v6734_v2 }
 0x618   : > { %3832 = vmatpush2.bf16.msra.mxu1 %v6732_v22 }
 0x619   : > { %3833 = vmatprep.subr.bf16.mxu1 %v6737_v20 }
 0x61c   : > { %3834 = vmatpush2.bf16.msra.mxu1 %v6735_v30 }
 0x61d   : > { %3835 = vmatprep.subr.bf16.mxu1 %v6740_v12 }
 0x620   : > { %3836 = vmatpush2.bf16.msra.mxu1 %v6738_v46 }
 0x621   : > { %3837 = vmatprep.subr.bf16.mxu1 %v6743_v57 }
 0x624   : > { %3838 = vmatpush2.bf16.msra.mxu1 %v6741_v24 }
 0x625   : > { %3839 = vmatprep.subr.bf16.mxu1 %v6746_v36 }
 0x628   : > { %3840 = vmatpush2.bf16.msra.mxu1 %v6744_v56 }
 0x629   : > { %3841 = vmatprep.subr.bf16.mxu1 %v6749_v4 }
 0x62c   : > { %3842 = vmatpush2.bf16.msra.mxu1 %v6747_v6 }
 0x62d   : > { %3843 = vmatprep.subr.bf16.mxu1 %v6752_v9 }
 0x630   : > { %3844 = vmatpush2.bf16.msra.mxu1 %v6750_v11 }
 0x631   : > { %3845 = vmatprep.subr.bf16.mxu1 %v6755_v19 }
 0x634   : > { %3846 = vmatpush2.bf16.msra.mxu1 %v6753_v17 }
 0x637   : > { %5843 = vmatmul.mubr.msk.bf16.vlgmr.msra.gmra.mxu1 %vm8148_vm6, %v5842_v37 }
 0x638   : > { %5847 = vmatprep.mubr.msk.bf16.mxu1 %vm8173_vm11, %v5846_v41 }
 0x63f   : > { %5851 = vmatmul.mubr.msk.bf16.gmra.mxu1 %vm8173_vm11, %v5850_v55 }
 0x6ad   : > { %v3796_v61 = vpop.f32.mrf.mxu0 }
 0x6af   : > { %v3798_v35 = vpop.f32.mrf.mxu0 }
 0x6b1   : > { %v3800_v29 = vpop.f32.mrf.mxu0 }
 0x6b3   : > { %v3802_v37 = vpop.f32.mrf.mxu0 }
 0x6b5   : > { %v3806_v31 = vpop.f32.mrf.mxu0 }
 0x6b7   : > { %v3743_v52 = vpop.f32.mrf.mxu1  ;;  %v3808_v14 = vpop.f32.mrf.mxu0 }
 0x6b8   : > { %v3744_v33 = vadd.f32 %v3743_v52, %v3222_v18 }
 0x6b9   : > { %v3745_v59 = vpop.f32.mrf.mxu1  ;;  %v3810_v8 = vpop.f32.mrf.mxu0 }
 0x6ba   : > { %v3746_v10 = vadd.f32 %v3745_v59, %v3226_v62  ;;  %v3797_v49 = vadd.f32 %v3796_v61, %v3744_v33 }
 0x6bb   : > { %v3747_v15 = vpop.f32.mrf.mxu1  ;;  %v3812_v0 = vpop.f32.mrf.mxu0 }
 0x6bc   : > { %v3748_v50 = vadd.f32 %v3747_v15, %v3222_v18  ;;  %v3799_v13 = vadd.f32 %v3798_v35, %v3746_v10 }
 0x6bd   : > { %v3749_v63 = vpop.f32.mrf.mxu1 }
 0x6be   : > { %v3750_v40 = vadd.f32 %v3749_v63, %v3226_v62  ;;  %v3801_v48 = vadd.f32 %v3800_v29, %v3748_v50  ;;  %v6756_v50 = vld [vmem:[%s8421_s12] sm:$0xff]  }
 0x6bf   : > { %v3753_v5 = vpop.f32.mrf.mxu1 }
 0x6c0   : > { %v3754_v39 = vadd.f32 %v3753_v5, %v3222_v18  ;;  %v3803_v44 = vadd.f32 %v3802_v37, %v3750_v40 }
 0x6c1   : > { %v3755_v53 = vpop.f32.mrf.mxu1 }
 0x6c2   : > { %v3756_v25 = vadd.f32 %v3755_v53, %v3226_v62  ;;  %v3807_v28 = vadd.f32 %v3806_v31, %v3754_v39 }
 0x6c3   : > { %v3757_v47 = vpop.f32.mrf.mxu1 }
 0x6c4   : > { %v3758_v58 = vadd.f32 %v3757_v47, %v3222_v18  ;;  %v3809_v23 = vadd.f32 %v3808_v14, %v3756_v25 }
 0x6c5   : > { %v3759_v60 = vpop.f32.mrf.mxu1 }
 0x6c6   : > { %v3760_v21 = vadd.f32 %v3759_v60, %v3226_v62  ;;  %v3811_v22 = vadd.f32 %v3810_v8, %v3758_v58  ;;  %v6765_v8 = vld [vmem:[#allocation18 + $0x54] ss:$8 sps:$4 sm:$0xff]   ;;  %v6763_v58 = vld [vmem:[#allocation18 + $0x50] ss:$8 sps:$4 sm:$0xff]  }
 0x6c8   : > { %v3813_v46 = vadd.f32 %v3812_v0, %v3760_v21  ;;  %v6771_v21 = vld [vmem:[#allocation18 + $0x34] ss:$8 sps:$4 sm:$0xff]   ;;  %v6786_v0 = vld [vmem:[#allocation18 + $0xe4] ss:$8 sps:$4 sm:$0xff]  }
 0x6f7   : > { %v3849_v7 = vpop.f32.mrf.mxu1 }
 0x6f8   : > { %v3850_v38 = vadd.f32 %v3849_v7, %v3797_v49  ;;  %v6768_v49 = vld [vmem:[#allocation18 + $0x44] ss:$8 sps:$4 sm:$0xff]  }
 0x6f9   : > { %v3851_v55 = vpop.f32.mrf.mxu1 }
 0x6fa   : > { %v3852_v34 = vadd.f32 %v3851_v55, %v3799_v13  ;;  %v3868_v57 = vmax.f32 %v3850_v38, 0.0  ;;  %v6769_v13 = vld [vmem:[#allocation18 + $0x30] ss:$8 sps:$4 sm:$0xff]   ;;  %v6777_v38 = vld [vmem:[#allocation18 + $0x14] ss:$8 sps:$4 sm:$0xff]  }
 0x6fb   : > { %v3853_v43 = vpop.f32.mrf.mxu1 }
 0x6fc   : > { %v3854_v20 = vadd.f32 %v3853_v43, %v3801_v48  ;;  %v3869_v4 = vmax.f32 %v3852_v34, 0.0  ;;  %v3876_v54 = vrot.slane %v3868_v57, 1  ;;  %v6759_v43 = vld [vmem:[#allocation18 + $0x74] ss:$8 sps:$4 sm:$0xff]   ;;  %v6778_v34 = vld [vmem:[#allocation18] ss:$8 sps:$4 sm:$0xff]  }
 0x6fd   : > { %v3855_v3 = vpop.f32.mrf.mxu1  ;;  %v6783_v48 = vld [vmem:[#allocation18 + $0xf4] ss:$8 sps:$4 sm:$0xff]  }
 0x6fe   : > { %v3856_v27 = vadd.f32 %v3855_v3, %v3803_v44  ;;  %v3870_v26 = vmax.f32 %v3854_v20, 0.0  ;;  %v3877_v59 = vrot.slane %v3869_v4, 1  ;;  %v6757_v44 = vld [vmem:[#allocation18 + $0x70] ss:$8 sps:$4 sm:$0xff]   ;;  %v6760_v3 = vld [vmem:[#allocation18 + $0x60] ss:$8 sps:$4 sm:$0xff]  }
 0x6ff   : > { %v3859_v16 = vpop.f32.mrf.mxu1  ;;  %v6787_v20 = vld [vmem:[#allocation18 + $0xd0] ss:$8 sps:$4 sm:$0xff]  }
 0x700   : > { %v3860_v42 = vadd.f32 %v3859_v16, %v3807_v28  ;;  %v3871_v30 = vmax.f32 %v3856_v27, 0.0  ;;  %v3878_v35 = vrot.slane %v3870_v26, 1  ;;  %v6766_v28 = vld [vmem:[#allocation18 + $0x40] ss:$8 sps:$4 sm:$0xff]   ;;  %v6774_v27 = vld [vmem:[#allocation18 + $0x24] ss:$8 sps:$4 sm:$0xff]  }
 0x701   : > { %v3861_v45 = vpop.f32.mrf.mxu1  ;;  %v6772_v16 = vld [vmem:[#allocation18 + $0x20] ss:$8 sps:$4 sm:$0xff]  }
 0x702   : > { %v3862_v2 = vadd.f32 %v3861_v45, %v3809_v23  ;;  %v3872_v24 = vmax.f32 %v3860_v42, 0.0  ;;  %v3879_v17 = vrot.slane %v3871_v30, 1  ;;  %v3888_v7 = vsel %vm915_vm0, %v3876_v54, %v3878_v35  ;;  %v6775_v42 = vld [vmem:[#allocation18 + $0x10] ss:$8 sps:$4 sm:$0xff]   ;;  %v6780_v23 = vld [vmem:[#allocation18 + $0x4] ss:$8 sps:$4 sm:$0xff]  }
 0x703   : > { %v3863_v12 = vpop.f32.mrf.mxu1  ;;  %v3892_v10 = vmax.f32 %v3868_v57, %v3888_v7  ;;  %v6781_v45 = vld [vmem:[#allocation18 + $0xf0] ss:$8 sps:$4 sm:$0xff]  }
 0x704   : > { %v3873_v36 = vmax.f32 %v3862_v2, 0.0  ;;  %v3864_v56 = vadd.f32 %v3863_v12, %v3811_v22  ;;  %v3880_v51 = vrot.slane %v3872_v24, 1  ;;  %v3889_v53 = vsel %vm915_vm0, %v3877_v59, %v3879_v17  ;;  %v6784_v2 = vld [vmem:[#allocation18 + $0xe0] ss:$8 sps:$4 sm:$0xff]   ;;  %v6789_v22 = vld [vmem:[#allocation18 + $0xd4] ss:$8 sps:$4 sm:$0xff]  }
 0x705   : > { %v3865_v6 = vpop.f32.mrf.mxu1  ;;  %v3893_v55 = vmax.f32 %v3869_v4, %v3889_v53  ;;  %v6790_v12 = vld [vmem:[#allocation18 + $0xc0] ss:$8 sps:$4 sm:$0xff]   ;;  %v6793_v57 = vld [vmem:[#allocation18 + $0xb0] ss:$8 sps:$4 sm:$0xff]   ;;  %v6801_v4 = vld [vmem:[#allocation18 + $0x94] ss:$8 sps:$4 sm:$0xff]  }
 0x706   : > { %v3881_v9 = vrot.slane %v3873_v36, 1  ;;  %v3874_v11 = vmax.f32 %v3864_v56, 0.0  ;;  %v3866_v19 = vadd.f32 %v3865_v6, %v3813_v46  ;;  %v3886_v60 = vsel %vm915_vm0, %v3878_v35, %v3880_v51  ;;  %v6795_v46 = vld [vmem:[#allocation18 + $0xb4] ss:$8 sps:$4 sm:$0xff]   ;;  %v6799_v56 = vld [vmem:[#allocation18 + $0x90] ss:$8 sps:$4 sm:$0xff]  }
 0x707   : > { %v3894_v14 = vmax.f32 %v3870_v26, %v3886_v60  ;;  %v6804_v6 = vld [vmem:[#allocation18 + $0x84] ss:$8 sps:$4 sm:$0xff]   ;;  %v4197_v53 = vld [vmem:[%s8422_s13] sm:$0x1]  ;;  %v5889_v7 = vld [vmem:[%s8422_s13 + $0x2] sm:$0x1] }
 0x708   : > { %v3882_v41 = vrot.slane %v3874_v11, 1  ;;  %v3875_v52 = vmax.f32 %v3866_v19, 0.0  ;;  %v3887_v5 = vsel %vm915_vm0, %v3879_v17, %v3881_v9  ;;  %v6806_v60 = vld [vmem:[#allocation19 + $0x38] sm:$0xff]  }
 0x709   : > { %v3895_v62 = vmax.f32 %v3871_v30, %v3887_v5  ;;  %v3902_v25 = vpack.c.bf16 %v3894_v14, %v3892_v10  ;;  %v6792_v30 = vld [vmem:[#allocation18 + $0xc4] ss:$8 sps:$4 sm:$0xff]   ;;  %v6815_v10 = vld [vmem:[#allocation19 + $0x18] sm:$0xff]  }
 0x70a   : > { %v3884_v15 = vsel %vm915_vm0, %v3880_v51, %v3882_v41  ;;  %v3890_v63 = vsel %vm915_vm0, %v3882_v41, %v3876_v54  ;;  %v3883_v61 = vrot.slane %v3875_v52, 1  ;;  %v7265_v41 = vmov 0.0   ;;  %v6812_v14 = vld [vmem:[#allocation19 + $0x20] sm:$0xff]  }
 0x70b   : > { %v3896_v29 = vmax.f32 %v3872_v24, %v3884_v15  ;;  %v3898_v47 = vmax.f32 %v3874_v11, %v3890_v63  ;;  %v3903_v39 = vpack.c.bf16 %v3895_v62, %v3893_v55  ;;  %v6798_v24 = vld [vmem:[#allocation18 + $0xa4] ss:$8 sps:$4 sm:$0xff]   ;;  %6077 = vmatprep.subr.bf16.mxu1 %v7265_v41 }
 0x70c   : > { %v3891_v37 = vsel %vm915_vm0, %v3883_v61, %v3877_v59  ;;  %v3885_v32 = vsel %vm915_vm0, %v3881_v9, %v3883_v61  ;;  %v6802_v9 = vld [vmem:[#allocation18 + $0x80] ss:$8 sps:$4 sm:$0xff]   ;;  %vm7266_vm0 = vmmov 0  }
 0x70d   : > { %v3899_v31 = vmax.f32 %v3875_v52, %v3891_v37  ;;  %v3897_v18 = vmax.f32 %v3873_v36, %v3885_v32  ;;  %v3904_v33 = vpack.c.bf16 %v3898_v47, %v3896_v29  ;;  %v6796_v36 = vld [vmem:[#allocation18 + $0xa0] ss:$8 sps:$4 sm:$0xff]   ;;  %6079 = vmatprep.mubr.msk.bf16.mxu1 %vm7266_vm0, %v7265_v41  ;;  %v5893_v29 = vld [vmem:[%s8422_s13 + $0x4] sm:$0x1]  ;;  %v5887_v37 = vld [vmem:[%s8422_s13 + $0x1] sm:$0x1] }
 0x70e   : > { %v6805_v47 = vld [vmem:[#allocation19 + $0x78] sm:$0xff]   ;;  %v6809_v62 = vld [vmem:[#allocation19 + $0x68] sm:$0xff]   ;;  %v6811_v55 = vld [vmem:[#allocation19 + $0x60] sm:$0xff]  }
 0x70f   : > { %v3905_v40 = vpack.c.bf16 %v3899_v31, %v3897_v18  ;;  %v5897_v32 = vld [vmem:[%s8422_s13 + $0x6] sm:$0x1]  ;;  %v6807_v31 = vld [vmem:[#allocation19 + $0x70] sm:$0xff]  }
 0x710   : > { %v6808_v18 = vld [vmem:[#allocation19 + $0x30] sm:$0xff]  }
 0x711   : > { %3926 = vmatprep.subr.bf16.mxu0 %v3905_v40  ;;  %v6810_v40 = vld [vmem:[#allocation19 + $0x28] sm:$0xff]  }
 0x712   : > { %3927 = vmatpush1.bf16.msra.mxu0 %v3904_v33  ;;  %v6813_v33 = vld [vmem:[#allocation19 + $0x58] sm:$0xff]  }
 0x713   : > { %3928 = vmatprep.subr.bf16.mxu0 %v3903_v39  ;;  %v5891_v39 = vld [vmem:[%s8422_s13 + $0x3] sm:$0x1] }
 0x716   : > { %3929 = vmatpush1.bf16.msra.mxu0 %v3902_v25  ;;  %v5895_v25 = vld [vmem:[%s8422_s13 + $0x5] sm:$0x1] }
 0x717   : > { %4151 = vmatprep.subr.bf16.mxu0 %v6759_v43  ;;  %v6817_v43 = vld [vmem:[#allocation19 + $0x50] sm:$0xff]  }
 0x719   : > { %5853 = vmatmul.mubr.msk.bf16.vlgmr.msra.gmra.mxu0 %vm1012_vm5, %v6756_v50  ;;  %v6814_v50 = vld [vmem:[#allocation19 + $0xf8] sm:$0xff]   ;;  %vm5261_vm5 = vcmask 31744  }
 0x71a   : > { %4152 = vmatpush1.bf16.msra.mxu0 %v6757_v44  ;;  %v5899_v44 = vld [vmem:[%s8422_s13 + $0x7] sm:$0x1] }
 0x71b   : > { %4153 = vmatprep.subr.bf16.mxu0 %v6762_v1  ;;  %v6816_v1 = vld [vmem:[#allocation19 + $0xb8] sm:$0xff]  }
 0x71e   : > { %4154 = vmatpush1.bf16.msra.mxu0 %v6760_v3  ;;  %v6818_v3 = vld [vmem:[#allocation19 + $0xf0] sm:$0xff]  }
 0x71f   : > { %4155 = vmatprep.subr.bf16.mxu0 %v6765_v8  ;;  %v6819_v8 = vld [vmem:[#allocation19 + $0x10] sm:$0xff]  }
 0x722   : > { %4156 = vmatpush1.bf16.msra.mxu0 %v6763_v58  ;;  %v6820_v58 = vld [vmem:[#allocation19 + $0xb0] sm:$0xff]  }
 0x723   : > { %4157 = vmatprep.subr.bf16.mxu0 %v6768_v49  ;;  %v6821_v49 = vld [vmem:[#allocation19 + $0x48] sm:$0xff]  }
 0x726   : > { %4158 = vmatpush1.bf16.msra.mxu0 %v6766_v28  ;;  %v6822_v28 = vld [vmem:[#allocation19 + $0xe8] sm:$0xff]  }
 0x727   : > { %4159 = vmatprep.subr.bf16.mxu0 %v6771_v21  ;;  %v6823_v21 = vld [vmem:[#allocation19 + $0x8] sm:$0xff]  }
 0x72a   : > { %4160 = vmatpush1.bf16.msra.mxu0 %v6769_v13  ;;  %v6824_v13 = vld [vmem:[#allocation19 + $0xa8] sm:$0xff]  }
 0x72b   : > { %4161 = vmatprep.subr.bf16.mxu0 %v6774_v27  ;;  %v6825_v27 = vld [vmem:[#allocation19 + $0x40] sm:$0xff]  }
 0x72e   : > { %4162 = vmatpush1.bf16.msra.mxu0 %v6772_v16  ;;  %v6826_v16 = vld [vmem:[#allocation19 + $0xe0] sm:$0xff]  }
 0x72f   : > { %4163 = vmatprep.subr.bf16.mxu0 %v6777_v38  ;;  %v6827_v38 = vld [vmem:[#allocation19] sm:$0xff]  }
 0x732   : > { %4164 = vmatpush1.bf16.msra.mxu0 %v6775_v42  ;;  %v6828_v42 = vld [vmem:[#allocation19 + $0xa0] sm:$0xff]  }
 0x733   : > { %4165 = vmatprep.subr.bf16.mxu0 %v6780_v23  ;;  %v6829_v23 = vld [vmem:[#allocation19 + $0xd8] sm:$0xff]  }
 0x736   : > { %4166 = vmatpush1.bf16.msra.mxu0 %v6778_v34  ;;  %v6830_v34 = vld [vmem:[#allocation19 + $0x178] sm:$0xff]  }
 0x737   : > { %4167 = vmatprep.subr.bf16.mxu0 %v6783_v48  ;;  %v6831_v48 = vld [vmem:[#allocation19 + $0x98] sm:$0xff]  }
 0x73a   : > { %4168 = vmatpush2.bf16.msra.mxu0 %v6781_v45  ;;  %v6833_v45 = vld [vmem:[#allocation19 + $0xd0] sm:$0xff]  }
 0x73b   : > { %4169 = vmatprep.subr.bf16.mxu0 %v6786_v0  ;;  %v6835_v0 = vld [vmem:[#allocation19 + $0x90] sm:$0xff]  }
 0x73e   : > { %4170 = vmatpush2.bf16.msra.mxu0 %v6784_v2  ;;  %v6837_v2 = vld [vmem:[#allocation19 + $0xc8] sm:$0xff]  }
 0x73f   : > { %4171 = vmatprep.subr.bf16.mxu0 %v6789_v22  ;;  %v6839_v22 = vld [vmem:[#allocation19 + $0x88] sm:$0xff]  }
 0x742   : > { %4172 = vmatpush2.bf16.msra.mxu0 %v6787_v20  ;;  %v6841_v20 = vld [vmem:[#allocation19 + $0xc0] sm:$0xff]  }
 0x743   : > { %4173 = vmatprep.subr.bf16.mxu0 %v6792_v30  ;;  %v6843_v30 = vld [vmem:[#allocation19 + $0x80] sm:$0xff]  }
 0x746   : > { %4174 = vmatpush2.bf16.msra.mxu0 %v6790_v12  ;;  %v6846_v12 = vld [vmem:[#allocation19 + $0x1f8] sm:$0xff]  }
 0x747   : > { %4175 = vmatprep.subr.bf16.mxu0 %v6795_v46  ;;  %v5246_v46 = vld [vmem:[%s731_s4] sm:$0x3] }
 0x748   : > { %5248 = vrot.lane.b32.xlu0 %v5246_v46, %s7267_s5  ;;  %v6864_v46 = vld [vmem:[#allocation19 + $0x190] sm:$0xff]  }
 0x74a   : > { %4176 = vmatpush2.bf16.msra.mxu0 %v6793_v57 }
 0x74b   : > { %4177 = vmatprep.subr.bf16.mxu0 %v6798_v24 }
 0x74e   : > { %4178 = vmatpush2.bf16.msra.mxu0 %v6796_v36 }
 0x74f   : > { %4179 = vmatprep.subr.bf16.mxu0 %v6801_v4 }
 0x752   : > { %4180 = vmatpush2.bf16.msra.mxu0 %v6799_v56 }
 0x753   : > { %4181 = vmatprep.subr.bf16.mxu0 %v6804_v6 }
 0x756   : > { %4182 = vmatpush2.bf16.msra.mxu0 %v6802_v9 }
 0x757   : > { %6101 = vmatprep.subr.bf16.mxu0 %v7265_v41 }
 0x7d9   : > { %v3948_v11 = vpop.f32.mrf.mxu0 }
 0x7db   : > { %v3950_v19 = vpop.f32.mrf.mxu0 }
 0x7dd   : > { %v3952_v26 = vpop.f32.mrf.mxu0 }
 0x7de   : > { %v3957_v51 = vpack.c.bf16 %v3952_v26, %v3948_v11 }
 0x7df   : > { %v3954_v17 = vpop.f32.mrf.mxu0 }
 0x7e0   : > { %v3958_v54 = vpack.c.bf16 %v3954_v17, %v3950_v19 }
 0x7e2   : > { %4183 = vmatprep.mubr.bf16.mxu0 %v3958_v54  ;;  %v6832_v54 = vld [vmem:[#allocation19 + $0x138] sm:$0xff]  }
 0x7e3   : > { %4184 = vmatmul.mubr.bf16.vlgmr.msra.gmra.mxu0 %v3957_v51 }
 0x7e4   : > { %6103 = vmatprep.mubr.msk.bf16.mxu0 %vm7266_vm0, %v7265_v41 }
 0x8a3   : > { %v4185_v52 = vpop.f32.mrf.mxu0 }
 0x8a5   : > { %v4187_v59 = vpop.f32.mrf.mxu0 }
 0x8a6   : > { %v4194_v61 = vmax.f32 %v4185_v52, %v4187_v59  ;;  %v6834_v52 = vld [vmem:[#allocation19 + $0x170] sm:$0xff]  }
 0x8a7   : > { %v4189_v15 = vpop.f32.mrf.mxu0 }
 0x8a9   : > { %v4191_v63 = vpop.f32.mrf.mxu0 }
 0x8aa   : > { %v4195_v5 = vmax.f32 %v4189_v15, %v4191_v63 }
 0x8ac   : > { %v4196_v35 = vpack.c.bf16 %v4195_v5, %v4194_v61  ;;  %v6836_v61 = vld [vmem:[#allocation19 + $0x130] sm:$0xff]  }
 0x8ae   : > { %6078 = vmatpush3.bf16.msra.mxu1 %v4196_v35  ;;  %6102 = vmatpush3.bf16.msra.mxu0 %v4196_v35 }
 0x8af   : > { %6083 = vmatprep.subr.bf16.mxu1 %v7265_v41  ;;  %6113 = vmatprep.subr.bf16.mxu0 %v7265_v41 }
 0x8b1   : > { %6080 = vmatmul.mubr.msk.bf16.vlgmr.msra.gmra.mxu1 %vm4198_vm2, %v4197_v53  ;;  %6104 = vmatmul.mubr.msk.bf16.vlgmr.msra.gmra.mxu0 %vm4198_vm2, %v5893_v29 }
 0x8b2   : > { %6084 = vmatpush3.bf16.msra.mxu1 %v4196_v35  ;;  %6114 = vmatpush3.bf16.msra.mxu0 %v4196_v35 }
 0x8b3   : > { %6085 = vmatprep.mubr.msk.bf16.mxu1 %vm7266_vm0, %v7265_v41  ;;  %6089 = vmatprep.subr.bf16.mxu1 %v7265_v41 }
 0x8b4   : > { %6115 = vmatprep.mubr.msk.bf16.mxu0 %vm7266_vm0, %v7265_v41  ;;  %5989 = vmatprep.subr.bf16.mxu0 %v6805_v47  ;;  %v6840_v47 = vld [vmem:[#allocation19 + $0x128] sm:$0xff]  }
 0x8b9   : > { %6086 = vmatmul.mubr.msk.bf16.vlgmr.msra.gmra.mxu1 %vm4198_vm2, %v5887_v37  ;;  %6116 = vmatmul.mubr.msk.bf16.vlgmr.msra.gmra.mxu0 %vm4198_vm2, %v5897_v32  ;;  %v6842_v32 = vld [vmem:[#allocation19 + $0x160] sm:$0xff]  }
 0x8ba   : > { %6090 = vmatpush3.bf16.msra.mxu1 %v4196_v35  ;;  %6091 = vmatprep.mubr.msk.bf16.mxu1 %vm7266_vm0, %v7265_v41 }
 0x8bb   : > { %6095 = vmatprep.subr.bf16.mxu1 %v7265_v41  ;;  %5990 = vmatpush3.bf16.msra.mxu0 %v6806_v60 }
 0x8bc   : > { %5991 = vmatprep.subr.bf16.mxu0 %v6807_v31  ;;  %v6844_v31 = vld [vmem:[#allocation19 + $0x120] sm:$0xff]  }
 0x8bf   : > { %5992 = vmatpush3.bf16.msra.mxu0 %v6808_v18 }
 0x8c0   : > { %5993 = vmatprep.subr.bf16.mxu0 %v6809_v62  ;;  %v6845_v62 = vld [vmem:[#allocation19 + $0x158] sm:$0xff]  }
 0x8c1   : > { %6092 = vmatmul.mubr.msk.bf16.vlgmr.msra.gmra.mxu1 %vm4198_vm2, %v5889_v7 }
 0x8c2   : > { %6096 = vmatpush3.bf16.msra.mxu1 %v4196_v35  ;;  %6097 = vmatprep.mubr.msk.bf16.mxu1 %vm7266_vm0, %v7265_v41 }
 0x8c3   : > { %6107 = vmatprep.subr.bf16.mxu1 %v7265_v41  ;;  %5994 = vmatpush3.bf16.msra.mxu0 %v6810_v40 }
 0x8c4   : > { %5995 = vmatprep.subr.bf16.mxu0 %v6811_v55  ;;  %v6847_v55 = vld [vmem:[#allocation19 + $0x118] sm:$0xff]  }
 0x8c7   : > { %5996 = vmatpush3.bf16.msra.mxu0 %v6812_v14  ;;  %v6848_v14 = vld [vmem:[#allocation19 + $0x1b8] sm:$0xff]  }
 0x8c8   : > { %5997 = vmatprep.subr.bf16.mxu0 %v6813_v33 }
 0x8c9   : > { %6098 = vmatmul.mubr.msk.bf16.vlgmr.msra.gmra.mxu1 %vm4198_vm2, %v5891_v39  ;;  %v6849_v39 = vld [vmem:[#allocation19 + $0x150] sm:$0xff]  }
 0x8ca   : > { %6108 = vmatpush3.bf16.msra.mxu1 %v4196_v35  ;;  %6109 = vmatprep.mubr.msk.bf16.mxu1 %vm7266_vm0, %v7265_v41 }
 0x8cb   : > { %6119 = vmatprep.subr.bf16.mxu1 %v7265_v41  ;;  %5998 = vmatpush3.bf16.msra.mxu0 %v6815_v10  ;;  %v6850_v10 = vld [vmem:[#allocation19 + $0x1f0] sm:$0xff]  }
 0x8cc   : > { %5999 = vmatprep.subr.bf16.mxu0 %v6817_v43 }
 0x8cf   : > { %6000 = vmatpush3.bf16.msra.mxu0 %v6819_v8 }
 0x8d0   : > { %6001 = vmatprep.subr.bf16.mxu0 %v6821_v49  ;;  %v6855_v49 = vld [vmem:[#allocation19 + $0x108] sm:$0xff]  }
 0x8d1   : > { %6110 = vmatmul.mubr.msk.bf16.vlgmr.msra.gmra.mxu1 %vm4198_vm2, %v5895_v25 }
 0x8d2   : > { %6120 = vmatpush3.bf16.msra.mxu1 %v4196_v35  ;;  %6121 = vmatprep.mubr.msk.bf16.mxu1 %vm7266_vm0, %v7265_v41  ;;  %v6838_v35 = vld [vmem:[#allocation19 + $0x168] sm:$0xff]  }
 0x8d3   : > { %6011 = vmatprep.subr.bf16.mxu1 %v6814_v50  ;;  %6002 = vmatpush3.bf16.msra.mxu0 %v6823_v21  ;;  %v6851_v50 = vld [vmem:[#allocation19 + $0x110] sm:$0xff]  }
 0x8d4   : > { %6003 = vmatprep.subr.bf16.mxu0 %v6825_v27  ;;  %v6858_v27 = vld [vmem:[#allocation19 + $0x1e0] sm:$0xff]  }
 0x8d7   : > { %6004 = vmatpush3.bf16.msra.mxu0 %v6827_v38 }
 0x8d8   : > { %6033 = vmatprep.subr.bf16.mxu0 %v6830_v34  ;;  %v6861_v34 = vld [vmem:[#allocation19 + $0x1d8] sm:$0xff]  }
 0x8d9   : > { %6122 = vmatmul.mubr.msk.bf16.vlgmr.msra.gmra.mxu1 %vm4198_vm2, %v5899_v44  ;;  %v6852_v44 = vld [vmem:[#allocation19 + $0x1b0] sm:$0xff]  }
 0x8da   : > { %6012 = vmatpush3.bf16.msra.mxu1 %v6816_v1  ;;  %v6853_v1 = vld [vmem:[#allocation19 + $0x148] sm:$0xff]  }
 0x8db   : > { %6013 = vmatprep.subr.bf16.mxu1 %v6818_v3  ;;  %v6854_v3 = vld [vmem:[#allocation19 + $0x1e8] sm:$0xff]  }
 0x8de   : > { %6014 = vmatpush3.bf16.msra.mxu1 %v6820_v58 }
 0x8df   : > { %6015 = vmatprep.subr.bf16.mxu1 %v6822_v28  ;;  %v6856_v28 = vld [vmem:[#allocation19 + $0x1a8] sm:$0xff]  }
 0x8e2   : > { %6016 = vmatpush3.bf16.msra.mxu1 %v6824_v13  ;;  %v6857_v13 = vld [vmem:[#allocation19 + $0x140] sm:$0xff]  }
 0x8e3   : > { %6017 = vmatprep.subr.bf16.mxu1 %v6826_v16 }
 0x8e6   : > { %6018 = vmatpush3.bf16.msra.mxu1 %v6828_v42  ;;  %v6859_v42 = vld [vmem:[#allocation19 + $0x100] sm:$0xff]  }
 0x8e7   : > { %6019 = vmatprep.subr.bf16.mxu1 %v6829_v23  ;;  %v6860_v23 = vld [vmem:[#allocation19 + $0x1a0] sm:$0xff]  }
 0x8ea   : > { %6020 = vmatpush3.bf16.msra.mxu1 %v6831_v48 }
 0x8eb   : > { %6021 = vmatprep.subr.bf16.mxu1 %v6833_v45 }
 0x8ee   : > { %6022 = vmatpush3.bf16.msra.mxu1 %v6835_v0 }
 0x8ef   : > { %6023 = vmatprep.subr.bf16.mxu1 %v6837_v2  ;;  %v6862_v2 = vld [vmem:[#allocation19 + $0x198] sm:$0xff]  }
 0x8f2   : > { %6024 = vmatpush3.bf16.msra.mxu1 %v6839_v22 }
 0x8f3   : > { %6025 = vmatprep.subr.bf16.mxu1 %v6841_v20  ;;  %v6863_v20 = vld [vmem:[#allocation19 + $0x1d0] sm:$0xff]  }
 0x8f6   : > { %6026 = vmatpush3.bf16.msra.mxu1 %v6843_v30 }
 0x8f7   : > { %6055 = vmatprep.subr.bf16.mxu1 %v6846_v12 }
 0x971   : > { %v4236_v57 = vpop.f32.mrf.mxu1  ;;  %v8380_v24 = vpop.f32.mrf.mxu0 }
 0x972   : > { %v4557_v51 = vpack.c.bf16 %v4236_v57, %v4236_v57  ;;  %v4561_v45 = vpack.c.bf16 %v8380_v24, %v8380_v24  ;;  %v6865_v57 = vld [vmem:[#allocation19 + $0x1c8] sm:$0xff]   ;;  %v6867_v24 = vld [vmem:[#allocation19 + $0x1c0] sm:$0xff]  }
 0x973   : > { %v6081_v36 = vpop.f32.mrf.mxu1  ;;  %v6105_v56 = vpop.f32.mrf.mxu0 }
 0x974   : > { %v6866_v56 = vld [vmem:[#allocation19 + $0x188] sm:$0xff]  }
 0x975   : > { %v4239_v4 = vpop.f32.mrf.mxu1  ;;  %v4419_v6 = vpop.f32.mrf.mxu0 }
 0x976   : > { %v6868_v4 = vld [vmem:[#allocation19 + $0x180] sm:$0xff]  }
 0x977   : > { %v6082_v9 = vpop.f32.mrf.mxu1  ;;  %v6106_v11 = vpop.f32.mrf.mxu0 }
 0x979   : > { %v4281_v19 = vpop.f32.mrf.mxu1  ;;  %v8382_v26 = vpop.f32.mrf.mxu0 }
 0x97a   : > { %v4558_v17 = vpack.c.bf16 %v4281_v19, %v4281_v19  ;;  %v4563_v6 = vpack.c.bf16 %v8382_v26, %v8382_v26 }
 0x97b   : > { %v6087_v41 = vpop.f32.mrf.mxu1  ;;  %v6117_v59 = vpop.f32.mrf.mxu0 }
 0x97c   : > { %5116 = vmatprep.mubr.bf16.mxu0 %v4558_v17 }
 0x97d   : > { %v4284_v15 = vpop.f32.mrf.mxu1  ;;  %5117 = vmatmul.mubr.bf16.vlgmr.msra.gmra.mxu0 %v4557_v51  ;;  %v4509_v63 = vpop.f32.mrf.mxu0 }
 0x97e   : > { %6034 = vmatpush3.bf16.msra.mxu0 %v6832_v54 }
 0x97f   : > { %v6088_v5 = vpop.f32.mrf.mxu1  ;;  %6035 = vmatprep.subr.bf16.mxu0 %v6834_v52  ;;  %v6118_v53 = vpop.f32.mrf.mxu0 }
 0x981   : > { %v4326_v29 = vpop.f32.mrf.mxu1 }
 0x982   : > { %6036 = vmatpush3.bf16.msra.mxu0 %v6836_v61  ;;  %v4559_v33 = vpack.c.bf16 %v4326_v29, %v4326_v29 }
 0x983   : > { %v6093_v37 = vpop.f32.mrf.mxu1  ;;  %6037 = vmatprep.subr.bf16.mxu0 %v6838_v35  ;;  %v5901_v35 = vld [vmem:[%s8495_s3] ss:$0 sm:$0xff] }
 0x985   : > { %v4329_v60 = vpop.f32.mrf.mxu1 }
 0x986   : > { %6038 = vmatpush3.bf16.msra.mxu0 %v6840_v47 }
 0x987   : > { %v6094_v18 = vpop.f32.mrf.mxu1  ;;  %6039 = vmatprep.subr.bf16.mxu0 %v6842_v32 }
 0x989   : > { %v4371_v7 = vpop.f32.mrf.mxu1 }
 0x98a   : > { %v4560_v40 = vpack.c.bf16 %v4371_v7, %v4371_v7  ;;  %6040 = vmatpush3.bf16.msra.mxu0 %v6844_v31 }
 0x98b   : > { %6041 = vmatprep.subr.bf16.mxu0 %v6845_v62  ;;  %v6099_v43 = vpop.f32.mrf.mxu1 }
 0x98c   : > { %5156 = vmatprep.mubr.bf16.mxu1 %v4560_v40 }
 0x98d   : > { %5157 = vmatmul.mubr.bf16.vlgmr.msra.gmra.mxu1 %v4559_v33  ;;  %v4374_v25 = vpop.f32.mrf.mxu1 }
 0x98e   : > { %6042 = vmatpush3.bf16.msra.mxu0 %v6847_v55  ;;  %6056 = vmatpush3.bf16.msra.mxu1 %v6848_v14  ;;  %v5249_v55 = vpop.permute.xlu0 %5248 }
 0x98f   : > { %6043 = vmatprep.subr.bf16.mxu0 %v6849_v39  ;;  %6057 = vmatprep.subr.bf16.mxu1 %v6850_v10  ;;  %v6100_v8 = vpop.f32.mrf.mxu1 }
 0x991   : > { %v4461_v58 = vpop.f32.mrf.mxu1 }
 0x992   : > { %6044 = vmatpush3.bf16.msra.mxu0 %v6851_v50  ;;  %6058 = vmatpush3.bf16.msra.mxu1 %v6852_v44  ;;  %v4562_v21 = vpack.c.bf16 %v4461_v58, %v4461_v58 }
 0x993   : > { %6045 = vmatprep.subr.bf16.mxu0 %v6853_v1  ;;  %6059 = vmatprep.subr.bf16.mxu1 %v6854_v3  ;;  %v6111_v16 = vpop.f32.mrf.mxu1 }
 0x994   : > { %5196 = vmatprep.mubr.bf16.mxu0 %v4562_v21 }
 0x995   : > { %v4464_v38 = vpop.f32.mrf.mxu1 }
 0x996   : > { %6046 = vmatpush3.bf16.msra.mxu0 %v6855_v49  ;;  %6060 = vmatpush3.bf16.msra.mxu1 %v6856_v28 }
 0x997   : > { %6047 = vmatprep.subr.bf16.mxu0 %v6857_v13  ;;  %6061 = vmatprep.subr.bf16.mxu1 %v6858_v27  ;;  %v6112_v48 = vpop.f32.mrf.mxu1 }
 0x999   : > { %v4551_v0 = vpop.f32.mrf.mxu1 }
 0x99a   : > { %6048 = vmatpush3.bf16.msra.mxu0 %v6859_v42  ;;  %6062 = vmatpush3.bf16.msra.mxu1 %v6860_v23  ;;  %v4564_v22 = vpack.c.bf16 %v4551_v0, %v4551_v0 }
 0x99b   : > { %6063 = vmatprep.subr.bf16.mxu1 %v6861_v34  ;;  %v6123_v30 = vpop.f32.mrf.mxu1 }
 0x99c   : > { %5236 = vmatprep.mubr.bf16.mxu1 %v4564_v22 }
 0x99d   : > { %5197 = vmatmul.mubr.bf16.vlgmr.msra.gmra.mxu0 %v4561_v45  ;;  %v4554_v12 = vpop.f32.mrf.mxu1 }
 0x99e   : > { %6064 = vmatpush3.bf16.msra.mxu1 %v6862_v2 }
 0x99f   : > { %6065 = vmatprep.subr.bf16.mxu1 %v6863_v20  ;;  %v6124_v36 = vpop.f32.mrf.mxu1 }
 0x9a2   : > { %6066 = vmatpush3.bf16.msra.mxu1 %v6864_v46 }
 0x9a3   : > { %6067 = vmatprep.subr.bf16.mxu1 %v6865_v57 }
 0x9a6   : > { %6068 = vmatpush3.bf16.msra.mxu1 %v6866_v56 }
 0x9a7   : > { %6069 = vmatprep.subr.bf16.mxu1 %v6867_v24 }
 0x9aa   : > { %6070 = vmatpush3.bf16.msra.mxu1 %v6868_v4 }
 0x9ad   : > { %5237 = vmatmul.mubr.bf16.vlgmr.msra.gmra.mxu1 %v4563_v6 }
 0xa3d   : > { %v6005_v9 = vpop.f32.mrf.mxu0 }
 0xa3f   : > { %v6006_v11 = vpop.f32.mrf.mxu0 }
 0xa40   : > { %v6007_v5 = vadd.f32 %v6006_v11, %v6005_v9 }
 0xa41   : > { %v6008_v19 = vpop.f32.mrf.mxu0 }
 0xa42   : > { %v5119_v53 = vadd.f32 %v6007_v5, %v5901_v35 }
 0xa43   : > { %v6009_v17 = vpop.f32.mrf.mxu0 }
 0xa4d   : > { %v6027_v54 = vpop.f32.mrf.mxu1 }
 0xa4f   : > { %v6028_v51 = vpop.f32.mrf.mxu1 }
 0xa50   : > { %v6029_v26 = vadd.f32 %v6028_v51, %v6027_v54 }
 0xa51   : > { %v6030_v41 = vpop.f32.mrf.mxu1 }
 0xa52   : > { %v5159_v37 = vadd.f32 %v6029_v26, %v5119_v53 }
 0xa53   : > { %v6031_v52 = vpop.f32.mrf.mxu1 }
 0xa5d   : > { %v6049_v59 = vpop.f32.mrf.mxu0 }
 0xa5f   : > { %v6050_v15 = vpop.f32.mrf.mxu0 }
 0xa60   : > { %v6051_v29 = vadd.f32 %v6050_v15, %v6049_v59 }
 0xa61   : > { %v6052_v63 = vpop.f32.mrf.mxu0 }
 0xa62   : > { %v5199_v60 = vadd.f32 %v6051_v29, %v5159_v37 }
 0xa63   : > { %v6053_v61 = vpop.f32.mrf.mxu0 }
 0xa6d   : > { %v6071_v47 = vpop.f32.mrf.mxu1 }
 0xa6f   : > { %v6072_v32 = vpop.f32.mrf.mxu1 }
 0xa70   : > { %v6073_v31 = vadd.f32 %v6072_v32, %v6071_v47 }
 0xa71   : > { %v6074_v18 = vpop.f32.mrf.mxu1 }
 0xa72   : > { %v5239_v62 = vadd.f32 %v6073_v31, %v5199_v60 }
 0xa73   : > { %v6075_v7 = vpop.f32.mrf.mxu1 }
 0xa74   : > { %v5244_v40 = vmul.f32 1.442695, %v5239_v62 }
 0xa76   : > { %6869 = vpow2.f32 %v5244_v40 }
 0xa83   : > { %v6870_v14 = vpop.eup %6869 }
 0xa84   : > { %v5251_v33 = vmul.f32 %v6870_v14, %v5249_v55 }
 0xa86   : > { %5253 = vrot.lane.b32.xlu1 %v5251_v33, %s7268_s30 }
 0xaf8   : > { %v5254_v39 = vpop.permute.xlu1 %5253 }
 0xaf9   : > { %v5256_v10 = vadd.f32 %v5254_v39, %v5239_v62 }
 0xafb   : > { %5258 = vrot.lane.b32.xlu0 %v5256_v10, %s7269_s18 }
 0xb6d   : > { %v5259_v43 = vpop.permute.xlu0 %5258 }
 0xb6e   : > { %v5262_v25 = vsel %vm5261_vm5, %v5239_v62, %v5259_v43 }
 0xb6f   : > { %v5264_v50 = vsel %vm5263_vm10, %v5262_v25, %v5239_v62 }
 0xb70   : > { %5265 = vst [vmem:[%s735_s21] sm:$0x3] %v5264_v50 }
 0xb71 PF: > { %p33_p9 = scmp.ge.s32.totalorder %s7514_s19, 4   ;;  %s8497_s24 = smov %s7235_s25 }
 0xb72   : > { %s8498_s25 = smov %s7239_s26  ;;  %s8499_s26 = smov %s7525_s23 }
 0xb73   : > { %s8500_s27 = smov %s7514_s19  ;;  %35 = sbr.rel (!%p33_p9) target bundleno = 19 (0x13), region = 182 }
 0xb78   :  { %5285 = vsyncpa [#allocation3], 1 }
 0xb79   :  { %5287 = vsyncpa [#allocation3 + $0x1], 1 }
 0xb7a   :  { %5288 = vsyncpa [#allocation5], 1 }
 0xb7b   :  { %5289 = vsyncpa [#allocation8], 1 }
 0xb7c   :  { %5290 = vsyncpa [#allocation11], 1 }
 0xb7d   :  { %5291 = vsyncpa [#allocation14], 1 }
 0xb7e   :  { %5292 = vsyncpa [#allocation17], 1 }
 0xb7f   :  { %5293 = vsyncpa [#allocation20], 1 }

</bundles_post_ra>
